<compile_context>
chip_gen: v6e
topology: v6e:2x2x1
jax: 0.10.0
libtpu: 0.0.40
codegen_flags: <defaults>
</compile_context>

<pallas_src>
import jax
import jax.numpy as jnp
from jax import lax
from jax.experimental import pallas as pl
from jax.experimental.pallas import tpu as pltpu

KH = KW = 4
STRIDE = 2
PAD = 1


# --------------------------------------------------------------------------- #
# Kernel                                                                      #
# --------------------------------------------------------------------------- #
def _upsample_poly_kernel(x_ref, w_ref, b_ref, o_ref, cols_ref):
    """One (batch, row-tile) step of the polyphase ConvTranspose2d.

    x_ref    : (1, H+2, W+2, Cin) bf16  ZERO-padded input image (resident per batch)
    w_ref    : (4, 4*Cin, Cout)   bf16  per-phase folded (spatially flipped) weights
    b_ref    : (1, Cout)          f32   bias
    o_ref    : (1, TH, 2, 2*W, Cout)    phase-interleaved output rows [y, py, wo]
    cols_ref : (TH*W, 4*Cin)      bf16  single reused im2col staging scratch
    """
    th = o_ref.shape[1]
    w2 = o_ref.shape[3]
    wdim = w2 // 2
    cin = x_ref.shape[3]
    cout = o_ref.shape[4]
    m = th * wdim

    r = pl.program_id(1)
    hint = th & -th                       # largest power of two dividing th
    row0 = pl.multiple_of(r * th, hint)   # first halo row of this row tile

    # Hoist the W-axis (sublane) shift: 3 shifted planes of the TH+2 halo rows
    # instead of 9/16 shifted windows.  Per-tap H shifts below are cheap
    # leading-dim slices of these planes.
    planes = [x_ref[0, pl.ds(row0, th + 2), pl.ds(rx, wdim), :] for rx in range(3)]

    bias = b_ref[...]                                            # (1, Cout) f32
    for py in range(2):
        halves = []
        for px in range(2):
            # Stage this phase's 4 taps into the single reused cols scratch.
            for dy in range(2):
                for dx in range(2):
                    t = 2 * dy + dx
                    cols_ref[:, t * cin:(t + 1) * cin] = (
                        planes[px + dx][py + dy:py + dy + th].reshape(m, cin))
            acc = jnp.dot(cols_ref[...], w_ref[2 * py + px],
                          preferred_element_type=jnp.float32)    # (M, Cout) f32
            halves.append((acc + bias).astype(o_ref.dtype))
        # Interleave the two W parities: rows 2j/2j+1 of (2M, Cout) come from
        # px=0/px=1 -> pure row-major regroup into (TH, 2W, Cout).
        inter = jnp.stack(halves, axis=1).reshape(th, w2, cout)
        o_ref[0, :, py, :, :] = inter


# --------------------------------------------------------------------------- #
# Wrapper helpers                                                             #
# --------------------------------------------------------------------------- #
def _fold_phase_weights(weight):
    """(Cin, Cout, 4, 4) PyTorch ConvTranspose2d weight -> (4, 4*Cin, Cout) bf16.

    For output parity (py, px) and tap (dy, dx) the contributing (flipped)
    kernel element is weight[:, :, 3-py-2*dy, 3-px-2*dx]; taps are stacked
    along K in (dy, dx) row-major order to match the kernel's staging order.
    """
    w_list = []
    for py in range(2):
        for px in range(2):
            taps = [weight[:, :, 3 - py - 2 * dy, 3 - px - 2 * dx]   # (Cin, Cout)
                    for dy in range(2) for dx in range(2)]
            w_list.append(jnp.concatenate(taps, axis=0))             # (4*Cin, Cout)
    return jnp.stack(w_list, axis=0).astype(jnp.bfloat16)            # (4, 4*Cin, Cout)


def _vmem_limit_bytes():
    """Per-generation VMEM limit: ~48 MiB on v7x (64 MiB phys), ~100 MiB on v5e/v6e."""
    cap = 64 * 1024 * 1024          # conservative fallback = v7x physical VMEM / TC
    try:
        cap = int(pltpu.get_tpu_info().vmem_capacity_bytes)
    except Exception:
        pass
    return max(32 * 1024 * 1024, min(cap - 16 * 1024 * 1024, 100 * 1024 * 1024))


def _choose_row_tile(H, W, cin, cout, out_itemsize, vmem_limit_bytes):
    """Largest TH dividing H whose per-step working set fits the VMEM budget."""
    per_row = (2 * 4 * W * cout * out_itemsize      # double-buffered output block
               + 4 * W * cin * 2                    # im2col scratch (bf16)
               + 3 * W * cin * 2                    # 3 W-shifted planes (bf16)
               + 3 * 4 * W * cout * 4)              # f32 GEMM/interleave temporaries
    fixed = (2 * (H + 2) * (W + 2) * cin * 2        # resident zero-padded input (2 bufs)
             + 2 * 16 * cin * cout * 2              # folded weights (2 bufs, worst case)
             + 2 * cout * 4)                        # bias
    budget = int(0.6 * vmem_limit_bytes) - fixed
    th = 1
    for cand in range(1, min(H, 64) + 1):
        if H % cand == 0 and cand * per_row <= budget:
            th = cand
    if H >= 16:                                     # keep >=2 row steps per image
        th = min(th, H // 2)
    return max(th, 1)


# --------------------------------------------------------------------------- #
# Public entry points                                                         #
# --------------------------------------------------------------------------- #
def upsample_conv_transpose2d_nhwc(x_nhwc, weight, bias, *, out_dtype=jnp.float32):
    """ConvTranspose2d(k=4, s=2, p=1), NHWC in -> NHWC out (no layout passes)."""
    N, H, W, Cin = x_nhwc.shape
    assert weight.shape[0] == Cin and weight.shape[2:] == (KH, KW)
    Cout = weight.shape[1]

    # ZERO padding (what k=4/s=2/p=1 ConvTranspose2d requires); XLA fuses the
    # bf16 cast + pad into a single pass over the (small) input stream.
    x_pad = jnp.pad(x_nhwc.astype(jnp.bfloat16), ((0, 0), (1, 1), (1, 1), (0, 0)))

    w_ph = _fold_phase_weights(weight)                       # (4, 4*Cin, Cout) bf16
    b2 = bias.reshape(1, Cout).astype(jnp.float32)

    vmem_limit = _vmem_limit_bytes()
    th = _choose_row_tile(H, W, Cin, Cout, jnp.dtype(out_dtype).itemsize, vmem_limit)
    grid = (N, H // th)

    out5 = pl.pallas_call(
        _upsample_poly_kernel,
        out_shape=jax.ShapeDtypeStruct((N, H, 2, 2 * W, Cout), out_dtype),
        grid=grid,
        in_specs=[
            # Resident per batch element: block index ignores the row axis, so
            # the padded image is DMA'd once per image (it is the small stream).
            pl.BlockSpec((1, H + 2, W + 2, Cin), lambda n, r: (n, 0, 0, 0)),
            # Constant block indices -> fetched once, copies elided afterwards.
            pl.BlockSpec((4, 4 * Cin, Cout), lambda n, r: (0, 0, 0)),
            pl.BlockSpec((1, Cout), lambda n, r: (0, 0)),
        ],
        out_specs=pl.BlockSpec((1, th, 2, 2 * W, Cout), lambda n, r: (n, r, 0, 0, 0)),
        scratch_shapes=[pltpu.VMEM((th * W, 4 * Cin), jnp.bfloat16)],
        compiler_params=pltpu.CompilerParams(
            dimension_semantics=("parallel", "parallel"),
            vmem_limit_bytes=vmem_limit,
        ),
    )(x_pad, w_ph, b2)

    # Free reshape (adjacent dims merge): (N, H, 2, 2W, C) -> NHWC (N, 2H, 2W, C).
    return out5.reshape(N, 2 * H, 2 * W, Cout)


def upsample_conv_transpose2d(x_nchw, weight, bias, *, scale_factor=2,
                              out_dtype=jnp.float32):
    """PyTorch-contract wrapper: NCHW in/out, weight (Cin, Cout, 4, 4), f32 out."""
    assert scale_factor == STRIDE
    N, Cin, H, W = x_nchw.shape
    assert weight.shape[0] == Cin and weight.shape[2:] == (KH, KW)
    x_nhwc = jnp.transpose(x_nchw, (0, 2, 3, 1))
    out_nhwc = upsample_conv_transpose2d_nhwc(x_nhwc, weight, bias,
                                              out_dtype=out_dtype)
    return jnp.transpose(out_nhwc, (0, 3, 1, 2))             # NHWC -> NCHW


# --------------------------------------------------------------------------- #
# Demo / correctness check                                                    #
# --------------------------------------------------------------------------- #
if __name__ == "__main__":
    key = jax.random.PRNGKey(0)
    kx, kw_, kb = jax.random.split(key, 3)

    # Smallest channel count used by the module's decoder Upsample layers (128),
    # small spatial size.
    N, Cin, Cout, H, W = 2, 128, 128, 8, 8
    x = jax.random.normal(kx, (N, Cin, H, W), jnp.float32)

    # PyTorch parameter shapes: weight (Cin, Cout, 4, 4), bias (Cout,)
    fan = Cin * KH * KW
    weight = jax.random.uniform(kw_, (Cin, Cout, KH, KW), jnp.float32,
                                minval=-1.0, maxval=1.0) / jnp.sqrt(float(fan))
    bias = jax.random.uniform(kb, (Cout,), jnp.float32, minval=-0.1, maxval=0.1)

    out = jax.jit(upsample_conv_transpose2d)(x, weight, bias)
    out = jax.block_until_ready(out)
    assert out.shape == (N, Cout, 2 * H, 2 * W), out.shape
    assert out.dtype == jnp.float32

    # Reference: ConvTranspose2d == lhs-dilated conv with spatially flipped
    # weights.  Inputs rounded to bf16 (the kernel's MXU dtype), f32 accumulate.
    xq = x.astype(jnp.bfloat16).astype(jnp.float32)
    wq = weight.astype(jnp.bfloat16).astype(jnp.float32)
    rhs = jnp.transpose(jnp.flip(wq, (2, 3)), (1, 0, 2, 3))           # (Cout, Cin, 4, 4)
    ref = lax.conv_general_dilated(
        xq, rhs,
        window_strides=(1, 1),
        padding=[(KH - 1 - PAD,) * 2, (KW - 1 - PAD,) * 2],
        lhs_dilation=(STRIDE, STRIDE),
        dimension_numbers=("NCHW", "OIHW", "NCHW"),
        precision=lax.Precision.HIGHEST,
    ) + bias[None, :, None, None]

    err = float(jnp.max(jnp.abs(out - ref)))
    assert jnp.allclose(out, ref, atol=2e-3, rtol=2e-3), err

    print("KERNEL_OK")
</pallas_src>

<mosaic_0001>
module attributes {stable_mosaic.version = 11 : i64} {
  func.func @_upsample_poly_kernel(%arg0: i32, %arg1: i32, %arg2: memref<1x10x10x128xbf16, #tpu.memory_space<vmem>>, %arg3: memref<4x512x128xbf16, #tpu.memory_space<vmem>>, %arg4: memref<1x128xf32, #tpu.memory_space<vmem>>, %arg5: memref<1x8x2x16x128xf32, #tpu.memory_space<vmem>>, %arg6: memref<64x512xbf16, #tpu.memory_space<vmem>>) attributes {dimension_semantics = [#tpu.dimension_semantics<parallel>, #tpu.dimension_semantics<parallel>], iteration_bounds = array<i64: 2, 1>, scalar_prefetch = 0 : i64, scratch_operands = 1 : i64, tpu.core_type = #tpu.core_type<tc>, window_params = [{transform_indices = @transform_0, window_bounds = array<i64: 1, 10, 10, 128>}, {pipeline_mode = #tpu.pipeline_mode<synchronous>, transform_indices = @transform_1, window_bounds = array<i64: 4, 512, 128>}, {pipeline_mode = #tpu.pipeline_mode<synchronous>, transform_indices = @transform_2, window_bounds = array<i64: 1, 128>}, {transform_indices = @transform_3, window_bounds = array<i64: 1, 8, 2, 16, 128>}]} {
    %c8_i32 = arith.constant 8 : i32
    %0 = arith.muli %arg1, %c8_i32 : i32
    %1 = tpu.assume_multiple %0, 8 : i32
    %c0 = arith.constant 0 : index
    %2 = arith.index_cast %1 : i32 to index
    %c0_0 = arith.constant 0 : index
    %c0_1 = arith.constant 0 : index
    %3 = vector.load %arg2[%c0, %2, %c0_0, %c0_1] : memref<1x10x10x128xbf16, #tpu.memory_space<vmem>>, vector<1x10x8x128xbf16>
    %4 = vector.shape_cast %3 : vector<1x10x8x128xbf16> to vector<10x8x128xbf16>
    %c0_2 = arith.constant 0 : index
    %5 = arith.index_cast %1 : i32 to index
    %c1 = arith.constant 1 : index
    %c0_3 = arith.constant 0 : index
    %6 = vector.load %arg2[%c0_2, %5, %c1, %c0_3] : memref<1x10x10x128xbf16, #tpu.memory_space<vmem>>, vector<1x10x8x128xbf16>
    %7 = vector.shape_cast %6 : vector<1x10x8x128xbf16> to vector<10x8x128xbf16>
    %c0_4 = arith.constant 0 : index
    %8 = arith.index_cast %1 : i32 to index
    %c2 = arith.constant 2 : index
    %c0_5 = arith.constant 0 : index
    %9 = vector.load %arg2[%c0_4, %8, %c2, %c0_5] : memref<1x10x10x128xbf16, #tpu.memory_space<vmem>>, vector<1x10x8x128xbf16>
    %10 = vector.shape_cast %9 : vector<1x10x8x128xbf16> to vector<10x8x128xbf16>
    %c0_6 = arith.constant 0 : index
    %c0_7 = arith.constant 0 : index
    %11 = vector.load %arg4[%c0_6, %c0_7] : memref<1x128xf32, #tpu.memory_space<vmem>>, vector<1x128xf32>
    %12 = vector.extract_strided_slice %4 {offsets = [0, 0, 0], sizes = [8, 8, 128], strides = [1, 1, 1]} : vector<10x8x128xbf16> to vector<8x8x128xbf16>
    %13 = vector.shape_cast %12 : vector<8x8x128xbf16> to vector<64x128xbf16>
    %c0_8 = arith.constant 0 : index
    %c0_9 = arith.constant 0 : index
    %14 = vector.load %arg6[%c0_8, %c0_9] : memref<64x512xbf16, #tpu.memory_space<vmem>>, vector<64x128xbf16>
    tpu.vector_store %arg6[%c0_8, %c0_9], %13 {strides = array<i32>} : memref<64x512xbf16, #tpu.memory_space<vmem>>, vector<64x128xbf16>,
    %15 = vector.extract_strided_slice %7 {offsets = [0, 0, 0], sizes = [8, 8, 128], strides = [1, 1, 1]} : vector<10x8x128xbf16> to vector<8x8x128xbf16>
    %16 = vector.shape_cast %15 : vector<8x8x128xbf16> to vector<64x128xbf16>
    %c0_10 = arith.constant 0 : index
    %c128 = arith.constant 128 : index
    %17 = vector.load %arg6[%c0_10, %c128] : memref<64x512xbf16, #tpu.memory_space<vmem>>, vector<64x128xbf16>
    tpu.vector_store %arg6[%c0_10, %c128], %16 {strides = array<i32>} : memref<64x512xbf16, #tpu.memory_space<vmem>>, vector<64x128xbf16>,
    %18 = vector.extract_strided_slice %4 {offsets = [1, 0, 0], sizes = [8, 8, 128], strides = [1, 1, 1]} : vector<10x8x128xbf16> to vector<8x8x128xbf16>
    %19 = vector.shape_cast %18 : vector<8x8x128xbf16> to vector<64x128xbf16>
    %c0_11 = arith.constant 0 : index
    %c256 = arith.constant 256 : index
    %20 = vector.load %arg6[%c0_11, %c256] : memref<64x512xbf16, #tpu.memory_space<vmem>>, vector<64x128xbf16>
    tpu.vector_store %arg6[%c0_11, %c256], %19 {strides = array<i32>} : memref<64x512xbf16, #tpu.memory_space<vmem>>, vector<64x128xbf16>,
    %21 = vector.extract_strided_slice %7 {offsets = [1, 0, 0], sizes = [8, 8, 128], strides = [1, 1, 1]} : vector<10x8x128xbf16> to vector<8x8x128xbf16>
    %22 = vector.shape_cast %21 : vector<8x8x128xbf16> to vector<64x128xbf16>
    %c0_12 = arith.constant 0 : index
    %c384 = arith.constant 384 : index
    %23 = vector.load %arg6[%c0_12, %c384] : memref<64x512xbf16, #tpu.memory_space<vmem>>, vector<64x128xbf16>
    tpu.vector_store %arg6[%c0_12, %c384], %22 {strides = array<i32>} : memref<64x512xbf16, #tpu.memory_space<vmem>>, vector<64x128xbf16>,
    %c0_13 = arith.constant 0 : index
    %c0_14 = arith.constant 0 : index
    %24 = vector.load %arg6[%c0_13, %c0_14] : memref<64x512xbf16, #tpu.memory_space<vmem>>, vector<64x512xbf16>
    %c0_15 = arith.constant 0 : index
    %c0_16 = arith.constant 0 : index
    %c0_17 = arith.constant 0 : index
    %25 = vector.load %arg3[%c0_15, %c0_16, %c0_17] : memref<4x512x128xbf16, #tpu.memory_space<vmem>>, vector<1x512x128xbf16>
    %26 = vector.shape_cast %25 : vector<1x512x128xbf16> to vector<512x128xbf16>
    %cst = arith.constant dense<0.000000e+00> : vector<64x128xf32>
    %27 = tpu.matmul %24, %26, %cst {dimension_numbers = #tpu.dot_dimension_numbers<[1], [0], [0], [1], [0, 0, 1, 1], [], []>} : vector<64x512xbf16>, vector<512x128xbf16>, vector<64x128xf32> -> vector<64x128xf32>
    %28 = vector.broadcast %11 : vector<1x128xf32> to vector<64x128xf32>
    %29 = arith.addf %27, %28 : vector<64x128xf32>
    %30 = vector.extract_strided_slice %7 {offsets = [0, 0, 0], sizes = [8, 8, 128], strides = [1, 1, 1]} : vector<10x8x128xbf16> to vector<8x8x128xbf16>
    %31 = vector.shape_cast %30 : vector<8x8x128xbf16> to vector<64x128xbf16>
    %c0_18 = arith.constant 0 : index
    %c0_19 = arith.constant 0 : index
    %32 = vector.load %arg6[%c0_18, %c0_19] : memref<64x512xbf16, #tpu.memory_space<vmem>>, vector<64x128xbf16>
    tpu.vector_store %arg6[%c0_18, %c0_19], %31 {strides = array<i32>} : memref<64x512xbf16, #tpu.memory_space<vmem>>, vector<64x128xbf16>,
    %33 = vector.extract_strided_slice %10 {offsets = [0, 0, 0], sizes = [8, 8, 128], strides = [1, 1, 1]} : vector<10x8x128xbf16> to vector<8x8x128xbf16>
    %34 = vector.shape_cast %33 : vector<8x8x128xbf16> to vector<64x128xbf16>
    %c0_20 = arith.constant 0 : index
    %c128_21 = arith.constant 128 : index
    %35 = vector.load %arg6[%c0_20, %c128_21] : memref<64x512xbf16, #tpu.memory_space<vmem>>, vector<64x128xbf16>
    tpu.vector_store %arg6[%c0_20, %c128_21], %34 {strides = array<i32>} : memref<64x512xbf16, #tpu.memory_space<vmem>>, vector<64x128xbf16>,
    %36 = vector.extract_strided_slice %7 {offsets = [1, 0, 0], sizes = [8, 8, 128], strides = [1, 1, 1]} : vector<10x8x128xbf16> to vector<8x8x128xbf16>
    %37 = vector.shape_cast %36 : vector<8x8x128xbf16> to vector<64x128xbf16>
    %c0_22 = arith.constant 0 : index
    %c256_23 = arith.constant 256 : index
    %38 = vector.load %arg6[%c0_22, %c256_23] : memref<64x512xbf16, #tpu.memory_space<vmem>>, vector<64x128xbf16>
    tpu.vector_store %arg6[%c0_22, %c256_23], %37 {strides = array<i32>} : memref<64x512xbf16, #tpu.memory_space<vmem>>, vector<64x128xbf16>,
    %39 = vector.extract_strided_slice %10 {offsets = [1, 0, 0], sizes = [8, 8, 128], strides = [1, 1, 1]} : vector<10x8x128xbf16> to vector<8x8x128xbf16>
    %40 = vector.shape_cast %39 : vector<8x8x128xbf16> to vector<64x128xbf16>
    %c0_24 = arith.constant 0 : index
    %c384_25 = arith.constant 384 : index
    %41 = vector.load %arg6[%c0_24, %c384_25] : memref<64x512xbf16, #tpu.memory_space<vmem>>, vector<64x128xbf16>
    tpu.vector_store %arg6[%c0_24, %c384_25], %40 {strides = array<i32>} : memref<64x512xbf16, #tpu.memory_space<vmem>>, vector<64x128xbf16>,
    %c0_26 = arith.constant 0 : index
    %c0_27 = arith.constant 0 : index
    %42 = vector.load %arg6[%c0_26, %c0_27] : memref<64x512xbf16, #tpu.memory_space<vmem>>, vector<64x512xbf16>
    %c1_28 = arith.constant 1 : index
    %c0_29 = arith.constant 0 : index
    %c0_30 = arith.constant 0 : index
    %43 = vector.load %arg3[%c1_28, %c0_29, %c0_30] : memref<4x512x128xbf16, #tpu.memory_space<vmem>>, vector<1x512x128xbf16>
    %44 = vector.shape_cast %43 : vector<1x512x128xbf16> to vector<512x128xbf16>
    %cst_31 = arith.constant dense<0.000000e+00> : vector<64x128xf32>
    %45 = tpu.matmul %42, %44, %cst_31 {dimension_numbers = #tpu.dot_dimension_numbers<[1], [0], [0], [1], [0, 0, 1, 1], [], []>} : vector<64x512xbf16>, vector<512x128xbf16>, vector<64x128xf32> -> vector<64x128xf32>
    %46 = vector.broadcast %11 : vector<1x128xf32> to vector<64x128xf32>
    %47 = arith.addf %45, %46 : vector<64x128xf32>
    %48 = vector.shape_cast %29 : vector<64x128xf32> to vector<64x1x128xf32>
    %49 = vector.shape_cast %47 : vector<64x128xf32> to vector<64x1x128xf32>
    %50 = tpu.concatenate %48, %49 in 1 : vector<64x1x128xf32>, vector<64x1x128xf32> -> vector<64x2x128xf32>
    %51 = vector.shape_cast %50 : vector<64x2x128xf32> to vector<8x16x128xf32>
    %c0_32 = arith.constant 0 : index
    %c0_33 = arith.constant 0 : index
    %c0_34 = arith.constant 0 : index
    %c0_35 = arith.constant 0 : index
    %c0_36 = arith.constant 0 : index
    %52 = vector.load %arg5[%c0_32, %c0_33, %c0_34, %c0_35, %c0_36] : memref<1x8x2x16x128xf32, #tpu.memory_space<vmem>>, vector<1x8x1x16x128xf32>
    %53 = vector.shape_cast %52 : vector<1x8x1x16x128xf32> to vector<8x16x128xf32>
    %54 = vector.shape_cast %51 : vector<8x16x128xf32> to vector<1x8x1x16x128xf32>
    tpu.vector_store %arg5[%c0_32, %c0_33, %c0_34, %c0_35, %c0_36], %54 {strides = array<i32>} : memref<1x8x2x16x128xf32, #tpu.memory_space<vmem>>, vector<1x8x1x16x128xf32>,
    %55 = vector.extract_strided_slice %4 {offsets = [1, 0, 0], sizes = [8, 8, 128], strides = [1, 1, 1]} : vector<10x8x128xbf16> to vector<8x8x128xbf16>
    %56 = vector.shape_cast %55 : vector<8x8x128xbf16> to vector<64x128xbf16>
    %c0_37 = arith.constant 0 : index
    %c0_38 = arith.constant 0 : index
    %57 = vector.load %arg6[%c0_37, %c0_38] : memref<64x512xbf16, #tpu.memory_space<vmem>>, vector<64x128xbf16>
    tpu.vector_store %arg6[%c0_37, %c0_38], %56 {strides = array<i32>} : memref<64x512xbf16, #tpu.memory_space<vmem>>, vector<64x128xbf16>,
    %58 = vector.extract_strided_slice %7 {offsets = [1, 0, 0], sizes = [8, 8, 128], strides = [1, 1, 1]} : vector<10x8x128xbf16> to vector<8x8x128xbf16>
    %59 = vector.shape_cast %58 : vector<8x8x128xbf16> to vector<64x128xbf16>
    %c0_39 = arith.constant 0 : index
    %c128_40 = arith.constant 128 : index
    %60 = vector.load %arg6[%c0_39, %c128_40] : memref<64x512xbf16, #tpu.memory_space<vmem>>, vector<64x128xbf16>
    tpu.vector_store %arg6[%c0_39, %c128_40], %59 {strides = array<i32>} : memref<64x512xbf16, #tpu.memory_space<vmem>>, vector<64x128xbf16>,
    %61 = vector.extract_strided_slice %4 {offsets = [2, 0, 0], sizes = [8, 8, 128], strides = [1, 1, 1]} : vector<10x8x128xbf16> to vector<8x8x128xbf16>
    %62 = vector.shape_cast %61 : vector<8x8x128xbf16> to vector<64x128xbf16>
    %c0_41 = arith.constant 0 : index
    %c256_42 = arith.constant 256 : index
    %63 = vector.load %arg6[%c0_41, %c256_42] : memref<64x512xbf16, #tpu.memory_space<vmem>>, vector<64x128xbf16>
    tpu.vector_store %arg6[%c0_41, %c256_42], %62 {strides = array<i32>} : memref<64x512xbf16, #tpu.memory_space<vmem>>, vector<64x128xbf16>,
    %64 = vector.extract_strided_slice %7 {offsets = [2, 0, 0], sizes = [8, 8, 128], strides = [1, 1, 1]} : vector<10x8x128xbf16> to vector<8x8x128xbf16>
    %65 = vector.shape_cast %64 : vector<8x8x128xbf16> to vector<64x128xbf16>
    %c0_43 = arith.constant 0 : index
    %c384_44 = arith.constant 384 : index
    %66 = vector.load %arg6[%c0_43, %c384_44] : memref<64x512xbf16, #tpu.memory_space<vmem>>, vector<64x128xbf16>
    tpu.vector_store %arg6[%c0_43, %c384_44], %65 {strides = array<i32>} : memref<64x512xbf16, #tpu.memory_space<vmem>>, vector<64x128xbf16>,
    %c0_45 = arith.constant 0 : index
    %c0_46 = arith.constant 0 : index
    %67 = vector.load %arg6[%c0_45, %c0_46] : memref<64x512xbf16, #tpu.memory_space<vmem>>, vector<64x512xbf16>
    %c2_47 = arith.constant 2 : index
    %c0_48 = arith.constant 0 : index
    %c0_49 = arith.constant 0 : index
    %68 = vector.load %arg3[%c2_47, %c0_48, %c0_49] : memref<4x512x128xbf16, #tpu.memory_space<vmem>>, vector<1x512x128xbf16>
    %69 = vector.shape_cast %68 : vector<1x512x128xbf16> to vector<512x128xbf16>
    %cst_50 = arith.constant dense<0.000000e+00> : vector<64x128xf32>
    %70 = tpu.matmul %67, %69, %cst_50 {dimension_numbers = #tpu.dot_dimension_numbers<[1], [0], [0], [1], [0, 0, 1, 1], [], []>} : vector<64x512xbf16>, vector<512x128xbf16>, vector<64x128xf32> -> vector<64x128xf32>
    %71 = vector.broadcast %11 : vector<1x128xf32> to vector<64x128xf32>
    %72 = arith.addf %70, %71 : vector<64x128xf32>
    %73 = vector.extract_strided_slice %7 {offsets = [1, 0, 0], sizes = [8, 8, 128], strides = [1, 1, 1]} : vector<10x8x128xbf16> to vector<8x8x128xbf16>
    %74 = vector.shape_cast %73 : vector<8x8x128xbf16> to vector<64x128xbf16>
    %c0_51 = arith.constant 0 : index
    %c0_52 = arith.constant 0 : index
    %75 = vector.load %arg6[%c0_51, %c0_52] : memref<64x512xbf16, #tpu.memory_space<vmem>>, vector<64x128xbf16>
    tpu.vector_store %arg6[%c0_51, %c0_52], %74 {strides = array<i32>} : memref<64x512xbf16, #tpu.memory_space<vmem>>, vector<64x128xbf16>,
    %76 = vector.extract_strided_slice %10 {offsets = [1, 0, 0], sizes = [8, 8, 128], strides = [1, 1, 1]} : vector<10x8x128xbf16> to vector<8x8x128xbf16>
    %77 = vector.shape_cast %76 : vector<8x8x128xbf16> to vector<64x128xbf16>
    %c0_53 = arith.constant 0 : index
    %c128_54 = arith.constant 128 : index
    %78 = vector.load %arg6[%c0_53, %c128_54] : memref<64x512xbf16, #tpu.memory_space<vmem>>, vector<64x128xbf16>
    tpu.vector_store %arg6[%c0_53, %c128_54], %77 {strides = array<i32>} : memref<64x512xbf16, #tpu.memory_space<vmem>>, vector<64x128xbf16>,
    %79 = vector.extract_strided_slice %7 {offsets = [2, 0, 0], sizes = [8, 8, 128], strides = [1, 1, 1]} : vector<10x8x128xbf16> to vector<8x8x128xbf16>
    %80 = vector.shape_cast %79 : vector<8x8x128xbf16> to vector<64x128xbf16>
    %c0_55 = arith.constant 0 : index
    %c256_56 = arith.constant 256 : index
    %81 = vector.load %arg6[%c0_55, %c256_56] : memref<64x512xbf16, #tpu.memory_space<vmem>>, vector<64x128xbf16>
    tpu.vector_store %arg6[%c0_55, %c256_56], %80 {strides = array<i32>} : memref<64x512xbf16, #tpu.memory_space<vmem>>, vector<64x128xbf16>,
    %82 = vector.extract_strided_slice %10 {offsets = [2, 0, 0], sizes = [8, 8, 128], strides = [1, 1, 1]} : vector<10x8x128xbf16> to vector<8x8x128xbf16>
    %83 = vector.shape_cast %82 : vector<8x8x128xbf16> to vector<64x128xbf16>
    %c0_57 = arith.constant 0 : index
    %c384_58 = arith.constant 384 : index
    %84 = vector.load %arg6[%c0_57, %c384_58] : memref<64x512xbf16, #tpu.memory_space<vmem>>, vector<64x128xbf16>
    tpu.vector_store %arg6[%c0_57, %c384_58], %83 {strides = array<i32>} : memref<64x512xbf16, #tpu.memory_space<vmem>>, vector<64x128xbf16>,
    %c0_59 = arith.constant 0 : index
    %c0_60 = arith.constant 0 : index
    %85 = vector.load %arg6[%c0_59, %c0_60] : memref<64x512xbf16, #tpu.memory_space<vmem>>, vector<64x512xbf16>
    %c3 = arith.constant 3 : index
    %c0_61 = arith.constant 0 : index
    %c0_62 = arith.constant 0 : index
    %86 = vector.load %arg3[%c3, %c0_61, %c0_62] : memref<4x512x128xbf16, #tpu.memory_space<vmem>>, vector<1x512x128xbf16>
    %87 = vector.shape_cast %86 : vector<1x512x128xbf16> to vector<512x128xbf16>
    %cst_63 = arith.constant dense<0.000000e+00> : vector<64x128xf32>
    %88 = tpu.matmul %85, %87, %cst_63 {dimension_numbers = #tpu.dot_dimension_numbers<[1], [0], [0], [1], [0, 0, 1, 1], [], []>} : vector<64x512xbf16>, vector<512x128xbf16>, vector<64x128xf32> -> vector<64x128xf32>
    %89 = vector.broadcast %11 : vector<1x128xf32> to vector<64x128xf32>
    %90 = arith.addf %88, %89 : vector<64x128xf32>
    %91 = vector.shape_cast %72 : vector<64x128xf32> to vector<64x1x128xf32>
    %92 = vector.shape_cast %90 : vector<64x128xf32> to vector<64x1x128xf32>
    %93 = tpu.concatenate %91, %92 in 1 : vector<64x1x128xf32>, vector<64x1x128xf32> -> vector<64x2x128xf32>
    %94 = vector.shape_cast %93 : vector<64x2x128xf32> to vector<8x16x128xf32>
    %c0_64 = arith.constant 0 : index
    %c0_65 = arith.constant 0 : index
    %c1_66 = arith.constant 1 : index
    %c0_67 = arith.constant 0 : index
    %c0_68 = arith.constant 0 : index
    %95 = vector.load %arg5[%c0_64, %c0_65, %c1_66, %c0_67, %c0_68] : memref<1x8x2x16x128xf32, #tpu.memory_space<vmem>>, vector<1x8x1x16x128xf32>
    %96 = vector.shape_cast %95 : vector<1x8x1x16x128xf32> to vector<8x16x128xf32>
    %97 = vector.shape_cast %94 : vector<8x16x128xf32> to vector<1x8x1x16x128xf32>
    tpu.vector_store %arg5[%c0_64, %c0_65, %c1_66, %c0_67, %c0_68], %97 {strides = array<i32>} : memref<1x8x2x16x128xf32, #tpu.memory_space<vmem>>, vector<1x8x1x16x128xf32>,
    return
  }
  func.func @transform_0(%arg0: i32, %arg1: i32) -> (i32, i32, i32, i32) {
    %c0_i32 = arith.constant 0 : i32
    %c0_i32_0 = arith.constant 0 : i32
    %c0_i32_1 = arith.constant 0 : i32
    %c0_i32_2 = arith.constant 0 : i32
    return %arg0, %c0_i32, %c0_i32_0, %c0_i32_1 : i32, i32, i32, i32
  }
  func.func @transform_1(%arg0: i32, %arg1: i32) -> (i32, i32, i32) {
    %c0_i32 = arith.constant 0 : i32
    %c0_i32_0 = arith.constant 0 : i32
    %c0_i32_1 = arith.constant 0 : i32
    %c0_i32_2 = arith.constant 0 : i32
    return %c0_i32, %c0_i32_0, %c0_i32_1 : i32, i32, i32
  }
  func.func @transform_2(%arg0: i32, %arg1: i32) -> (i32, i32) {
    %c0_i32 = arith.constant 0 : i32
    %c0_i32_0 = arith.constant 0 : i32
    %c0_i32_1 = arith.constant 0 : i32
    return %c0_i32, %c0_i32_0 : i32, i32
  }
  func.func @transform_3(%arg0: i32, %arg1: i32) -> (i32, i32, i32, i32, i32) {
    %c0_i32 = arith.constant 0 : i32
    %c0_i32_0 = arith.constant 0 : i32
    %c0_i32_1 = arith.constant 0 : i32
    %c0_i32_2 = arith.constant 0 : i32
    return %arg0, %arg1, %c0_i32, %c0_i32_0, %c0_i32_1 : i32, i32, i32, i32, i32
  }
}

</mosaic_0001>

<bundles_post_ra>
// kernel: upsample_conv_transpose2d.1
= control target key start
LH: loop header
LB: loop body
LE: loop exit
PB: predicated region body
PF: predicated region fallthrough
CT: control target
= control target key end

     0   :  { %8 = vsyncpa [#allocation4], 0  ;;  %s9062_s0 = inlined_call_operand.vmem [shape: bf16[2,10,10,128], index: 0, kind: input, shape index: {}]   ;;  %s9063_s1 = inlined_call_operand.vmem [shape: bf16[4,512,128], index: 1, kind: input, shape index: {}]   ;;  %s9064_s2 = inlined_call_operand.vmem [shape: f32[1,128], index: 2, kind: input, shape index: {}]   ;;  %s9065_s3 = inlined_call_operand.hbm [shape: f32[2,8,2,16,128], index: 3, kind: output, shape index: {}]  }
   0x1   :  { %10 = vsyncpa [#allocation4 + $0x1], 0  ;;  %s6945_s12 = smov 0   ;;  %s6947_s13 = smov 0  }
   0x2   :  { %s6949_s14 = smov 0   ;;  %s6951_s15 = smov 0  }
   0x3   :  { %s6953_s16 = smov 0   ;;  %s6955_s17 = smov 0  }
   0x4 LB: > { %s5837_s18 = sadd.s32 4294967295, %s6918_s17   ;;  %s5838_s19 = sadd.s32 4294967294, %s6918_s17   ;;  %s6918_s17 = sphi %s6955_s17, %s16_s17   ;;  %s6914_s16 = sphi %s6953_s16, %s9142_s16   ;;  %s6910_s15 = sphi %s6951_s15, %s9141_s15   ;;  %s6906_s14 = sphi %s6949_s14, %s9140_s14   ;;  %s6902_s13 = sphi %s6947_s13, %s9139_s13   ;;  %s6898_s12 = sphi %s6945_s12, %s9138_s12  }
   0x5   : > { %s28_s20 = sadd.s32 1, %s6914_s16  ;;  %s105_s21 = sadd.s32 1, %s6906_s14 }
   0x6   : > { %p30_p0 = scmp.ge.s32.totalorder %s28_s20, 2  ;;  %p115_p1 = scmp.ne.s32.totalorder %s6906_s14, %s6902_s13 }
   0x7   : > { %p116_p2 = scmp.eq.s32.totalorder %s5837_s18, 1  ;;  %p121_p3 = scmp.ne.s32.totalorder %s6902_s13, %s6898_s12 }
   0x8   : > { %s9144_s20 = smov (%p30_p0, %s28_s20), 0  ;;  %p122_p5 = scmp.eq.s32.totalorder %s5838_s19, 1 }
   0x9   : > { %p6985_p4 = por %p116_p2, %p115_p1  ;;  %s100_s23 = ssub.s32 %s6914_s16, %s9144_s20 }
   0xa   : > { %p5841_p6 = scmp.ge.s32.totalorder %s6918_s17, 1  ;;  %p103_p7 = scmp.eq.s32.totalorder %s100_s23, 0 }
   0xb   : > { %p6992_p8 = por %p122_p5, %p121_p3  ;;  %p154_p9 = scmp.lt.s32.totalorder %s6918_s17, 3 }
   0xc   : > { %s6998_s25 = scalar_select %p103_p7, %s6906_s14, %s105_s21  }
   0xd   : > { %p155_p10 = pnand %p5841_p6, %p154_p9 }
   0xf   : > { %158 = sbr.rel (%p155_p10) target bundleno = 533 (0x215), region = 32 }
  0x14   : > { %v6641_v0 = vld [vmem:[%s9063_s1 + $0x78] sm:$0xff]   ;;  %v6645_v4 = vld [vmem:[%s9063_s1 + $0x70] sm:$0xff]   ;;  %v6649_v8 = vld [vmem:[%s9063_s1 + $0x68] sm:$0xff]   ;;  %p178_p11 = scmp.lt.s32.totalorder %s6910_s15, 1  ;;  %vm228_vm0 = vsmask.f32 3328 }
  0x15   : > { %v6642_v1 = vld [vmem:[%s9063_s1 + $0xf8] sm:$0xff]   ;;  %6261 = vmatprep.subr.bf16.mxu0 %v6641_v0  ;;  %v6646_v5 = vld [vmem:[%s9063_s1 + $0xf0] sm:$0xff]   ;;  %v6650_v9 = vld [vmem:[%s9063_s1 + $0xe8] sm:$0xff]   ;;  %vm229_vm1 = vsmask.f32 7440  ;;  %vm902_vm3 = vcmask 1042432  }
  0x16   : > { %v6643_v2 = vld [vmem:[%s9063_s1 + $0x38] sm:$0xff]   ;;  %6301 = vmatprep.subr.bf16.mxu1 %v6642_v1  ;;  %v6647_v6 = vld [vmem:[%s9063_s1 + $0x30] sm:$0xff]   ;;  %v6651_v10 = vld [vmem:[%s9063_s1 + $0x28] sm:$0xff]   ;;  %s179_s9 = scalar_select %p178_p11, %s6910_s15, 1  ;;  %vm903_vm4 = vcmask 1046532   ;;  %vm2643_vm6 = vcmask 1040384  }
  0x17   : > { %v6644_v3 = vld [vmem:[%s9063_s1 + $0xb8] sm:$0xff]   ;;  %6262 = vmatpush3.bf16.msra.mxu0 %v6643_v2  ;;  %v6648_v7 = vld [vmem:[%s9063_s1 + $0xb0] sm:$0xff]   ;;  %v6652_v11 = vld [vmem:[%s9063_s1 + $0xa8] sm:$0xff]   ;;  %s6260_s6 = sshll.u32 %s6910_s15, 12  ;;  %s6922_s19 = smov [#allocation3]  }
  0x18   : > { %6302 = vmatpush3.bf16.msra.mxu1 %v6644_v3  ;;  %6263 = vmatprep.subr.bf16.mxu0 %v6645_v4  ;;  %v6653_v12 = vld [vmem:[%s9063_s1 + $0x60] sm:$0xff]   ;;  %v6657_v16 = vld [vmem:[%s9063_s1 + $0x58] sm:$0xff]   ;;  %v6661_v20 = vld [vmem:[%s9063_s1 + $0x50] sm:$0xff]   ;;  %s6581_s28 = smul.u32 80, %s179_s9  ;;  %s9009_s9 = scalar_lea.hbm %s9065_s3, %s6260_s6 }
  0x19   : > { %6303 = vmatprep.subr.bf16.mxu1 %v6646_v5  ;;  %v6654_v13 = vld [vmem:[%s9063_s1 + $0xe0] sm:$0xff]   ;;  %v6658_v17 = vld [vmem:[%s9063_s1 + $0xd8] sm:$0xff]   ;;  %v6662_v21 = vld [vmem:[%s9063_s1 + $0xd0] sm:$0xff]   ;;  %s6846_s21 = sshll.u32 %s6922_s19, 4  ;;  %s6847_s21 = int_to_ptr.vmem [resolvable:$false] %s6846_s21 }
  0x1a   : > { %v6655_v14 = vld [vmem:[%s9063_s1 + $0x20] sm:$0xff]   ;;  %v6659_v18 = vld [vmem:[%s9063_s1 + $0x18] sm:$0xff]   ;;  %v6663_v22 = vld [vmem:[%s9063_s1 + $0x10] sm:$0xff]   ;;  %s7095_s18 = scalar_lea.vmem %s9062_s0, %s6581_s28  ;;  %s175_s28 = sand.u32 1, %s6902_s13  }
  0x1b   : > { %6264 = vmatpush3.bf16.msra.mxu0 %v6647_v6  ;;  %v6656_v15 = vld [vmem:[%s9063_s1 + $0xa0] sm:$0xff]   ;;  %v6660_v19 = vld [vmem:[%s9063_s1 + $0x98] sm:$0xff]   ;;  %v6664_v23 = vld [vmem:[%s9063_s1 + $0x90] sm:$0xff]   ;;  %s5842_s29 = sshll.u32 %s175_s28, 8  ;;  %s9017_s15 = scalar_lea.sflag [#allocation4], %s175_s28 }
  0x1c   : > { %6304 = vmatpush3.bf16.msra.mxu1 %v6648_v7  ;;  %6265 = vmatprep.subr.bf16.mxu0 %v6649_v8  ;;  %v6665_v24 = vld [vmem:[%s9063_s1 + $0x48] sm:$0xff]   ;;  %v6669_v28 = vld [vmem:[%s9063_s1 + $0x40] sm:$0xff]   ;;  %v7117_v42 = vld [vmem:[%s7095_s18 + $0x10] sm:$0xf]  ;;  %s7967_s30 = scalar_lea.vmem [#allocation3], %s5842_s29 }
  0x1d   : > { %6305 = vmatprep.subr.bf16.mxu1 %v6650_v9  ;;  %v6666_v25 = vld [vmem:[%s9063_s1 + $0xc8] sm:$0xff]   ;;  %v6670_v29 = vld [vmem:[%s9063_s1 + $0xc0] sm:$0xff]   ;;  %v7120_v45 = vld [vmem:[%s7095_s18 + $0x14] sm:$0x1]  ;;  %360 = vst [vmem:[#allocation2 + $0x18] sm:$0xf] %v7117_v42 }
  0x1e   : > { %v6667_v26 = vld [vmem:[%s9063_s1 + $0x8] sm:$0xff]   ;;  %v6671_v30 = vld [vmem:[%s9063_s1] sm:$0xff]   ;;  %222 = vst [vmem:[#allocation2 + $0x20] sm:$0xf] %v7117_v42  ;;  %vm7126_vm2 = vmor %vm228_vm0, %vm229_vm1  ;;  %v260_v54 = vshrl.u32 %v7117_v42, 16  ;;  %v263_v55 = vshll.u32 %v7117_v42, 16 }
  0x1f   : > { %6266 = vmatpush3.bf16.msra.mxu0 %v6651_v10  ;;  %v6668_v27 = vld [vmem:[%s9063_s1 + $0x88] sm:$0xff]   ;;  %v6672_v31 = vld [vmem:[%s9063_s1 + $0x80] sm:$0xff]   ;;  %v269_v56 = vshll.u32 %v7120_v45, 16  ;;  %v6677_v57 = vld [vmem:[%s9063_s1 + $0x178] sm:$0xff]   ;;  %s5762_s7 = sshll.u32 %s7967_s30, 4  ;;  %s9011_s7 = int_to_ptr.vmem [resolvable:$true] %s5762_s7 }
  0x20   : > { %6306 = vmatpush3.bf16.msra.mxu1 %v6652_v11  ;;  %6267 = vmatprep.subr.bf16.mxu0 %v6653_v12  ;;  %v189_v32 = vld [vmem:[%s7095_s18] sm:$0xf]  ;;  %v7105_v33 = vld [vmem:[%s7095_s18 + $0x8] sm:$0xf]  ;;  %v199_v34 = vld [vmem:[%s7095_s18 + $0x4] sm:$0x1]  ;;  %p6849_p1 = scmp.lt.s32.totalorder %s9011_s7, %s6847_s21 }
  0x21   : > { %6307 = vmatprep.subr.bf16.mxu1 %v6654_v13  ;;  %v7109_v35 = vld [vmem:[%s7095_s18 + $0xc] sm:$0x1]  ;;  %220 = vst [vmem:[#allocation2] sm:$0xf] %v189_v32  ;;  %221 = vst [vmem:[#allocation2 + $0x10] sm:$0xf] %v7105_v33 }
  0x22   : > { %359 = vst [vmem:[#allocation2 + $0x8] sm:$0xf] %v7105_v33  ;;  %v232_v36 = vshrl.u32 %v189_v32, 16  ;;  %v235_v37 = vshll.u32 %v189_v32, 16  ;;  %v241_v38 = vshll.u32 %v199_v34, 16  ;;  %v246_v39 = vshrl.u32 %v7105_v33, 16  ;;  %vm7148_vm5 = vmor %vm902_vm3, %vm903_vm4 }
  0x23   : > { %6268 = vmatpush3.bf16.msra.mxu0 %v6655_v14  ;;  %v249_v40 = vshll.u32 %v7105_v33, 16  ;;  %v255_v41 = vshll.u32 %v7109_v35, 16  ;;  %v209_v48 = vld [vmem:[%s7095_s18] sm:$0xe]  ;;  %v210_v58 = vld [vmem:[%s7095_s18 + $0x8] sm:$0xe] }
  0x24   : > { %6308 = vmatpush3.bf16.msra.mxu1 %v6656_v15  ;;  %6269 = vmatprep.subr.bf16.mxu0 %v6657_v16  ;;  %v234_v43 = vrot.slane %v232_v36, 4  ;;  %v237_v44 = vrot.slane %v235_v37, 5  ;;  %v248_v46 = vrot.slane %v246_v39, 4  ;;  %v243_v50 = vrot.slane %v241_v38, 5  ;;  %v6678_v60 = vld [vmem:[%s9063_s1 + $0x1f8] sm:$0xff]   ;;  %s6842_s11 = scalar_lea.vmem %s9011_s7, 4096 }
  0x25   : > { %6309 = vmatprep.subr.bf16.mxu1 %v6658_v17  ;;  %v251_v47 = vrot.slane %v249_v40, 5  ;;  %v257_v51 = vrot.slane %v255_v41, 5  ;;  %v262_v62 = vrot.slane %v260_v54, 4  ;;  %v265_v63 = vrot.slane %v263_v55, 5  ;;  %v211_v10 = vld [vmem:[%s7095_s18 + $0x10] sm:$0xe]  ;;  %p6843_p12 = scmp.ne.s32.totalorder %s9011_s7, %s6842_s11 }
  0x26   : > { %v238_v49 = vor.u32 %v237_v44, %v234_v43  ;;  %v5893_v2 = vrot.slane %v209_v48, 9  ;;  %v271_v4 = vrot.slane %v269_v56, 5  ;;  %v907_v5 = vrot.slane %v199_v34, 5  ;;  %v7159_v12 = vld [vmem:[%s7095_s18 + $0x18] sm:$0xf]  ;;  %v6681_v34 = vld [vmem:[%s9063_s1 + $0x170] sm:$0xff]  }
  0x27   : > { %6270 = vmatpush3.bf16.msra.mxu0 %v6659_v18  ;;  %v252_v53 = vor.u32 %v251_v47, %v248_v46  ;;  %v266_v3 = vor.u32 %v265_v63, %v262_v62  ;;  %v5894_v6 = vrot.slane %v210_v58, 9  ;;  %v911_v8 = vrot.slane %v7109_v35, 5  ;;  %v7166_v14 = vld [vmem:[%s7095_s18 + $0x1c] sm:$0x1]  ;;  %223 = vst [vmem:[#allocation2 + $0x30] sm:$0xf] %v7159_v12  ;;  %p6844_p13 = pnand %p6843_p12, %p6985_p4 }
  0x28   : > { %6310 = vmatpush3.bf16.msra.mxu1 %v6660_v19  ;;  %6271 = vmatprep.subr.bf16.mxu0 %v6661_v20  ;;  %v239_v59 = vrot.slane %v238_v49, 4  ;;  %v908_v13 = vsel %vm7148_vm5, %v5893_v2, %v907_v5  ;;  %v274_v15 = vshrl.u32 %v7159_v12, 16  ;;  %v277_v16 = vshll.u32 %v7159_v12, 16  ;;  %361 = vst [vmem:[#allocation2 + $0x28] sm:$0xf] %v7159_v12  ;;  %v6680_v40 = vld [vmem:[%s9063_s1 + $0x1b8] sm:$0xff]  }
  0x29   : > { %6311 = vmatprep.subr.bf16.mxu1 %v6662_v21  ;;  %v253_v61 = vrot.slane %v252_v53, 4  ;;  %v267_v9 = vrot.slane %v266_v3, 4  ;;  %v7174_v17 = vsel %vm7148_vm5, %v5894_v6, %v911_v8  ;;  %v5895_v18 = vrot.slane %v211_v10, 9  ;;  %v7179_v21 = vld [vmem:[%s7095_s18 + $0x20] sm:$0xf]  ;;  %v6682_v44 = vld [vmem:[%s9063_s1 + $0x1f0] sm:$0xff]   ;;  %p6845_p0 = pneg %p6844_p13 }
  0x2a   : > { %v244_v0 = vsel %vm7126_vm2, %v239_v59, %v243_v50  ;;  %v915_v19 = vrot.slane %v7120_v45, 5  ;;  %v283_v20 = vshll.u32 %v7166_v14, 16  ;;  %362 = vst [vmem:[#allocation2 + $0x38] sm:$0xf] %v7179_v21  ;;  %224 = vst [vmem:[#allocation2 + $0x40] sm:$0xf] %v7179_v21 }
  0x2b   : > { %6272 = vmatpush3.bf16.msra.mxu0 %v6663_v22  ;;  %v7144_v1 = vsel %vm7126_vm2, %v253_v61, %v257_v51  ;;  %351 = vst [vmem:[#allocation2 + $0x4] sm:$0xf] %v244_v0  ;;  %v7156_v11 = vsel %vm7126_vm2, %v267_v9, %v271_v4  ;;  %v212_v41 = vld [vmem:[%s7095_s18 + $0x18] sm:$0xe]  ;;  %v6683_v45 = vld [vmem:[%s9063_s1 + $0x130] sm:$0xff]   ;;  %v6689_v51 = vld [vmem:[%s9063_s1 + $0x168] sm:$0xff]  }
  0x2c   : > { %6312 = vmatpush3.bf16.msra.mxu1 %v6664_v23  ;;  %6273 = vmatprep.subr.bf16.mxu0 %v6665_v24  ;;  %352 = vst [vmem:[#allocation2 + $0x14] sm:$0xf] %v7144_v1  ;;  %382 = vst [vmem:[#allocation2 + $0xc] sm:$0xf] %v7144_v1  ;;  %v276_v23 = vrot.slane %v274_v15, 4  ;;  %v279_v24 = vrot.slane %v277_v16, 5  ;;  %v7199_v39 = vsel %vm7148_vm5, %v5895_v18, %v915_v19 }
  0x2d   : > { %6313 = vmatprep.subr.bf16.mxu1 %v6666_v25  ;;  %383 = vst [vmem:[#allocation2 + $0x1c] sm:$0xf] %v7156_v11  ;;  %353 = vst [vmem:[#allocation2 + $0x24] sm:$0xf] %v7156_v11  ;;  %v7182_v25 = vld [vmem:[%s7095_s18 + $0x24] sm:$0x1] }
  0x2e   : > { %v280_v35 = vor.u32 %v279_v24, %v276_v23  ;;  %v297_v37 = vshll.u32 %v7182_v25, 16  ;;  %v213_v55 = vld [vmem:[%s7095_s18 + $0x20] sm:$0xe]  ;;  %v6684_v56 = vld [vmem:[%s9063_s1 + $0x1b0] sm:$0xff]   ;;  %v919_v59 = vrot.slane %v7166_v14, 5  ;;  %v6691_v62 = vld [vmem:[%s9063_s1 + $0x128] sm:$0xff]  }
  0x2f   : > { %6274 = vmatpush3.bf16.msra.mxu0 %v6667_v26  ;;  %v288_v26 = vshrl.u32 %v7179_v21, 16  ;;  %v5897_v63 = vrot.slane %v213_v55, 9  ;;  %v923_v3 = vrot.slane %v7182_v25, 5  ;;  %v6692_v5 = vld [vmem:[%s9063_s1 + $0x1a8] sm:$0xff]   ;;  %v6694_v9 = vld [vmem:[%s9063_s1 + $0x1e0] sm:$0xff]   ;;  %v6705_v55 = vld [vmem:[%s9063_s1 + $0x150] sm:$0xff]  }
  0x30   : > { %6314 = vmatpush3.bf16.msra.mxu1 %v6668_v27  ;;  %6275 = vmatprep.subr.bf16.mxu0 %v6669_v28  ;;  %v281_v46 = vrot.slane %v280_v35, 4  ;;  %v299_v50 = vrot.slane %v297_v37, 5  ;;  %v7253_v6 = vld [vmem:[%s7095_s18 + $0x28] sm:$0xf]  ;;  %v7256_v8 = vld [vmem:[%s7095_s18 + $0x2c] sm:$0x1] }
  0x31   : > { %6315 = vmatprep.subr.bf16.mxu1 %v6670_v29  ;;  %v6679_v29 = vld [vmem:[%s9063_s1 + $0x138] sm:$0xff]   ;;  %v290_v36 = vrot.slane %v288_v26, 4  ;;  %225 = vst [vmem:[#allocation2 + $0x50] sm:$0xf] %v7253_v6  ;;  %v302_v10 = vshrl.u32 %v7253_v6, 16  ;;  %v311_v14 = vshll.u32 %v7256_v8, 16  ;;  %v7281_v23 = vsel %vm7148_vm5, %v5897_v63, %v923_v3 }
  0x32   : > { %v390_v22 = vld [vmem:[#allocation2] sm:$0xff]  ;;  %363 = vst [vmem:[#allocation2 + $0x48] sm:$0xf] %v7253_v6  ;;  %v7267_v15 = vld [vmem:[%s7095_s18 + $0x30] sm:$0xf] }
  0x33   : > { %6276 = vmatpush3.bf16.msra.mxu0 %v6671_v30  ;;  %v392_v27 = vld [vmem:[#allocation2 + $0x10] sm:$0xff]  ;;  %v285_v30 = vrot.slane %v283_v20, 5  ;;  %878 = vst [vmem:[#allocation2] sm:$0xf] %v244_v0  ;;  %v391_v38 = vld [vmem:[#allocation2 + $0x8] sm:$0xff]  ;;  %v6693_v0 = vld [vmem:[%s9063_s1 + $0x160] sm:$0xff]  }
  0x34   : > { %6316 = vmatpush3.bf16.msra.mxu1 %v6672_v31  ;;  %6341 = vmatprep.subr.bf16.mxu0 %v6677_v57  ;;  %v6673_v28 = vld [vmem:[#allocation2 + $0x4] ss:$16 sps:$4 sm:$0xff]   ;;  %v291_v31 = vshll.u32 %v7179_v21, 16  ;;  %879 = vst [vmem:[#allocation2 + $0x10] sm:$0xf] %v7144_v1  ;;  %v5845_v32 = vcombine.low %v390_v22, %v392_v27  ;;  %v393_v47 = vld [vmem:[#allocation2 + $0x18] sm:$0xff] }
  0x35   : > { %6381 = vmatprep.subr.bf16.mxu1 %v6678_v60  ;;  %945 = vst [vmem:[#allocation2 + $0x4] sm:$0xf] %v908_v13  ;;  %946 = vst [vmem:[#allocation2 + $0x14] sm:$0xf] %v7174_v17  ;;  %780 = vmatprep.mubr.bf16.mxu0 %v6673_v28  ;;  %v6675_v48 = vld [vmem:[#allocation2 + $0xc] ss:$16 sps:$4 sm:$0xff]   ;;  %v5847_v53 = vcombine.low %v391_v38, %v393_v47  ;;  %v7220_v54 = vsel %vm7126_vm2, %v281_v46, %v285_v30 }
  0x36   : > { %v293_v43 = vrot.slane %v291_v31, 5  ;;  %781 = vmatmul.mubr.bf16.vlgmr.msra.gmra.mxu0 %v5845_v32  ;;  %953 = vst [vmem:[#allocation2 + $0x8] sm:$0xf] %v7144_v1  ;;  %954 = vst [vmem:[#allocation2 + $0x18] sm:$0xf] %v7156_v11  ;;  %845 = vmatprep.mubr.bf16.mxu1 %v6675_v48  ;;  %v5896_v57 = vrot.slane %v212_v41, 9 }
  0x37   : > { %6342 = vmatpush3.bf16.msra.mxu0 %v6679_v29  ;;  %968 = vst [vmem:[#allocation2 + $0xc] sm:$0xf] %v7174_v17  ;;  %969 = vst [vmem:[#allocation2 + $0x1c] sm:$0xf] %v7199_v39  ;;  %846 = vmatmul.mubr.bf16.vlgmr.msra.gmra.mxu1 %v5847_v53  ;;  %v6690_v60 = vld [vmem:[%s9063_s1 + $0x1e8] sm:$0xff]   ;;  %v394_v2 = vld [vmem:[#allocation2 + $0x20] sm:$0xff] }
  0x38   : > { %v294_v49 = vor.u32 %v293_v43, %v290_v36  ;;  %6343 = vmatprep.subr.bf16.mxu0 %v6681_v34  ;;  %354 = vst [vmem:[#allocation2 + $0x34] sm:$0xf] %v7220_v54  ;;  %384 = vst [vmem:[#allocation2 + $0x2c] sm:$0xf] %v7220_v54  ;;  %6382 = vmatpush3.bf16.msra.mxu1 %v6680_v40  ;;  %v7247_v4 = vsel %vm7148_vm5, %v5896_v57, %v919_v59  ;;  %v305_v13 = vshll.u32 %v7253_v6, 16  ;;  %v6695_v19 = vld [vmem:[%s9063_s1 + $0x120] sm:$0xff]  }
  0x39   : > { %6383 = vmatprep.subr.bf16.mxu1 %v6682_v44  ;;  %v316_v20 = vshrl.u32 %v7267_v15, 16  ;;  %364 = vst [vmem:[#allocation2 + $0x58] sm:$0xf] %v7267_v15  ;;  %226 = vst [vmem:[#allocation2 + $0x60] sm:$0xf] %v7267_v15  ;;  %v304_v25 = vrot.slane %v302_v10, 4 }
  0x3a   : > { %v295_v58 = vrot.slane %v294_v49, 4  ;;  %880 = vst [vmem:[#allocation2 + $0x20] sm:$0xf] %v7156_v11  ;;  %v307_v26 = vrot.slane %v305_v13, 5  ;;  %v7284_v27 = vld [vmem:[%s7095_s18 + $0x34] sm:$0x1] }
  0x3b   : > { %6344 = vmatpush3.bf16.msra.mxu0 %v6683_v45  ;;  %v6701_v28 = vld [vmem:[%s9063_s1 + $0x158] sm:$0xff]   ;;  %v6696_v29 = vld [vmem:[%s9063_s1 + $0x1a0] sm:$0xff]   ;;  %v214_v30 = vld [vmem:[%s7095_s18 + $0x28] sm:$0xe]  ;;  %v318_v31 = vrot.slane %v316_v20, 4  ;;  %v319_v32 = vshll.u32 %v7267_v15, 16 }
  0x3c   : > { %v7234_v61 = vsel %vm7126_vm2, %v295_v58, %v299_v50  ;;  %6345 = vmatprep.subr.bf16.mxu0 %v6689_v51  ;;  %6384 = vmatpush3.bf16.msra.mxu1 %v6684_v56  ;;  %v325_v34 = vshll.u32 %v7284_v27, 16  ;;  %v308_v37 = vor.u32 %v307_v26, %v304_v25  ;;  %v313_v38 = vrot.slane %v311_v14, 5  ;;  %v6702_v40 = vld [vmem:[%s9063_s1 + $0x1d8] sm:$0xff]   ;;  %v215_v46 = vld [vmem:[%s7095_s18 + $0x30] sm:$0xe]  ;;  %v6713_v14 = vld [vmem:[%s9063_s1 + $0x148] sm:$0xff]  }
  0x3d   : > { %385 = vst [vmem:[#allocation2 + $0x3c] sm:$0xf] %v7234_v61  ;;  %355 = vst [vmem:[#allocation2 + $0x44] sm:$0xf] %v7234_v61  ;;  %6385 = vmatprep.subr.bf16.mxu1 %v6690_v60  ;;  %v321_v43 = vrot.slane %v319_v32, 5  ;;  %v6703_v47 = vld [vmem:[%s9063_s1 + $0x118] sm:$0xff]  }
  0x3e   : > { %v327_v44 = vrot.slane %v325_v34, 5  ;;  %v309_v45 = vrot.slane %v308_v37, 4  ;;  %v5898_v50 = vrot.slane %v214_v30, 9  ;;  %v6704_v51 = vld [vmem:[%s9063_s1 + $0x198] sm:$0xff]   ;;  %v927_v56 = vrot.slane %v7256_v8, 5  ;;  %v6706_v57 = vld [vmem:[%s9063_s1 + $0x1d0] sm:$0xff]  }
  0x3f   : > { %6346 = vmatpush3.bf16.msra.mxu0 %v6691_v62  ;;  %v396_v16 = vld [vmem:[#allocation2 + $0x30] sm:$0xff]  ;;  %v395_v22 = vld [vmem:[#allocation2 + $0x28] sm:$0xff]  ;;  %v322_v48 = vor.u32 %v321_v43, %v318_v31  ;;  %v5899_v59 = vrot.slane %v215_v46, 9  ;;  %v931_v62 = vrot.slane %v7284_v27, 5  ;;  %v7351_v13 = vld [vmem:[%s7095_s18 + $0x40] sm:$0xf] }
  0x40   : > { %v6685_v18 = vld [vmem:[#allocation2 + $0x24] ss:$16 sps:$4 sm:$0xff]   ;;  %6347 = vmatprep.subr.bf16.mxu0 %v6693_v0  ;;  %881 = vst [vmem:[#allocation2 + $0x30] sm:$0xf] %v7220_v54  ;;  %v5849_v24 = vcombine.low %v394_v2, %v396_v16  ;;  %6386 = vmatpush3.bf16.msra.mxu1 %v6692_v5  ;;  %955 = vst [vmem:[#allocation2 + $0x28] sm:$0xf] %v7220_v54  ;;  %v7308_v49 = vsel %vm7126_vm2, %v309_v45, %v313_v38 }
  0x41   : > { %947 = vst [vmem:[#allocation2 + $0x24] sm:$0xf] %v7199_v39  ;;  %948 = vst [vmem:[#allocation2 + $0x34] sm:$0xf] %v7247_v4  ;;  %788 = vmatprep.mubr.bf16.mxu0 %v6685_v18  ;;  %6387 = vmatprep.subr.bf16.mxu1 %v6694_v9  ;;  %v323_v53 = vrot.slane %v322_v48, 4  ;;  %v6707_v60 = vld [vmem:[%s9063_s1 + $0x110] sm:$0xff]   ;;  %v7347_v9 = vsel %vm7148_vm5, %v5898_v50, %v927_v56  ;;  %v7363_v26 = vsel %vm7148_vm5, %v5899_v59, %v931_v62 }
  0x42   : > { %789 = vmatmul.mubr.bf16.gmra.mxu0 %v5849_v24  ;;  %356 = vst [vmem:[#allocation2 + $0x54] sm:$0xf] %v7308_v49  ;;  %386 = vst [vmem:[#allocation2 + $0x4c] sm:$0xf] %v7308_v49  ;;  %v6708_v63 = vld [vmem:[%s9063_s1 + $0x190] sm:$0xff]   ;;  %v371_v31 = vshll.u32 %v7351_v13, 16 }
  0x43   : > { %6348 = vmatpush3.bf16.msra.mxu0 %v6695_v19  ;;  %v7324_v58 = vsel %vm7126_vm2, %v323_v53, %v327_v44  ;;  %v7336_v0 = vld [vmem:[%s7095_s18 + $0x38] sm:$0xf]  ;;  %v7339_v2 = vld [vmem:[%s7095_s18 + $0x3c] sm:$0x1]  ;;  %v7358_v20 = vld [vmem:[%s7095_s18 + $0x44] sm:$0x1] }
  0x44   : > { %v397_v35 = vld [vmem:[#allocation2 + $0x38] sm:$0xff]  ;;  %6349 = vmatprep.subr.bf16.mxu0 %v6701_v28  ;;  %6388 = vmatpush3.bf16.msra.mxu1 %v6696_v29  ;;  %387 = vst [vmem:[#allocation2 + $0x5c] sm:$0xf] %v7324_v58  ;;  %357 = vst [vmem:[#allocation2 + $0x64] sm:$0xf] %v7324_v58  ;;  %v330_v3 = vshrl.u32 %v7336_v0, 16 }
  0x45   : > { %v6687_v36 = vld [vmem:[#allocation2 + $0x2c] ss:$16 sps:$4 sm:$0xff]   ;;  %956 = vst [vmem:[#allocation2 + $0x38] sm:$0xf] %v7234_v61  ;;  %v5851_v41 = vcombine.low %v395_v22, %v397_v35  ;;  %6389 = vmatprep.subr.bf16.mxu1 %v6702_v40  ;;  %227 = vst [vmem:[#allocation2 + $0x70] sm:$0xf] %v7336_v0 }
  0x46   : > { %970 = vst [vmem:[#allocation2 + $0x2c] sm:$0xf] %v7247_v4  ;;  %971 = vst [vmem:[#allocation2 + $0x3c] sm:$0xf] %v7281_v23  ;;  %853 = vmatprep.mubr.bf16.mxu1 %v6687_v36  ;;  %v333_v5 = vshll.u32 %v7336_v0, 16  ;;  %v398_v8 = vld [vmem:[#allocation2 + $0x40] sm:$0xff] }
  0x47   : > { %854 = vmatmul.mubr.bf16.gmra.mxu1 %v5851_v41  ;;  %6350 = vmatpush3.bf16.msra.mxu0 %v6703_v47  ;;  %365 = vst [vmem:[#allocation2 + $0x68] sm:$0xf] %v7336_v0  ;;  %v339_v10 = vshll.u32 %v7339_v2, 16  ;;  %v216_v16 = vld [vmem:[%s7095_s18 + $0x38] sm:$0xe]  ;;  %v332_v18 = vrot.slane %v330_v3, 4 }
  0x48   : > { %6351 = vmatprep.subr.bf16.mxu0 %v6705_v55  ;;  %6390 = vmatpush3.bf16.msra.mxu1 %v6704_v51  ;;  %v335_v19 = vrot.slane %v333_v5, 5  ;;  %366 = vst [vmem:[#allocation2 + $0x78] sm:$0xf] %v7351_v13  ;;  %v368_v28 = vshrl.u32 %v7351_v13, 16  ;;  %882 = vst [vmem:[#allocation2 + $0x40] sm:$0xf] %v7234_v61 }
  0x49   : > { %6391 = vmatprep.subr.bf16.mxu1 %v6706_v57  ;;  %v400_v22 = vld [vmem:[#allocation2 + $0x50] sm:$0xff]  ;;  %v399_v25 = vld [vmem:[#allocation2 + $0x48] sm:$0xff]  ;;  %v341_v27 = vrot.slane %v339_v10, 5  ;;  %v377_v32 = vshll.u32 %v7358_v20, 16  ;;  %v5900_v40 = vrot.slane %v216_v16, 9  ;;  %v373_v41 = vrot.slane %v371_v31, 5 }
  0x4a   : > { %v6697_v24 = vld [vmem:[#allocation2 + $0x44] ss:$16 sps:$4 sm:$0xff]   ;;  %883 = vst [vmem:[#allocation2 + $0x50] sm:$0xf] %v7308_v49  ;;  %v5853_v29 = vcombine.low %v398_v8, %v400_v22  ;;  %v336_v30 = vor.u32 %v335_v19, %v332_v18  ;;  %v370_v34 = vrot.slane %v368_v28, 4  ;;  %v6714_v35 = vld [vmem:[%s9063_s1 + $0x1c8] sm:$0xff]  }
  0x4b   : > { %6352 = vmatpush3.bf16.msra.mxu0 %v6707_v60  ;;  %949 = vst [vmem:[#allocation2 + $0x44] sm:$0xf] %v7281_v23  ;;  %950 = vst [vmem:[#allocation2 + $0x54] sm:$0xf] %v7347_v9  ;;  %796 = vmatprep.mubr.bf16.mxu0 %v6697_v24  ;;  %v401_v36 = vld [vmem:[#allocation2 + $0x58] sm:$0xff]  ;;  %v379_v44 = vrot.slane %v377_v32, 5 }
  0x4c   : > { %6392 = vmatpush3.bf16.msra.mxu1 %v6708_v63  ;;  %6353 = vmatprep.subr.bf16.mxu0 %v6713_v14  ;;  %v6699_v37 = vld [vmem:[#allocation2 + $0x4c] ss:$16 sps:$4 sm:$0xff]   ;;  %v337_v38 = vrot.slane %v336_v30, 4  ;;  %957 = vst [vmem:[#allocation2 + $0x48] sm:$0xf] %v7308_v49  ;;  %v5855_v43 = vcombine.low %v399_v25, %v401_v36  ;;  %v374_v47 = vor.u32 %v373_v41, %v370_v34  ;;  %v935_v48 = vrot.slane %v7339_v2, 5 }
  0x4d   : > { %797 = vmatmul.mubr.bf16.gmra.mxu0 %v5853_v29  ;;  %958 = vst [vmem:[#allocation2 + $0x58] sm:$0xf] %v7324_v58  ;;  %972 = vst [vmem:[#allocation2 + $0x4c] sm:$0xf] %v7347_v9  ;;  %6393 = vmatprep.subr.bf16.mxu1 %v6714_v35  ;;  %v6715_v45 = vld [vmem:[%s9063_s1 + $0x108] sm:$0xff]   ;;  %v6717_v55 = vld [vmem:[%s9063_s1 + $0x140] sm:$0xff]  }
  0x4e   : > { %973 = vst [vmem:[#allocation2 + $0x5c] sm:$0xf] %v7363_v26  ;;  %861 = vmatprep.mubr.bf16.mxu1 %v6699_v37  ;;  %v7384_v46 = vsel %vm7126_vm2, %v337_v38, %v341_v27  ;;  %v217_v50 = vld [vmem:[%s7095_s18 + $0x40] sm:$0xe]  ;;  %v6716_v51 = vld [vmem:[%s9063_s1 + $0x188] sm:$0xff]   ;;  %v375_v53 = vrot.slane %v374_v47, 4  ;;  %v7412_v63 = vsel %vm7148_vm5, %v5900_v40, %v935_v48 }
  0x4f   : > { %862 = vmatmul.mubr.bf16.gmra.mxu1 %v5855_v43  ;;  %358 = vst [vmem:[#allocation2 + $0x74] sm:$0xf] %v7384_v46  ;;  %388 = vst [vmem:[#allocation2 + $0x6c] sm:$0xf] %v7384_v46  ;;  %6354 = vmatpush3.bf16.msra.mxu0 %v6715_v45  ;;  %v6718_v56 = vld [vmem:[%s9063_s1 + $0x1c0] sm:$0xff]   ;;  %v5901_v2 = vrot.slane %v217_v50, 9 }
  0x50   : > { %6394 = vmatpush3.bf16.msra.mxu1 %v6716_v51  ;;  %v7401_v57 = vsel %vm7126_vm2, %v375_v53, %v379_v44  ;;  %6355 = vmatprep.subr.bf16.mxu0 %v6717_v55  ;;  %v6719_v59 = vld [vmem:[%s9063_s1 + $0x100] sm:$0xff]   ;;  %v965_v3 = vrot.slane %v7358_v20, 5  ;;  %3076 = vst [vmem:[#allocation2] sm:$0xf] %v7105_v33  ;;  %3077 = vst [vmem:[#allocation2 + $0x10] sm:$0xf] %v7117_v42 }
  0x51   : > { %389 = vst [vmem:[#allocation2 + $0x7c] sm:$0xf] %v7401_v57  ;;  %6395 = vmatprep.subr.bf16.mxu1 %v6718_v56  ;;  %v6720_v60 = vld [vmem:[%s9063_s1 + $0x180] sm:$0xff]   ;;  %v6723_v8 = vld [vmem:[#allocation2 + $0xc] ss:$16 sps:$4 sm:$0xff]   ;;  %v6729_v32 = vld [vmem:[%s9063_s1 + $0x270] sm:$0xff]  }
  0x52   : > { %v402_v62 = vld [vmem:[#allocation2 + $0x60] sm:$0xff]  ;;  %3092 = vst [vmem:[#allocation2 + $0x8] sm:$0xf] %v7117_v42  ;;  %3093 = vst [vmem:[#allocation2 + $0x18] sm:$0xf] %v7159_v12  ;;  %v6725_v18 = vld [vmem:[%s9063_s1 + $0x278] sm:$0xff]   ;;  %v7432_v42 = vsel %vm7148_vm5, %v5901_v2, %v965_v3 }
  0x53   : > { %6356 = vmatpush3.bf16.msra.mxu0 %v6719_v59  ;;  %v6721_v5 = vld [vmem:[#allocation2 + $0x4] ss:$16 sps:$4 sm:$0xff]   ;;  %3115 = vst [vmem:[#allocation2 + $0xc] sm:$0xf] %v7156_v11  ;;  %3116 = vst [vmem:[#allocation2 + $0x1c] sm:$0xf] %v7220_v54 }
  0x54   : > { %6396 = vmatpush3.bf16.msra.mxu1 %v6720_v60  ;;  %3084 = vst [vmem:[#allocation2 + $0x4] sm:$0xf] %v7144_v1  ;;  %3085 = vst [vmem:[#allocation2 + $0x14] sm:$0xf] %v7156_v11  ;;  %v6726_v19 = vld [vmem:[%s9063_s1 + $0x2f8] sm:$0xff]   ;;  %6421 = vmatprep.subr.bf16.mxu0 %v6725_v18  ;;  %v6731_v36 = vld [vmem:[%s9063_s1 + $0x230] sm:$0xff]  }
  0x55   : > { %884 = vst [vmem:[#allocation2 + $0x60] sm:$0xf] %v7324_v58  ;;  %6461 = vmatprep.subr.bf16.mxu1 %v6726_v19  ;;  %v6727_v31 = vld [vmem:[%s9063_s1 + $0x238] sm:$0xff]   ;;  %v6733_v34 = vld [vmem:[#allocation2 + $0x24] ss:$16 sps:$4 sm:$0xff]   ;;  %v6737_v45 = vld [vmem:[%s9063_s1 + $0x268] sm:$0xff]  }
  0x56   : > { %v404_v10 = vld [vmem:[#allocation2 + $0x70] sm:$0xff]  ;;  %v403_v16 = vld [vmem:[#allocation2 + $0x68] sm:$0xff]  ;;  %v6728_v35 = vld [vmem:[%s9063_s1 + $0x2b8] sm:$0xff]   ;;  %3078 = vst [vmem:[#allocation2 + $0x20] sm:$0xf] %v7159_v12 }
  0x57   : > { %v6709_v14 = vld [vmem:[#allocation2 + $0x64] ss:$16 sps:$4 sm:$0xff]   ;;  %885 = vst [vmem:[#allocation2 + $0x70] sm:$0xf] %v7384_v46  ;;  %v5857_v33 = vcombine.low %v402_v62, %v404_v10  ;;  %959 = vst [vmem:[#allocation2 + $0x68] sm:$0xf] %v7384_v46 }
  0x58   : > { %951 = vst [vmem:[#allocation2 + $0x64] sm:$0xf] %v7363_v26  ;;  %952 = vst [vmem:[#allocation2 + $0x74] sm:$0xf] %v7412_v63  ;;  %804 = vmatprep.mubr.bf16.mxu0 %v6709_v14  ;;  %v405_v22 = vld [vmem:[#allocation2 + $0x78] sm:$0xff]  ;;  %v6730_v41 = vld [vmem:[%s9063_s1 + $0x2f0] sm:$0xff]  }
  0x59   : > { %805 = vmatmul.mubr.bf16.gmra.mxu0 %v5857_v33  ;;  %v6711_v24 = vld [vmem:[#allocation2 + $0x6c] ss:$16 sps:$4 sm:$0xff]   ;;  %960 = vst [vmem:[#allocation2 + $0x78] sm:$0xf] %v7401_v57  ;;  %v5859_v27 = vcombine.low %v403_v16, %v405_v22  ;;  %3079 = vst [vmem:[#allocation2 + $0x30] sm:$0xf] %v7179_v21 }
  0x5a   : > { %1361 = vmatprep.mubr.bf16.mxu0 %v6721_v5  ;;  %974 = vst [vmem:[#allocation2 + $0x6c] sm:$0xf] %v7412_v63  ;;  %975 = vst [vmem:[#allocation2 + $0x7c] sm:$0xf] %v7432_v42  ;;  %869 = vmatprep.mubr.bf16.mxu1 %v6711_v24  ;;  %v977_v28 = vld [vmem:[#allocation2 + $0x8] sm:$0xff]  ;;  %v979_v29 = vld [vmem:[#allocation2 + $0x18] sm:$0xff] }
  0x5b   : > { %v976_v20 = vld [vmem:[#allocation2] sm:$0xff]  ;;  %v978_v25 = vld [vmem:[#allocation2 + $0x10] sm:$0xff]  ;;  %870 = vmatmul.mubr.bf16.gmra.mxu1 %v5859_v27  ;;  %3086 = vst [vmem:[#allocation2 + $0x24] sm:$0xf] %v7220_v54  ;;  %3087 = vst [vmem:[#allocation2 + $0x34] sm:$0xf] %v7234_v61  ;;  %v5968_v38 = vcombine.low %v977_v28, %v979_v29 }
  0x5c   : > { %v5966_v30 = vcombine.low %v976_v20, %v978_v25  ;;  %1426 = vmatprep.mubr.bf16.mxu1 %v6723_v8  ;;  %v6735_v37 = vld [vmem:[#allocation2 + $0x2c] ss:$16 sps:$4 sm:$0xff]   ;;  %3094 = vst [vmem:[#allocation2 + $0x28] sm:$0xf] %v7179_v21  ;;  %3095 = vst [vmem:[#allocation2 + $0x38] sm:$0xf] %v7253_v6 }
  0x5d   : > { %3117 = vst [vmem:[#allocation2 + $0x2c] sm:$0xf] %v7234_v61  ;;  %3118 = vst [vmem:[#allocation2 + $0x3c] sm:$0xf] %v7308_v49  ;;  %v6732_v43 = vld [vmem:[%s9063_s1 + $0x2b0] sm:$0xff]   ;;  %v6738_v48 = vld [vmem:[%s9063_s1 + $0x2e8] sm:$0xff]  }
  0x5e   : > { %v6739_v50 = vld [vmem:[%s9063_s1 + $0x228] sm:$0xff]   ;;  %v6741_v51 = vld [vmem:[%s9063_s1 + $0x260] sm:$0xff]   ;;  %v986_v62 = vld [vmem:[#allocation2 + $0x50] sm:$0xff]  ;;  %3096 = vst [vmem:[#allocation2 + $0x48] sm:$0xf] %v7267_v15 }
  0x5f   : > { %v6740_v55 = vld [vmem:[%s9063_s1 + $0x2a8] sm:$0xff]   ;;  %v6743_v56 = vld [vmem:[%s9063_s1 + $0x220] sm:$0xff]   ;;  %3081 = vst [vmem:[#allocation2 + $0x50] sm:$0xf] %v7267_v15  ;;  %3097 = vst [vmem:[#allocation2 + $0x58] sm:$0xf] %v7336_v0 }
  0x60   : > { %v6745_v59 = vld [vmem:[#allocation2 + $0x44] ss:$16 sps:$4 sm:$0xff]   ;;  %v6747_v2 = vld [vmem:[#allocation2 + $0x4c] ss:$16 sps:$4 sm:$0xff]  }
  0x61   : > { %1362 = vmatmul.mubr.bf16.vlgmr.msra.gmra.mxu0 %v5966_v30  ;;  %v984_v60 = vld [vmem:[#allocation2 + $0x40] sm:$0xff]  ;;  %3089 = vst [vmem:[#allocation2 + $0x54] sm:$0xf] %v7324_v58  ;;  %3119 = vst [vmem:[#allocation2 + $0x4c] sm:$0xf] %v7324_v58  ;;  %v6749_v10 = vld [vmem:[%s9063_s1 + $0x258] sm:$0xff]  }
  0x62   : > { %v980_v40 = vld [vmem:[#allocation2 + $0x20] sm:$0xff]  ;;  %6422 = vmatpush3.bf16.msra.mxu0 %v6727_v31  ;;  %v982_v12 = vld [vmem:[#allocation2 + $0x30] sm:$0xff]  ;;  %1369 = vmatprep.mubr.bf16.mxu0 %v6733_v34  ;;  %3080 = vst [vmem:[#allocation2 + $0x40] sm:$0xf] %v7253_v6  ;;  %3088 = vst [vmem:[#allocation2 + $0x44] sm:$0xf] %v7308_v49  ;;  %v5974_v14 = vcombine.low %v984_v60, %v986_v62 }
  0x63   : > { %6423 = vmatprep.subr.bf16.mxu0 %v6729_v32  ;;  %1427 = vmatmul.mubr.bf16.vlgmr.msra.gmra.mxu1 %v5968_v38  ;;  %v5970_v47 = vcombine.low %v980_v40, %v982_v12  ;;  %v6742_v3 = vld [vmem:[%s9063_s1 + $0x2e0] sm:$0xff]   ;;  %3120 = vst [vmem:[#allocation2 + $0x5c] sm:$0xf] %v7384_v46  ;;  %v6750_v15 = vld [vmem:[%s9063_s1 + $0x2d8] sm:$0xff]   ;;  %v6753_v33 = vld [vmem:[%s9063_s1 + $0x250] sm:$0xff]  }
  0x64   : > { %v981_v44 = vld [vmem:[#allocation2 + $0x28] sm:$0xff]  ;;  %v983_v21 = vld [vmem:[#allocation2 + $0x38] sm:$0xff]  ;;  %6462 = vmatpush3.bf16.msra.mxu1 %v6728_v35  ;;  %1434 = vmatprep.mubr.bf16.mxu1 %v6735_v37  ;;  %v6744_v6 = vld [vmem:[%s9063_s1 + $0x2a0] sm:$0xff]  }
  0x65   : > { %6463 = vmatprep.subr.bf16.mxu1 %v6730_v41  ;;  %v5972_v53 = vcombine.low %v981_v44, %v983_v21  ;;  %v6751_v16 = vld [vmem:[%s9063_s1 + $0x218] sm:$0xff]   ;;  %v6754_v20 = vld [vmem:[%s9063_s1 + $0x2d0] sm:$0xff]   ;;  %v988_v24 = vld [vmem:[#allocation2 + $0x60] sm:$0xff] }
  0x66   : > { %6424 = vmatpush3.bf16.msra.mxu0 %v6731_v36  ;;  %v6752_v18 = vld [vmem:[%s9063_s1 + $0x298] sm:$0xff]   ;;  %v6755_v22 = vld [vmem:[%s9063_s1 + $0x210] sm:$0xff]   ;;  %3082 = vst [vmem:[#allocation2 + $0x60] sm:$0xf] %v7336_v0  ;;  %v989_v29 = vld [vmem:[#allocation2 + $0x68] sm:$0xff] }
  0x67   : > { %6425 = vmatprep.subr.bf16.mxu0 %v6737_v45  ;;  %v990_v25 = vld [vmem:[#allocation2 + $0x70] sm:$0xff]  ;;  %v991_v30 = vld [vmem:[#allocation2 + $0x78] sm:$0xff]  ;;  %3098 = vst [vmem:[#allocation2 + $0x68] sm:$0xf] %v7351_v13  ;;  %v6761_v0 = vld [vmem:[%s9063_s1 + $0x248] sm:$0xff]  }
  0x68   : > { %6464 = vmatpush3.bf16.msra.mxu1 %v6732_v43  ;;  %v985_v5 = vld [vmem:[#allocation2 + $0x48] sm:$0xff]  ;;  %v6757_v27 = vld [vmem:[#allocation2 + $0x64] ss:$16 sps:$4 sm:$0xff]   ;;  %3083 = vst [vmem:[#allocation2 + $0x70] sm:$0xf] %v7351_v13  ;;  %v5978_v32 = vcombine.low %v988_v24, %v990_v25  ;;  %v5980_v36 = vcombine.low %v989_v29, %v991_v30  ;;  %v3126_v45 = vld [vmem:[#allocation2 + $0x18] sm:$0xff] }
  0x69   : > { %1370 = vmatmul.mubr.bf16.gmra.mxu0 %v5970_v47  ;;  %6465 = vmatprep.subr.bf16.mxu1 %v6738_v48  ;;  %v6756_v28 = vld [vmem:[%s9063_s1 + $0x290] sm:$0xff]   ;;  %3090 = vst [vmem:[#allocation2 + $0x64] sm:$0xf] %v7384_v46  ;;  %3091 = vst [vmem:[#allocation2 + $0x74] sm:$0xf] %v7401_v57  ;;  %v6762_v34 = vld [vmem:[%s9063_s1 + $0x2c8] sm:$0xff]  }
  0x6a   : > { %6426 = vmatpush3.bf16.msra.mxu0 %v6739_v50  ;;  %1377 = vmatprep.mubr.bf16.mxu0 %v6745_v59  ;;  %v987_v8 = vld [vmem:[#allocation2 + $0x58] sm:$0xff]  ;;  %v6763_v35 = vld [vmem:[%s9063_s1 + $0x208] sm:$0xff]   ;;  %v6765_v37 = vld [vmem:[%s9063_s1 + $0x240] sm:$0xff]   ;;  %3623 = vst [vmem:[#allocation2 + $0x18] sm:$0xf] %v7220_v54 }
  0x6b   : > { %6427 = vmatprep.subr.bf16.mxu0 %v6741_v51  ;;  %1435 = vmatmul.mubr.bf16.gmra.mxu1 %v5972_v53  ;;  %v5976_v19 = vcombine.low %v985_v5, %v987_v8  ;;  %v6759_v31 = vld [vmem:[#allocation2 + $0x6c] ss:$16 sps:$4 sm:$0xff]   ;;  %v6766_v38 = vld [vmem:[%s9063_s1 + $0x2c0] sm:$0xff]   ;;  %v3125_v43 = vld [vmem:[#allocation2 + $0x10] sm:$0xff] }
  0x6c   : > { %6466 = vmatpush3.bf16.msra.mxu1 %v6740_v55  ;;  %1442 = vmatprep.mubr.bf16.mxu1 %v6747_v2  ;;  %3121 = vst [vmem:[#allocation2 + $0x6c] sm:$0xf] %v7401_v57  ;;  %v6764_v13 = vld [vmem:[%s9063_s1 + $0x288] sm:$0xff]   ;;  %v6767_v40 = vld [vmem:[%s9063_s1 + $0x200] sm:$0xff]   ;;  %3607 = vst [vmem:[#allocation2 + $0x10] sm:$0xf] %v7156_v11 }
  0x6d   : > { %6467 = vmatprep.subr.bf16.mxu1 %v6742_v3  ;;  %v6768_v12 = vld [vmem:[%s9063_s1 + $0x280] sm:$0xff]   ;;  %v3124_v21 = vld [vmem:[#allocation2 + $0x8] sm:$0xff]  ;;  %v6777_v51 = vld [vmem:[%s9063_s1 + $0x370] sm:$0xff]  }
  0x6e   : > { %6428 = vmatpush3.bf16.msra.mxu0 %v6743_v56  ;;  %v3123_v41 = vld [vmem:[#allocation2] sm:$0xff]  ;;  %v6771_v47 = vld [vmem:[#allocation2 + $0xc] ss:$16 sps:$4 sm:$0xff]   ;;  %3622 = vst [vmem:[#allocation2 + $0x8] sm:$0xf] %v7156_v11  ;;  %v6080_v50 = vcombine.low %v3124_v21, %v3126_v45  ;;  %v6778_v53 = vld [vmem:[%s9063_s1 + $0x3f0] sm:$0xff]  }
  0x6f   : > { %6429 = vmatprep.subr.bf16.mxu0 %v6749_v10  ;;  %v6769_v44 = vld [vmem:[#allocation2 + $0x4] ss:$16 sps:$4 sm:$0xff]   ;;  %3606 = vst [vmem:[#allocation2] sm:$0xf] %v7144_v1  ;;  %v6078_v48 = vcombine.low %v3123_v41, %v3125_v43  ;;  %3637 = vst [vmem:[#allocation2 + $0xc] sm:$0xf] %v7199_v39 }
  0x70   : > { %6468 = vmatpush3.bf16.msra.mxu1 %v6744_v6  ;;  %3614 = vst [vmem:[#allocation2 + $0x4] sm:$0xf] %v7174_v17  ;;  %3615 = vst [vmem:[#allocation2 + $0x14] sm:$0xf] %v7199_v39  ;;  %v6773_v1 = vld [vmem:[%s9063_s1 + $0x378] sm:$0xff]   ;;  %v6779_v55 = vld [vmem:[%s9063_s1 + $0x330] sm:$0xff]  }
  0x71   : > { %1378 = vmatmul.mubr.bf16.gmra.mxu0 %v5974_v14  ;;  %6469 = vmatprep.subr.bf16.mxu1 %v6750_v15  ;;  %3638 = vst [vmem:[#allocation2 + $0x1c] sm:$0xf] %v7247_v4  ;;  %v6774_v17 = vld [vmem:[%s9063_s1 + $0x3f8] sm:$0xff]   ;;  %v6780_v56 = vld [vmem:[%s9063_s1 + $0x3b0] sm:$0xff]   ;;  %v3127_v59 = vld [vmem:[#allocation2 + $0x20] sm:$0xff] }
  0x72   : > { %6430 = vmatpush3.bf16.msra.mxu0 %v6751_v16  ;;  %1385 = vmatprep.mubr.bf16.mxu0 %v6757_v27  ;;  %v6775_v11 = vld [vmem:[%s9063_s1 + $0x338] sm:$0xff]   ;;  %v3129_v60 = vld [vmem:[#allocation2 + $0x30] sm:$0xff]  ;;  %3608 = vst [vmem:[#allocation2 + $0x20] sm:$0xf] %v7220_v54  ;;  %v3128_v2 = vld [vmem:[#allocation2 + $0x28] sm:$0xff] }
  0x73   : > { %6431 = vmatprep.subr.bf16.mxu0 %v6753_v33  ;;  %1443 = vmatmul.mubr.bf16.gmra.mxu1 %v5976_v19  ;;  %v6776_v39 = vld [vmem:[%s9063_s1 + $0x3b8] sm:$0xff]   ;;  %v6781_v62 = vld [vmem:[#allocation2 + $0x24] ss:$16 sps:$4 sm:$0xff]   ;;  %3609 = vst [vmem:[#allocation2 + $0x30] sm:$0xf] %v7234_v61  ;;  %v6082_v5 = vcombine.low %v3127_v59, %v3129_v60  ;;  %v6786_v8 = vld [vmem:[%s9063_s1 + $0x3e8] sm:$0xff]  }
  0x74   : > { %6470 = vmatpush3.bf16.msra.mxu1 %v6752_v18  ;;  %1450 = vmatprep.mubr.bf16.mxu1 %v6759_v31  ;;  %3616 = vst [vmem:[#allocation2 + $0x24] sm:$0xf] %v7247_v4  ;;  %3617 = vst [vmem:[#allocation2 + $0x34] sm:$0xf] %v7281_v23  ;;  %v3130_v3 = vld [vmem:[#allocation2 + $0x38] sm:$0xff]  ;;  %v6785_v4 = vld [vmem:[%s9063_s1 + $0x368] sm:$0xff]  }
  0x75   : > { %6471 = vmatprep.subr.bf16.mxu1 %v6754_v20  ;;  %v6783_v6 = vld [vmem:[#allocation2 + $0x2c] ss:$16 sps:$4 sm:$0xff]   ;;  %3624 = vst [vmem:[#allocation2 + $0x28] sm:$0xf] %v7234_v61  ;;  %3625 = vst [vmem:[#allocation2 + $0x38] sm:$0xf] %v7308_v49  ;;  %v6084_v54 = vcombine.low %v3128_v2, %v3130_v3 }
  0x76   : > { %6432 = vmatpush3.bf16.msra.mxu0 %v6755_v22  ;;  %3639 = vst [vmem:[#allocation2 + $0x2c] sm:$0xf] %v7281_v23  ;;  %3640 = vst [vmem:[#allocation2 + $0x3c] sm:$0xf] %v7347_v9  ;;  %v6787_v61 = vld [vmem:[%s9063_s1 + $0x328] sm:$0xff]   ;;  %v6789_v10 = vld [vmem:[%s9063_s1 + $0x360] sm:$0xff]  }
  0x77   : > { %6433 = vmatprep.subr.bf16.mxu0 %v6761_v0  ;;  %v6788_v23 = vld [vmem:[%s9063_s1 + $0x3a8] sm:$0xff]   ;;  %v6790_v14 = vld [vmem:[%s9063_s1 + $0x3e0] sm:$0xff]   ;;  %v3133_v18 = vld [vmem:[#allocation2 + $0x50] sm:$0xff] }
  0x78   : > { %6472 = vmatpush3.bf16.msra.mxu1 %v6756_v28  ;;  %v6791_v15 = vld [vmem:[%s9063_s1 + $0x320] sm:$0xff]   ;;  %3611 = vst [vmem:[#allocation2 + $0x50] sm:$0xf] %v7324_v58  ;;  %v3132_v20 = vld [vmem:[#allocation2 + $0x48] sm:$0xff]  ;;  %v3134_v22 = vld [vmem:[#allocation2 + $0x58] sm:$0xff] }
  0x79   : > { %1386 = vmatmul.mubr.bf16.gmra.mxu0 %v5978_v32  ;;  %6473 = vmatprep.subr.bf16.mxu1 %v6762_v34  ;;  %v6792_v16 = vld [vmem:[%s9063_s1 + $0x3a0] sm:$0xff]   ;;  %v6795_v24 = vld [vmem:[#allocation2 + $0x4c] ss:$16 sps:$4 sm:$0xff]   ;;  %3626 = vst [vmem:[#allocation2 + $0x48] sm:$0xf] %v7324_v58  ;;  %v6801_v28 = vld [vmem:[%s9063_s1 + $0x350] sm:$0xff]  }
  0x7a   : > { %6434 = vmatpush3.bf16.msra.mxu0 %v6763_v35  ;;  %3508 = vmatprep.mubr.bf16.mxu0 %v6769_v44  ;;  %v3131_v33 = vld [vmem:[#allocation2 + $0x40] sm:$0xff]  ;;  %3627 = vst [vmem:[#allocation2 + $0x58] sm:$0xf] %v7384_v46  ;;  %3641 = vst [vmem:[#allocation2 + $0x4c] sm:$0xf] %v7363_v26  ;;  %v6798_v27 = vld [vmem:[%s9063_s1 + $0x3d8] sm:$0xff]  }
  0x7b   : > { %6435 = vmatprep.subr.bf16.mxu0 %v6765_v37  ;;  %1451 = vmatmul.mubr.bf16.gmra.mxu1 %v5980_v36  ;;  %v6793_v19 = vld [vmem:[#allocation2 + $0x44] ss:$16 sps:$4 sm:$0xff]   ;;  %3610 = vst [vmem:[#allocation2 + $0x40] sm:$0xf] %v7308_v49  ;;  %v6086_v25 = vcombine.low %v3131_v33, %v3133_v18  ;;  %3642 = vst [vmem:[#allocation2 + $0x5c] sm:$0xf] %v7412_v63  ;;  %v6088_v49 = vcombine.low %v3132_v20, %v3134_v22 }
  0x7c   : > { %6474 = vmatpush3.bf16.msra.mxu1 %v6764_v13  ;;  %3573 = vmatprep.mubr.bf16.mxu1 %v6771_v47  ;;  %3618 = vst [vmem:[#allocation2 + $0x44] sm:$0xf] %v7347_v9  ;;  %3619 = vst [vmem:[#allocation2 + $0x54] sm:$0xf] %v7363_v26  ;;  %v6797_v9 = vld [vmem:[%s9063_s1 + $0x358] sm:$0xff]   ;;  %v6802_v29 = vld [vmem:[%s9063_s1 + $0x3d0] sm:$0xff]  }
  0x7d   : > { %6475 = vmatprep.subr.bf16.mxu1 %v6766_v38  ;;  %v6799_v58 = vld [vmem:[%s9063_s1 + $0x318] sm:$0xff]   ;;  %v6803_v30 = vld [vmem:[%s9063_s1 + $0x310] sm:$0xff]   ;;  %v3135_v32 = vld [vmem:[#allocation2 + $0x60] sm:$0xff] }
  0x7e   : > { %6436 = vmatpush3.bf16.msra.mxu0 %v6767_v40  ;;  %v6800_v26 = vld [vmem:[%s9063_s1 + $0x398] sm:$0xff]   ;;  %v6804_v31 = vld [vmem:[%s9063_s1 + $0x390] sm:$0xff]   ;;  %3612 = vst [vmem:[#allocation2 + $0x60] sm:$0xf] %v7384_v46  ;;  %v198_v35 = vld [vmem:[%s7095_s18 + $0x48] sm:$0xf] }
  0x7f   : > { %6501 = vmatprep.subr.bf16.mxu0 %v6773_v1  ;;  %v3137_v0 = vld [vmem:[#allocation2 + $0x70] sm:$0xff]  ;;  %v208_v13 = vld [vmem:[%s7095_s18 + $0x4c] sm:$0x1]  ;;  %3099 = vst [vmem:[#allocation2 + $0x78] sm:$0xf] %v198_v35  ;;  %v3101_v37 = vshrl.u32 %v198_v35, 16 }
  0x80   : > { %6476 = vmatpush3.bf16.msra.mxu1 %v6768_v12  ;;  %v6805_v34 = vld [vmem:[#allocation2 + $0x64] ss:$16 sps:$4 sm:$0xff]   ;;  %3613 = vst [vmem:[#allocation2 + $0x70] sm:$0xf] %v7401_v57  ;;  %v6090_v36 = vcombine.low %v3135_v32, %v3137_v0  ;;  %v3104_v38 = vshll.u32 %v198_v35, 16  ;;  %v3110_v40 = vshll.u32 %v208_v13, 16 }
  0x81   : > { %3509 = vmatmul.mubr.bf16.vlgmr.msra.gmra.mxu0 %v6078_v48  ;;  %6541 = vmatprep.subr.bf16.mxu1 %v6774_v17  ;;  %3620 = vst [vmem:[#allocation2 + $0x64] sm:$0xf] %v7412_v63  ;;  %3621 = vst [vmem:[#allocation2 + $0x74] sm:$0xf] %v7432_v42  ;;  %v6809_v12 = vld [vmem:[%s9063_s1 + $0x348] sm:$0xff]   ;;  %v3103_v63 = vrot.slane %v3101_v37, 4 }
  0x82   : > { %6502 = vmatpush3.bf16.msra.mxu0 %v6775_v11  ;;  %3516 = vmatprep.mubr.bf16.mxu0 %v6781_v62  ;;  %v6810_v46 = vld [vmem:[%s9063_s1 + $0x3c8] sm:$0xff]   ;;  %v3106_v41 = vrot.slane %v3104_v38, 5  ;;  %v3112_v21 = vrot.slane %v3110_v40, 5  ;;  %v6813_v48 = vld [vmem:[%s9063_s1 + $0x340] sm:$0xff]  }
  0x83   : > { %3574 = vmatmul.mubr.bf16.vlgmr.msra.gmra.mxu1 %v6080_v50  ;;  %6503 = vmatprep.subr.bf16.mxu0 %v6777_v51  ;;  %v6811_v43 = vld [vmem:[%s9063_s1 + $0x308] sm:$0xff]   ;;  %v6814_v17 = vld [vmem:[%s9063_s1 + $0x3c0] sm:$0xff]  }
  0x84   : > { %6542 = vmatpush3.bf16.msra.mxu1 %v6776_v39  ;;  %3581 = vmatprep.mubr.bf16.mxu1 %v6783_v6  ;;  %v3107_v44 = vor.u32 %v3106_v41, %v3103_v63  ;;  %v6812_v45 = vld [vmem:[%s9063_s1 + $0x388] sm:$0xff]   ;;  %v6815_v50 = vld [vmem:[%s9063_s1 + $0x300] sm:$0xff]  }
  0x85   : > { %6543 = vmatprep.subr.bf16.mxu1 %v6778_v53  ;;  %v218_v47 = vld [vmem:[%s7095_s18 + $0x48] sm:$0xe]  ;;  %v6816_v39 = vld [vmem:[%s9063_s1 + $0x380] sm:$0xff]   ;;  %v6822_v3 = vld [vmem:[#allocation2 + $0xc] ss:$16 sps:$4 sm:$0xff]   ;;  %s6848_s18 = scalar_lea.vmem %s6847_s21, 8192 }
  0x86   : > { %6504 = vmatpush3.bf16.msra.mxu0 %v6779_v55  ;;  %v3108_v1 = vrot.slane %v3107_v44, 4  ;;  %v6817_v51 = vld [vmem:[#allocation2] ss:$16 sps:$4 sm:$0xff]   ;;  %v6126_v53 = vrot.slane %v218_v47, 9  ;;  %v3634_v55 = vrot.slane %v208_v13, 5  ;;  %v3136_v60 = vld [vmem:[#allocation2 + $0x68] sm:$0xff]  ;;  %p6850_p2 = scmp.lt.s32.totalorder %s6848_s18, %s6842_s11 }
  0x87   : > { %6505 = vmatprep.subr.bf16.mxu0 %v6785_v4  ;;  %v6823_v59 = vld [vmem:[#allocation2 + $0x24] ss:$16 sps:$4 sm:$0xff]   ;;  %3628 = vst [vmem:[#allocation2 + $0x68] sm:$0xf] %v7401_v57  ;;  %v6820_v7 = vld [vmem:[#allocation2 + $0x8] ss:$16 sps:$4 sm:$0xff]  }
  0x88   : > { %6544 = vmatpush3.bf16.msra.mxu1 %v6780_v56  ;;  %v3113_v11 = vsel %vm7126_vm2, %v3108_v1, %v3112_v21  ;;  %v6819_v56 = vld [vmem:[#allocation2 + $0x4] ss:$16 sps:$4 sm:$0xff]   ;;  %v3635_v52 = vsel %vm7148_vm5, %v6126_v53, %v3634_v55  ;;  %v6825_v4 = vld [vmem:[#allocation2 + $0x2c] ss:$16 sps:$4 sm:$0xff]   ;;  %v6828_v57 = vld [vmem:[#allocation2 + $0x28] ss:$16 sps:$4 sm:$0xff]   ;;  %p6851_p3 = por %p6850_p2, %p6849_p1 }
  0x89   : > { %3517 = vmatmul.mubr.bf16.gmra.mxu0 %v6082_v5  ;;  %6545 = vmatprep.subr.bf16.mxu1 %v6786_v8  ;;  %3122 = vst [vmem:[#allocation2 + $0x7c] sm:$0xf] %v3113_v11  ;;  %v6827_v5 = vld [vmem:[#allocation2 + $0x20] ss:$16 sps:$4 sm:$0xff]  }
  0x8a   : > { %6506 = vmatpush3.bf16.msra.mxu0 %v6787_v61  ;;  %3524 = vmatprep.mubr.bf16.mxu0 %v6793_v19  ;;  %v6833_v8 = vld [vmem:[#allocation2 + $0x40] ss:$16 sps:$4 sm:$0xff]   ;;  %v6835_v61 = vld [vmem:[#allocation2 + $0x64] ss:$16 sps:$4 sm:$0xff]   ;;  %p6852_p5 = pnand %p6851_p3, %p6845_p0 }
  0x8b   : > { %3582 = vmatmul.mubr.bf16.gmra.mxu1 %v6084_v54  ;;  %6507 = vmatprep.subr.bf16.mxu0 %v6789_v10  ;;  %v6829_v54 = vld [vmem:[#allocation2 + $0x44] ss:$16 sps:$4 sm:$0xff]   ;;  %v6834_v10 = vld [vmem:[#allocation2 + $0x48] ss:$16 sps:$4 sm:$0xff]  }
  0x8c   : > { %6546 = vmatpush3.bf16.msra.mxu1 %v6788_v23  ;;  %3589 = vmatprep.mubr.bf16.mxu1 %v6795_v24  ;;  %v6831_v23 = vld [vmem:[#allocation2 + $0x4c] ss:$16 sps:$4 sm:$0xff]  }
  0x8d   : > { %6547 = vmatprep.subr.bf16.mxu1 %v6790_v14 }
  0x8e   : > { %6508 = vmatpush3.bf16.msra.mxu0 %v6791_v15 }
  0x8f   : > { %6509 = vmatprep.subr.bf16.mxu0 %v6797_v9  ;;  %v7689_v9 = vld [vmem:[%s9064_s2] ss:$0 sm:$0xff] }
  0x90   : > { %6548 = vmatpush3.bf16.msra.mxu1 %v6792_v16  ;;  %v3138_v62 = vld [vmem:[#allocation2 + $0x78] sm:$0xff] }
  0x91   : > { %3525 = vmatmul.mubr.bf16.gmra.mxu0 %v6086_v25  ;;  %6549 = vmatprep.subr.bf16.mxu1 %v6798_v27  ;;  %v6807_v2 = vld [vmem:[#allocation2 + $0x6c] ss:$16 sps:$4 sm:$0xff]   ;;  %3629 = vst [vmem:[#allocation2 + $0x78] sm:$0xf] %v3113_v11  ;;  %v6092_v6 = vcombine.low %v3136_v60, %v3138_v62 }
  0x92   : > { %6510 = vmatpush3.bf16.msra.mxu0 %v6799_v58  ;;  %3532 = vmatprep.mubr.bf16.mxu0 %v6805_v34  ;;  %3643 = vst [vmem:[#allocation2 + $0x6c] sm:$0xf] %v7432_v42  ;;  %3644 = vst [vmem:[#allocation2 + $0x7c] sm:$0xf] %v3635_v52  ;;  %v6839_v42 = vld [vmem:[#allocation2 + $0x60] ss:$16 sps:$4 sm:$0xff]  }
  0x93   : > { %3590 = vmatmul.mubr.bf16.gmra.mxu1 %v6088_v49  ;;  %6511 = vmatprep.subr.bf16.mxu0 %v6801_v28  ;;  %v6920_v58 = vmov 1966171168   ;;  %v1471_v28 = vlaneseq }
  0x94   : > { %6550 = vmatpush3.bf16.msra.mxu1 %v6800_v26  ;;  %3597 = vmatprep.mubr.bf16.mxu1 %v6807_v2  ;;  %v1469_v26 = vunpack.c.l.s4 %v6920_v58 }
  0x95   : > { %6551 = vmatprep.subr.bf16.mxu1 %v6802_v29 }
  0x96   : > { %6512 = vmatpush3.bf16.msra.mxu0 %v6803_v30  ;;  %v1470_v13 = vunpack.c.0.s8 %v1469_v26 }
  0x97   : > { %6513 = vmatprep.subr.bf16.mxu0 %v6809_v12 }
  0x98   : > { %6552 = vmatpush3.bf16.msra.mxu1 %v6804_v31  ;;  %v6840_v15 = vld [vmem:[#allocation2 + $0x68] ss:$16 sps:$4 sm:$0xff]  }
  0x99   : > { %3533 = vmatmul.mubr.bf16.gmra.mxu0 %v6090_v36  ;;  %6553 = vmatprep.subr.bf16.mxu1 %v6810_v46  ;;  %v6837_v14 = vld [vmem:[#allocation2 + $0x6c] ss:$16 sps:$4 sm:$0xff]   ;;  %v1472_v36 = vshrl.u32 %v1471_v28, 7 }
  0x9a   : > { %6514 = vmatpush3.bf16.msra.mxu0 %v6811_v43  ;;  %4030 = vmatprep.mubr.bf16.mxu0 %v6819_v56 }
  0x9b   : > { %6515 = vmatprep.subr.bf16.mxu0 %v6813_v48  ;;  %3598 = vmatmul.mubr.bf16.gmra.mxu1 %v6092_v6  ;;  %v7693_v41 = vsub.s32 %v1470_v13, %v1472_v36 }
  0x9c   : > { %6554 = vmatpush3.bf16.msra.mxu1 %v6812_v45  ;;  %4095 = vmatprep.mubr.bf16.mxu1 %v6822_v3 }
  0x9d   : > { %6555 = vmatprep.subr.bf16.mxu1 %v6814_v17  ;;  %v6921_v17 = vmov 1983009808  }
  0x9e   : > { %6516 = vmatpush3.bf16.msra.mxu0 %v6815_v50  ;;  %v2775_v50 = vunpack.c.l.s4 %v6921_v17 }
  0xa0   : > { %6556 = vmatpush3.bf16.msra.mxu1 %v6816_v39  ;;  %v2776_v52 = vunpack.c.0.s8 %v2775_v50 }
  0xa1   : > { %4031 = vmatmul.mubr.bf16.vlgmr.msra.gmra.mxu0 %v6817_v51 }
  0xa2   : > { %4038 = vmatprep.mubr.bf16.mxu0 %v6823_v59 }
  0xa3   : > { %4096 = vmatmul.mubr.bf16.vlgmr.msra.gmra.mxu1 %v6820_v7 }
  0xa4   : > { %4103 = vmatprep.mubr.bf16.mxu1 %v6825_v4 }
  0xa9   : > { %4039 = vmatmul.mubr.bf16.gmra.mxu0 %v6827_v5 }
  0xaa   : > { %4046 = vmatprep.mubr.bf16.mxu0 %v6829_v54 }
  0xab   : > { %4104 = vmatmul.mubr.bf16.gmra.mxu1 %v6828_v57 }
  0xac   : > { %4111 = vmatprep.mubr.bf16.mxu1 %v6831_v23  ;;  %v7705_v23 = vsub.s32 0, %v1472_v36 }
  0xb1   : > { %4047 = vmatmul.mubr.bf16.gmra.mxu0 %v6833_v8 }
  0xb2   : > { %4054 = vmatprep.mubr.bf16.mxu0 %v6835_v61 }
  0xb3   : > { %4112 = vmatmul.mubr.bf16.gmra.mxu1 %v6834_v10 }
  0xb4   : > { %4119 = vmatprep.mubr.bf16.mxu1 %v6837_v14 }
  0xb9   : > { %4055 = vmatmul.mubr.bf16.gmra.mxu0 %v6839_v42 }
  0xbb   : > { %4120 = vmatmul.mubr.bf16.gmra.mxu1 %v6840_v15 }
  0xf6   : > { %v6277_v16 = vpop.f32.mrf.mxu0 }
  0xf7   : > { %v6317_v18 = vpop.f32.mrf.mxu1 }
  0xf8   : > { %v6278_v33 = vpop.f32.mrf.mxu0 }
  0xf9   : > { %v6318_v20 = vpop.f32.mrf.mxu1  ;;  %v6279_v25 = vadd.f32 %v6278_v33, %v6277_v16  ;;  %v7708_v16 = vsub.s32 %v2776_v52, %v1472_v36 }
  0xfa   : > { %v6280_v19 = vpop.f32.mrf.mxu0  ;;  %v6319_v34 = vadd.f32 %v6318_v20, %v6317_v18 }
  0xfb   : > { %v6320_v22 = vpop.f32.mrf.mxu1  ;;  %v783_v30 = vadd.f32 %v6279_v25, %v7689_v9 }
  0xfc   : > { %v6281_v24 = vpop.f32.mrf.mxu0 }
  0xfd   : > { %v6321_v49 = vpop.f32.mrf.mxu1  ;;  %v6282_v32 = vadd.f32 %v6281_v24, %v6280_v19  ;;  %v848_v40 = vadd.f32 %v6319_v34, %v783_v30 }
  0xfe   : > { %v6322_v43 = vadd.f32 %v6321_v49, %v6320_v22 }
  0xff   : > { %v786_v12 = vadd.f32 %v6282_v32, %v7689_v9  ;;  %v1467_v21 = vcombine.high %v848_v40, %v848_v40  ;;  %v1474_v11 = vrot.slane %v848_v40, %v7693_v41 }
 0x101   : > { %v851_v45 = vadd.f32 %v6322_v43, %v786_v12  ;;  %v1481_v51 = vrot.slane %v1467_v21, %v7693_v41  ;;  %v1482_v62 = vcombine.high %v1474_v11, %v1474_v11  ;;  %v7701_v4 = vrot.slane %v1474_v11, %v7693_v41 }
 0x102   : > { %v6283_v27 = vpop.f32.mrf.mxu0 }
 0x103   : > { %v1516_v56 = vcombine.high %v851_v45, %v851_v45  ;;  %v1483_v5 = vcombine.high %v1481_v51, %v1481_v51  ;;  %v1523_v54 = vrot.slane %v851_v45, %v7693_v41  ;;  %v7711_v33 = vrot.slane %v1481_v51, %v7693_v41 }
 0x104   : > { %v6284_v29 = vpop.f32.mrf.mxu0  ;;  %v7714_v18 = vrot.slane %v1482_v62, %v7693_v41  ;;  %v1512_v58 = vcombine.high %v7701_v4, %v7701_v4 }
 0x105   : > { %v6285_v37 = vadd.f32 %v6284_v29, %v6283_v27  ;;  %v1530_v8 = vrot.slane %v1516_v56, %v7693_v41  ;;  %v7718_v24 = vrot.slane %v1483_v5, %v7693_v41  ;;  %v1531_v25 = vcombine.high %v1523_v54, %v1523_v54 }
 0x106   : > { %v6286_v0 = vpop.f32.mrf.mxu0  ;;  %v7721_v49 = vrot.slane %v1523_v54, %v7693_v41 }
 0x107   : > { %v6323_v31 = vpop.f32.mrf.mxu1  ;;  %v791_v44 = vadd.f32 %v6285_v37, %v7689_v9  ;;  %v1532_v26 = vcombine.high %v1530_v8, %v1530_v8  ;;  %v7726_v28 = vrot.slane %v1530_v8, %v7693_v41  ;;  %v7738_v40 = vrot.slane %v1531_v25, %v7693_v41 }
 0x108   : > { %v6287_v38 = vpop.f32.mrf.mxu0 }
 0x109   : > { %v6324_v35 = vpop.f32.mrf.mxu1  ;;  %v6288_v63 = vadd.f32 %v6287_v38, %v6286_v0 }
 0x10a   : > { %v6325_v47 = vadd.f32 %v6324_v35, %v6323_v31 }
 0x10b   : > { %v6326_v46 = vpop.f32.mrf.mxu1  ;;  %v794_v1 = vadd.f32 %v6288_v63, %v7689_v9  ;;  %v7743_v63 = vrot.slane %v1532_v26, %v7693_v41 }
 0x10c   : > { %v856_v39 = vadd.f32 %v6325_v47, %v791_v44 }
 0x10d   : > { %v6327_v48 = vpop.f32.mrf.mxu1  ;;  %v6289_v55 = vpop.f32.mrf.mxu0 }
 0x10e   : > { %v6328_v53 = vadd.f32 %v6327_v48, %v6326_v46  ;;  %v1565_v2 = vcombine.high %v856_v39, %v856_v39  ;;  %v1572_v42 = vrot.slane %v856_v39, %v7693_v41 }
 0x10f   : > { %v6290_v60 = vpop.f32.mrf.mxu0  ;;  %v6329_v3 = vpop.f32.mrf.mxu1 }
 0x110   : > { %v859_v59 = vadd.f32 %v6328_v53, %v794_v1  ;;  %v6291_v6 = vadd.f32 %v6290_v60, %v6289_v55  ;;  %v1579_v19 = vrot.slane %v1565_v2, %v7693_v41  ;;  %v1580_v31 = vcombine.high %v1572_v42, %v1572_v42 }
 0x111   : > { %v6292_v7 = vpop.f32.mrf.mxu0  ;;  %v6330_v57 = vpop.f32.mrf.mxu1  ;;  %v7748_v44 = vrot.slane %v1572_v42, %v7693_v41 }
 0x112   : > { %v799_v61 = vadd.f32 %v6291_v6, %v7689_v9  ;;  %v1614_v10 = vcombine.high %v859_v59, %v859_v59  ;;  %v6331_v14 = vadd.f32 %v6330_v57, %v6329_v3  ;;  %v1621_v32 = vrot.slane %v859_v59, %v7693_v41 }
 0x113   : > { %v6293_v15 = vpop.f32.mrf.mxu0  ;;  %v6332_v20 = vpop.f32.mrf.mxu1  ;;  %v1581_v36 = vcombine.high %v1579_v19, %v1579_v19  ;;  %v7752_v47 = vrot.slane %v1579_v19, %v7693_v41  ;;  %v7755_v48 = vrot.slane %v1580_v31, %v7693_v41 }
 0x114   : > { %v6294_v22 = vadd.f32 %v6293_v15, %v6292_v7  ;;  %v864_v27 = vadd.f32 %v6331_v14, %v799_v61  ;;  %v1628_v0 = vrot.slane %v1614_v10, %v7693_v41  ;;  %v1629_v1 = vcombine.high %v1621_v32, %v1621_v32 }
 0x115   : > { %v6333_v30 = vpop.f32.mrf.mxu1  ;;  %v7758_v50 = vrot.slane %v1581_v36, %v7693_v41  ;;  %v7765_v56 = vrot.slane %v1621_v32, %v7693_v41 }
 0x116   : > { %v802_v29 = vadd.f32 %v6294_v22, %v7689_v9  ;;  %v6334_v34 = vadd.f32 %v6333_v30, %v6332_v20  ;;  %v1663_v37 = vcombine.high %v864_v27, %v864_v27  ;;  %v1670_v21 = vrot.slane %v864_v27, %v7693_v41 }
 0x117   : > { %v1630_v17 = vcombine.high %v1628_v0, %v1628_v0  ;;  %v7768_v59 = vrot.slane %v1628_v0, %v7693_v41  ;;  %v7778_v7 = vrot.slane %v1629_v1, %v7693_v41 }
 0x118   : > { %v867_v46 = vadd.f32 %v6334_v34, %v802_v29  ;;  %v1677_v11 = vrot.slane %v1663_v37, %v7693_v41  ;;  %v1678_v2 = vcombine.high %v1670_v21, %v1670_v21  ;;  %v7793_v26 = vrot.slane %v1670_v21, %v7693_v41 }
 0x119   : > { %v6295_v45 = vpop.f32.mrf.mxu0  ;;  %v7781_v8 = vrot.slane %v1630_v17, %v7693_v41 }
 0x11a   : > { %v1712_v39 = vcombine.high %v867_v46, %v867_v46  ;;  %v1719_v51 = vrot.slane %v867_v46, %v7693_v41  ;;  %v1679_v10 = vcombine.high %v1677_v11, %v1677_v11  ;;  %v7796_v29 = vrot.slane %v1677_v11, %v7693_v41 }
 0x11b   : > { %v6296_v53 = vpop.f32.mrf.mxu0  ;;  %v6335_v6 = vpop.f32.mrf.mxu1  ;;  %v7799_v30 = vrot.slane %v1678_v2, %v7693_v41 }
 0x11c   : > { %v6297_v60 = vadd.f32 %v6296_v53, %v6295_v45  ;;  %v1726_v3 = vrot.slane %v1712_v39, %v7693_v41  ;;  %v1727_v14 = vcombine.high %v1719_v51, %v1719_v51  ;;  %v7807_v21 = vrot.slane %v1679_v10, %v7693_v41 }
 0x11d   : > { %v6298_v5 = vpop.f32.mrf.mxu0  ;;  %v6336_v15 = vpop.f32.mrf.mxu1  ;;  %v7810_v45 = vrot.slane %v1719_v51, %v7693_v41 }
 0x11e   : > { %v807_v61 = vadd.f32 %v6297_v60, %v7689_v9  ;;  %v6337_v25 = vadd.f32 %v6336_v15, %v6335_v6  ;;  %v1728_v31 = vcombine.high %v1726_v3, %v1726_v3  ;;  %v7813_v1 = vrot.slane %v1726_v3, %v7693_v41 }
 0x11f   : > { %v6299_v19 = vpop.f32.mrf.mxu0  ;;  %v6338_v32 = vpop.f32.mrf.mxu1  ;;  %v7816_v17 = vrot.slane %v1727_v14, %v7693_v41 }
 0x120   : > { %v6300_v27 = vadd.f32 %v6299_v19, %v6298_v5  ;;  %v872_v37 = vadd.f32 %v6337_v25, %v807_v61  ;;  %v7826_v61 = vrot.slane %v1728_v31, %v7693_v41 }
 0x121   : > { %v6357_v0 = vpop.f32.mrf.mxu0  ;;  %v6339_v11 = vpop.f32.mrf.mxu1 }
 0x122   : > { %v810_v46 = vadd.f32 %v6300_v27, %v7689_v9  ;;  %v1761_v53 = vcombine.high %v872_v37, %v872_v37  ;;  %v1768_v60 = vrot.slane %v872_v37, %v7693_v41  ;;  %v6340_v2 = vadd.f32 %v6339_v11, %v6338_v32 }
 0x123   : > { %v6358_v39 = vpop.f32.mrf.mxu0  ;;  %v6397_v10 = vpop.f32.mrf.mxu1 }
 0x124   : > { %v6359_v6 = vadd.f32 %v6358_v39, %v6357_v0  ;;  %v1775_v15 = vrot.slane %v1761_v53, %v7693_v41  ;;  %v1776_v19 = vcombine.high %v1768_v60, %v1768_v60  ;;  %v7830_v25 = vrot.slane %v1768_v60, %v7693_v41 }
 0x125   : > { %v6360_v14 = vpop.f32.mrf.mxu0  ;;  %v875_v27 = vadd.f32 %v6340_v2, %v810_v46  ;;  %v6398_v11 = vpop.f32.mrf.mxu1 }
 0x126   : > { %v1364_v31 = vadd.f32 %v6359_v6, %v7689_v9  ;;  %v1777_v51 = vcombine.high %v1775_v15, %v1775_v15  ;;  %v7842_v60 = vrot.slane %v1775_v15, %v7693_v41  ;;  %v7845_v46 = vrot.slane %v1776_v19, %v7693_v41 }
 0x127   : > { %v6361_v39 = vpop.f32.mrf.mxu0  ;;  %v1810_v2 = vcombine.high %v875_v27, %v875_v27  ;;  %v1817_v0 = vrot.slane %v875_v27, %v7693_v41  ;;  %v6399_v32 = vadd.f32 %v6398_v11, %v6397_v10  ;;  %v6400_v3 = vpop.f32.mrf.mxu1 }
 0x128   : > { %v6362_v37 = vadd.f32 %v6361_v39, %v6360_v14  ;;  %v7851_v36 = vrot.slane %v1777_v51, %v7693_v41 }
 0x129   : > { %v6363_v5 = vpop.f32.mrf.mxu0  ;;  %v1824_v53 = vrot.slane %v1810_v2, %v7693_v41  ;;  %v1825_v27 = vcombine.high %v1817_v0, %v1817_v0  ;;  %v7859_v10 = vrot.slane %v1817_v0, %v7693_v41  ;;  %v1429_v14 = vadd.f32 %v6399_v32, %v1364_v31  ;;  %v6401_v11 = vpop.f32.mrf.mxu1 }
 0x12a   : > { %v1367_v6 = vadd.f32 %v6362_v37, %v7689_v9  ;;  %v6402_v22 = vadd.f32 %v6401_v11, %v6400_v3 }
 0x12b   : > { %v6364_v39 = vpop.f32.mrf.mxu0  ;;  %v1826_v34 = vcombine.high %v1824_v53, %v1824_v53  ;;  %v7867_v2 = vrot.slane %v1824_v53, %v7693_v41  ;;  %v7870_v0 = vrot.slane %v1825_v27, %v7693_v41  ;;  %v6403_v32 = vpop.f32.mrf.mxu1  ;;  %v1931_v51 = vcombine.high %v1429_v14, %v1429_v14 }
 0x12c   : > { %v6365_v15 = vadd.f32 %v6364_v39, %v6363_v5  ;;  %v1938_v37 = vrot.slane %v1429_v14, %v7693_v41  ;;  %v1432_v3 = vadd.f32 %v6402_v22, %v1367_v6 }
 0x12d   : > { %9078 = vst [vmem:[#allocation6_spill] sm:$0xff] %v7867_v2  ;;  %9079 = vst [vmem:[#allocation7_spill] sm:$0xff] %v7870_v0  ;;  %v6366_v31 = vpop.f32.mrf.mxu0  ;;  %v7876_v5 = vrot.slane %v1826_v34, %v7693_v41  ;;  %v6404_v39 = vpop.f32.mrf.mxu1  ;;  %v1945_v20 = vrot.slane %v1931_v51, %v7693_v41 }
 0x12e   : > { %v7883_v27 = vadd.f32 %v6365_v15, %v7689_v9  ;;  %v1946_v42 = vcombine.high %v1938_v37, %v1938_v37  ;;  %v1954_v14 = vrot.slane %v1938_v37, %v7693_v41  ;;  %v1980_v22 = vcombine.high %v1432_v3, %v1432_v3 }
 0x12f   : > { %9080 = vst [vmem:[#allocation8_spill] sm:$0xff] %v7876_v5  ;;  %v6367_v19 = vpop.f32.mrf.mxu0  ;;  %v1987_v6 = vrot.slane %v1432_v3, %v7693_v41  ;;  %v7890_v11 = vadd.f32 %v6404_v39, %v6403_v32  ;;  %v7892_v54 = vpop.f32.mrf.mxu1  ;;  %v1947_v57 = vcombine.high %v1945_v20, %v1945_v20  ;;  %v1961_v51 = vrot.slane %v1945_v20, %v7693_v41 }
 0x130   : > { %v7894_v53 = vadd.f32 %v6367_v19, %v6366_v31  ;;  %v1968_v62 = vrot.slane %v1946_v42, %v7693_v41  ;;  %v1976_v37 = vcombine.high %v1954_v14, %v1954_v14  ;;  %v2326_v52 = vrot.slane %v1954_v14, %v7705_v23 }
 0x131   : > { %v7896_v15 = vpop.f32.mrf.mxu0  ;;  %v1994_v34 = vrot.slane %v1980_v22, %v7693_v41  ;;  %v1995_v3 = vcombine.high %v1987_v6, %v1987_v6  ;;  %v2003_v32 = vrot.slane %v1987_v6, %v7693_v41  ;;  %v7903_v39 = vpop.f32.mrf.mxu1  ;;  %v1975_v31 = vrot.slane %v1947_v57, %v7693_v41 }
 0x132   : > { %v1977_v43 = vcombine.high %v1961_v51, %v1961_v51  ;;  %v1978_v55 = vcombine.high %v1968_v62, %v1968_v62  ;;  %v2330_v20 = vrot.slane %v1968_v62, %v7705_v23  ;;  %v2334_v42 = vrot.slane %v1976_v37, %v7705_v23 }
 0x133   : > { %v7905_v19 = vpop.f32.mrf.mxu0  ;;  %v2342_v12 = vrot.slane %v1961_v51, %v7705_v23  ;;  %v2644_v14 = vsel %vm2643_vm6, %v7701_v4, %v2326_v52  ;;  %v1996_v22 = vcombine.high %v1994_v34, %v1994_v34  ;;  %v7913_v38 = vpop.f32.mrf.mxu1  ;;  %v1979_v6 = vcombine.high %v1975_v31, %v1975_v31 }
 0x134   : > { %v2338_v35 = vrot.slane %v1978_v55, %v7705_v23  ;;  %v2346_v57 = vrot.slane %v1975_v31, %v7705_v23  ;;  %v2350_v13 = vrot.slane %v1977_v43, %v7705_v23  ;;  %v2645_v62 = vsel %vm2643_vm6, %v7714_v18, %v2330_v20 }
 0x135   : > { %v2646_v52 = vsel %vm2643_vm6, %v1512_v58, %v2334_v42  ;;  %v2648_v51 = vsel %vm2643_vm6, %v7711_v33, %v2342_v12  ;;  %v2010_v37 = vrot.slane %v1994_v34, %v7693_v41  ;;  %v7928_v5 = vpop.f32.mrf.mxu1  ;;  %v7930_v55 = vpop.f32.mrf.mxu0  ;;  %v2354_v31 = vrot.slane %v1979_v6, %v7705_v23 }
 0x136   : > { %v9081_v43 = vcombine.high %v7714_v18, %v7714_v18  ;;  %v2649_v4 = vsel %vm2643_vm6, %v7718_v24, %v2346_v57  ;;  %v9082_v58 = vcombine.high %v7711_v33, %v7711_v33  ;;  %v2772_v34 = vcombine.low %v2644_v14, %v2645_v62 }
 0x137   : > { %v2789_v2 = vcombine.low %v2648_v51, %v2649_v4  ;;  %v2017_v6 = vrot.slane %v1995_v3, %v7693_v41  ;;  %v7946_v0 = vpop.f32.mrf.mxu1  ;;  %v9083_v18 = vcombine.high %v7718_v24, %v7718_v24  ;;  %v2024_v57 = vrot.slane %v1996_v22, %v7693_v41 }
 0x138   : > { %v2647_v20 = vsel %vm2643_vm6, %v9081_v43, %v2338_v35  ;;  %v2650_v12 = vsel %vm2643_vm6, %v9082_v58, %v2350_v13  ;;  %v2025_v43 = vcombine.high %v2003_v32, %v2003_v32  ;;  %v2026_v33 = vcombine.high %v2010_v37, %v2010_v37 }
 0x139   : > { %v2773_v42 = vcombine.low %v2646_v52, %v2647_v20  ;;  %v2651_v35 = vsel %vm2643_vm6, %v9083_v18, %v2354_v31  ;;  %v2780_v13 = vrot.slane %v2772_v34, %v7708_v16  ;;  %v2797_v62 = vrot.slane %v2789_v2, %v7708_v16  ;;  %v6373_v52 = vpop.f32.mrf.mxu0  ;;  %v7961_v34 = vpop.f32.mrf.mxu1 }
 0x13a   : > { %v2790_v14 = vcombine.low %v2650_v12, %v2651_v35  ;;  %v2027_v3 = vcombine.high %v2017_v6, %v2017_v6  ;;  %v2028_v51 = vcombine.high %v2024_v57, %v2024_v57  ;;  %v2358_v20 = vrot.slane %v2003_v32, %v7705_v23 }
 0x13b   : > { %v2787_v58 = vrot.slane %v2773_v42, %v7708_v16  ;;  %v2362_v24 = vrot.slane %v2017_v6, %v7705_v23  ;;  %v2366_v22 = vrot.slane %v2025_v43, %v7705_v23  ;;  %v2374_v18 = vrot.slane %v2010_v37, %v7705_v23 }
 0x13c   : > { %v2804_v31 = vrot.slane %v2790_v14, %v7708_v16  ;;  %v2370_v12 = vrot.slane %v2027_v3, %v7705_v23  ;;  %v2378_v2 = vrot.slane %v2024_v57, %v7705_v23  ;;  %v2382_v42 = vrot.slane %v2026_v33, %v7705_v23  ;;  %v7978_v33 = vpop.f32.mrf.mxu0 }
 0x13d   : > { %v2788_v4 = vcombine.low %v2780_v13, %v2787_v58  ;;  %v2386_v35 = vrot.slane %v2028_v51, %v7705_v23  ;;  %v2652_v6 = vsel %vm2643_vm6, %v7721_v49, %v2358_v20  ;;  %v2653_v37 = vsel %vm2643_vm6, %v7738_v40, %v2362_v24 }
 0x13e   : > { %v2805_v32 = vcombine.low %v2797_v62, %v2804_v31  ;;  %v9084_v43 = vcombine.high %v7721_v49, %v7721_v49  ;;  %v9085_v13 = vcombine.high %v7738_v40, %v7738_v40  ;;  %v2656_v14 = vsel %vm2643_vm6, %v7726_v28, %v2374_v18  ;;  %v7997_v31 = vpop.f32.mrf.mxu1 }
 0x13f   : > { %3060 = vst [vmem:[%s7967_s30] sm:$0xff] %v2788_v4  ;;  %v2657_v62 = vsel %vm2643_vm6, %v7743_v63, %v2378_v2  ;;  %v9086_v3 = vcombine.high %v7726_v28, %v7726_v28  ;;  %v9087_v51 = vcombine.high %v7743_v63, %v7743_v63  ;;  %v2806_v40 = vcombine.low %v2652_v6, %v2653_v37 }
 0x140   : > { %v2654_v57 = vsel %vm2643_vm6, %v9084_v43, %v2366_v22  ;;  %v2655_v58 = vsel %vm2643_vm6, %v9085_v13, %v2370_v12  ;;  %3061 = vst [vmem:[%s7967_s30 + $0x8] sm:$0xff] %v2805_v32  ;;  %v2823_v4 = vcombine.low %v2656_v14, %v2657_v62  ;;  %v1437_v18 = vadd.f32 %v7890_v11, %v7883_v27  ;;  %v8010_v32 = vpop.f32.mrf.mxu0 }
 0x141   : > { %v2658_v49 = vsel %vm2643_vm6, %v9086_v3, %v2382_v42  ;;  %v2659_v20 = vsel %vm2643_vm6, %v9087_v51, %v2386_v35  ;;  %v2807_v24 = vcombine.low %v2654_v57, %v2655_v58  ;;  %v1375_v28 = vadd.f32 %v7894_v53, %v7689_v9  ;;  %v8018_v57 = vpop.f32.mrf.mxu1 }
 0x142   : > { %v2824_v22 = vcombine.low %v2658_v49, %v2659_v20  ;;  %v6408_v12 = vadd.f32 %v7903_v39, %v7892_v54  ;;  %v2814_v2 = vrot.slane %v2806_v40, %v7708_v16  ;;  %v2831_v42 = vrot.slane %v2823_v4, %v7708_v16 }
 0x143   : > { %v2821_v63 = vrot.slane %v2807_v24, %v7708_v16  ;;  %v6371_v35 = vadd.f32 %v7905_v19, %v7896_v15  ;;  %v2029_v27 = vcombine.high %v1437_v18, %v1437_v18  ;;  %v2036_v53 = vrot.slane %v1437_v18, %v7693_v41 }
 0x144   : > { %v2838_v11 = vrot.slane %v2824_v22, %v7708_v16  ;;  %v1440_v6 = vadd.f32 %v6408_v12, %v1375_v28  ;;  %v6411_v37 = vadd.f32 %v7928_v5, %v7913_v38  ;;  %v6374_v43 = vadd.f32 %v6373_v52, %v7930_v55  ;;  %v8029_v38 = vpop.f32.mrf.mxu0  ;;  %v8037_v22 = vpop.f32.mrf.mxu1 }
 0x145   : > { %v2822_v54 = vcombine.low %v2814_v2, %v2821_v63  ;;  %v1380_v39 = vadd.f32 %v6371_v35, %v7689_v9  ;;  %v2043_v19 = vrot.slane %v2029_v27, %v7693_v41  ;;  %v2044_v13 = vcombine.high %v2036_v53, %v2036_v53 }
 0x146   : > { %v2839_v15 = vcombine.low %v2831_v42, %v2838_v11  ;;  %v2052_v58 = vrot.slane %v2036_v53, %v7693_v41  ;;  %v2078_v14 = vcombine.high %v1440_v6, %v1440_v6  ;;  %v2085_v62 = vrot.slane %v1440_v6, %v7693_v41  ;;  %v8045_v27 = vpop.f32.mrf.mxu0 }
 0x147   : > { %3062 = vst [vmem:[%s7967_s30 + $0x20] sm:$0xff] %v2822_v54  ;;  %v8024_v3 = vadd.f32 %v6411_v37, %v1380_v39  ;;  %v8027_v49 = vadd.f32 %v6374_v43, %v7689_v9  ;;  %v2045_v5 = vcombine.high %v2043_v19, %v2043_v19  ;;  %v2059_v55 = vrot.slane %v2043_v19, %v7693_v41 }
 0x148   : > { %3063 = vst [vmem:[%s7967_s30 + $0x28] sm:$0xff] %v2839_v15  ;;  %v2066_v52 = vrot.slane %v2044_v13, %v7693_v41  ;;  %v2074_v51 = vcombine.high %v2052_v58, %v2052_v58  ;;  %v2390_v20 = vrot.slane %v2052_v58, %v7705_v23  ;;  %v2092_v40 = vrot.slane %v2078_v14, %v7693_v41  ;;  %v8059_v58 = vpop.f32.mrf.mxu1 }
 0x149   : > { %v2093_v24 = vcombine.high %v2085_v62, %v2085_v62  ;;  %v2101_v4 = vrot.slane %v2085_v62, %v7693_v41  ;;  %v2073_v18 = vrot.slane %v2045_v5, %v7693_v41  ;;  %v2075_v28 = vcombine.high %v2059_v55, %v2059_v55 }
 0x14a   : > { %v2076_v12 = vcombine.high %v2066_v52, %v2066_v52  ;;  %v2394_v2 = vrot.slane %v2066_v52, %v7705_v23  ;;  %v2398_v63 = vrot.slane %v2074_v51, %v7705_v23  ;;  %v2406_v42 = vrot.slane %v2059_v55, %v7705_v23 }
 0x14b   : > { %v2660_v35 = vsel %vm2643_vm6, %v7748_v44, %v2390_v20  ;;  %v2094_v11 = vcombine.high %v2092_v40, %v2092_v40  ;;  %v2077_v53 = vcombine.high %v2073_v18, %v2073_v18  ;;  %v2410_v54 = vrot.slane %v2073_v18, %v7705_v23 }
 0x14c   : > { %v2402_v6 = vrot.slane %v2076_v12, %v7705_v23  ;;  %v2414_v39 = vrot.slane %v2075_v28, %v7705_v23  ;;  %v2661_v37 = vsel %vm2643_vm6, %v7755_v48, %v2394_v2  ;;  %v9088_v43 = vcombine.high %v7748_v44, %v7748_v44  ;;  %v8073_v28 = vpop.f32.mrf.mxu0 }
 0x14d   : > { %v2664_v19 = vsel %vm2643_vm6, %v7752_v47, %v2406_v42  ;;  %v2108_v13 = vrot.slane %v2092_v40, %v7693_v41  ;;  %v2418_v14 = vrot.slane %v2077_v53, %v7705_v23  ;;  %v9089_v62 = vcombine.high %v7755_v48, %v7755_v48 }
 0x14e   : > { %v2662_v15 = vsel %vm2643_vm6, %v9088_v43, %v2398_v63  ;;  %v2665_v55 = vsel %vm2643_vm6, %v7758_v50, %v2410_v54  ;;  %v9090_v44 = vcombine.high %v7752_v47, %v7752_v47  ;;  %v2840_v51 = vcombine.low %v2660_v35, %v2661_v37 }
 0x14f   : > { %v2663_v5 = vsel %vm2643_vm6, %v9089_v62, %v2402_v6  ;;  %v2857_v40 = vcombine.low %v2664_v19, %v2665_v55  ;;  %v2115_v18 = vrot.slane %v2093_v24, %v7693_v41  ;;  %v9091_v48 = vcombine.high %v7758_v50, %v7758_v50  ;;  %v8083_v24 = vpop.f32.mrf.mxu1 }
 0x150   : > { %v2666_v52 = vsel %vm2643_vm6, %v9090_v44, %v2414_v39  ;;  %v2841_v20 = vcombine.low %v2662_v15, %v2663_v5  ;;  %v2122_v2 = vrot.slane %v2094_v11, %v7693_v41  ;;  %v2123_v63 = vcombine.high %v2101_v4, %v2101_v4 }
 0x151   : > { %v2667_v12 = vsel %vm2643_vm6, %v9091_v48, %v2418_v14  ;;  %v2124_v42 = vcombine.high %v2108_v13, %v2108_v13  ;;  %v2848_v47 = vrot.slane %v2840_v51, %v7708_v16  ;;  %v2865_v6 = vrot.slane %v2857_v40, %v7708_v16  ;;  %v8090_v14 = vpop.f32.mrf.mxu0  ;;  %v8105_v40 = vpop.f32.mrf.mxu1 }
 0x152   : > { %v2855_v53 = vrot.slane %v2841_v20, %v7708_v16  ;;  %v2858_v35 = vcombine.low %v2666_v52, %v2667_v12  ;;  %v2125_v54 = vcombine.high %v2115_v18, %v2115_v18  ;;  %v2126_v39 = vcombine.high %v2122_v2, %v2122_v2 }
 0x153   : > { %v2422_v50 = vrot.slane %v2101_v4, %v7705_v23  ;;  %v2426_v37 = vrot.slane %v2115_v18, %v7705_v23  ;;  %v2430_v15 = vrot.slane %v2123_v63, %v7705_v23  ;;  %v2438_v19 = vrot.slane %v2108_v13, %v7705_v23 }
 0x154   : > { %v2856_v43 = vcombine.low %v2848_v47, %v2855_v53  ;;  %v2872_v11 = vrot.slane %v2858_v35, %v7708_v16  ;;  %v2434_v62 = vrot.slane %v2125_v54, %v7705_v23  ;;  %v2442_v5 = vrot.slane %v2122_v2, %v7705_v23 }
 0x155   : > { %v2446_v55 = vrot.slane %v2124_v42, %v7705_v23  ;;  %v2450_v4 = vrot.slane %v2126_v39, %v7705_v23  ;;  %v2668_v52 = vsel %vm2643_vm6, %v7765_v56, %v2422_v50  ;;  %v2669_v51 = vsel %vm2643_vm6, %v7778_v7, %v2426_v37 }
 0x156   : > { %v2873_v44 = vcombine.low %v2865_v6, %v2872_v11  ;;  %3064 = vst [vmem:[%s7967_s30 + $0x40] sm:$0xff] %v2856_v43  ;;  %v9092_v13 = vcombine.high %v7765_v56, %v7765_v56  ;;  %v9093_v18 = vcombine.high %v7778_v7, %v7778_v7  ;;  %v2672_v12 = vsel %vm2643_vm6, %v7768_v59, %v2438_v19  ;;  %v8124_v6 = vpop.f32.mrf.mxu0 }
 0x157   : > { %v2673_v2 = vsel %vm2643_vm6, %v7781_v8, %v2442_v5  ;;  %v9094_v63 = vcombine.high %v7768_v59, %v7768_v59  ;;  %v9095_v42 = vcombine.high %v7781_v8, %v7781_v8  ;;  %v2874_v7 = vcombine.low %v2668_v52, %v2669_v51 }
 0x158   : > { %v2670_v20 = vsel %vm2643_vm6, %v9092_v13, %v2430_v15  ;;  %v2671_v48 = vsel %vm2643_vm6, %v9093_v18, %v2434_v62  ;;  %3065 = vst [vmem:[%s7967_s30 + $0x48] sm:$0xff] %v2873_v44  ;;  %v2891_v35 = vcombine.low %v2672_v12, %v2673_v2  ;;  %v2127_v39 = vcombine.high %v8024_v3, %v8024_v3  ;;  %v8137_v15 = vpop.f32.mrf.mxu1 }
 0x159   : > { %v2674_v56 = vsel %vm2643_vm6, %v9094_v63, %v2446_v55  ;;  %v2675_v47 = vsel %vm2643_vm6, %v9095_v42, %v2450_v4  ;;  %v2875_v53 = vcombine.low %v2670_v20, %v2671_v48  ;;  %v2134_v59 = vrot.slane %v8024_v3, %v7693_v41 }
 0x15a   : > { %v2892_v54 = vcombine.low %v2674_v56, %v2675_v47  ;;  %v6414_v50 = vadd.f32 %v7961_v34, %v7946_v0  ;;  %v2882_v37 = vrot.slane %v2874_v7, %v7708_v16  ;;  %v2899_v43 = vrot.slane %v2891_v35, %v7708_v16  ;;  %v8157_v48 = vpop.f32.mrf.mxu1 }
 0x15b   : > { %v2889_v8 = vrot.slane %v2875_v53, %v7708_v16  ;;  %v6377_v11 = vadd.f32 %v8010_v32, %v7978_v33  ;;  %v2141_v62 = vrot.slane %v2127_v39, %v7693_v41  ;;  %v2142_v3 = vcombine.high %v2134_v59, %v2134_v59  ;;  %v8150_v33 = vpop.f32.mrf.mxu0 }
 0x15c   : > { %v2906_v19 = vrot.slane %v2892_v54, %v7708_v16  ;;  %v2150_v5 = vrot.slane %v2134_v59, %v7693_v41  ;;  %v1448_v34 = vadd.f32 %v6414_v50, %v8027_v49  ;;  %v8148_v4 = vadd.f32 %v8018_v57, %v7997_v31 }
 0x15d   : > { %v2890_v0 = vcombine.low %v2882_v37, %v2889_v8  ;;  %v8144_v55 = vadd.f32 %v6377_v11, %v7689_v9  ;;  %v2143_v44 = vcombine.high %v2141_v62, %v2141_v62  ;;  %v2157_v52 = vrot.slane %v2141_v62, %v7693_v41  ;;  %v8167_v7 = vpop.f32.mrf.mxu0  ;;  %v8180_v11 = vpop.f32.mrf.mxu1 }
 0x15e   : > { %v2907_v32 = vcombine.low %v2899_v43, %v2906_v19  ;;  %v2164_v51 = vrot.slane %v2142_v3, %v7693_v41  ;;  %v2172_v13 = vcombine.high %v2150_v5, %v2150_v5  ;;  %v2454_v20 = vrot.slane %v2150_v5, %v7705_v23 }
 0x15f   : > { %3066 = vst [vmem:[%s7967_s30 + $0x60] sm:$0xff] %v2890_v0  ;;  %v2176_v49 = vcombine.high %v1448_v34, %v1448_v34  ;;  %v2183_v18 = vrot.slane %v1448_v34, %v7693_v41  ;;  %v2171_v31 = vrot.slane %v2143_v44, %v7693_v41  ;;  %v2173_v57 = vcombine.high %v2157_v52, %v2157_v52 }
 0x160   : > { %3067 = vst [vmem:[%s7967_s30 + $0x68] sm:$0xff] %v2907_v32  ;;  %v2174_v12 = vcombine.high %v2164_v51, %v2164_v51  ;;  %v2458_v2 = vrot.slane %v2164_v51, %v7705_v23  ;;  %v2462_v63 = vrot.slane %v2172_v13, %v7705_v23  ;;  %v2470_v56 = vrot.slane %v2157_v52, %v7705_v23  ;;  %v8193_v51 = vpop.f32.mrf.mxu0 }
 0x161   : > { %v2676_v42 = vsel %vm2643_vm6, %v7793_v26, %v2454_v20  ;;  %v2190_v47 = vrot.slane %v2176_v49, %v7693_v41  ;;  %v2175_v53 = vcombine.high %v2171_v31, %v2171_v31  ;;  %v2474_v54 = vrot.slane %v2171_v31, %v7705_v23 }
 0x162   : > { %v2466_v35 = vrot.slane %v2174_v12, %v7705_v23  ;;  %v2478_v39 = vrot.slane %v2173_v57, %v7705_v23  ;;  %v2677_v59 = vsel %vm2643_vm6, %v7799_v30, %v2458_v2  ;;  %v9096_v50 = vcombine.high %v7793_v26, %v7793_v26 }
 0x163   : > { %v2680_v8 = vsel %vm2643_vm6, %v7796_v29, %v2470_v56  ;;  %v2191_v43 = vcombine.high %v2183_v18, %v2183_v18  ;;  %v2482_v19 = vrot.slane %v2175_v53, %v7705_v23  ;;  %v9097_v62 = vcombine.high %v7799_v30, %v7799_v30 }
 0x164   : > { %v2678_v37 = vsel %vm2643_vm6, %v9096_v50, %v2462_v63  ;;  %v2681_v5 = vsel %vm2643_vm6, %v7807_v21, %v2474_v54  ;;  %v9098_v26 = vcombine.high %v7796_v29, %v7796_v29  ;;  %v2908_v34 = vcombine.low %v2676_v42, %v2677_v59  ;;  %v8205_v63 = vpop.f32.mrf.mxu1 }
 0x165   : > { %v2679_v3 = vsel %vm2643_vm6, %v9097_v62, %v2466_v35  ;;  %v2925_v44 = vcombine.low %v2680_v8, %v2681_v5  ;;  %v2192_v52 = vcombine.high %v2190_v47, %v2190_v47  ;;  %v9099_v13 = vcombine.high %v7807_v21, %v7807_v21 }
 0x166   : > { %v2682_v0 = vsel %vm2643_vm6, %v9098_v26, %v2478_v39  ;;  %v2909_v32 = vcombine.low %v2678_v37, %v2679_v3  ;;  %v2199_v20 = vrot.slane %v2183_v18, %v7693_v41  ;;  %v2206_v49 = vrot.slane %v2190_v47, %v7693_v41  ;;  %v8211_v39 = vpop.f32.mrf.mxu0  ;;  %v8221_v5 = vpop.f32.mrf.mxu1 }
 0x167   : > { %v2683_v30 = vsel %vm2643_vm6, %v9099_v13, %v2482_v19  ;;  %v2213_v31 = vrot.slane %v2191_v43, %v7693_v41  ;;  %v2916_v29 = vrot.slane %v2908_v34, %v7708_v16  ;;  %v2933_v2 = vrot.slane %v2925_v44, %v7708_v16 }
 0x168   : > { %v2923_v57 = vrot.slane %v2909_v32, %v7708_v16  ;;  %v2926_v12 = vcombine.low %v2682_v0, %v2683_v30  ;;  %v2220_v21 = vrot.slane %v2192_v52, %v7693_v41  ;;  %v2221_v56 = vcombine.high %v2199_v20, %v2199_v20 }
 0x169   : > { %v2222_v42 = vcombine.high %v2206_v49, %v2206_v49  ;;  %v2223_v53 = vcombine.high %v2213_v31, %v2213_v31  ;;  %v2486_v35 = vrot.slane %v2199_v20, %v7705_v23  ;;  %v2490_v54 = vrot.slane %v2213_v31, %v7705_v23  ;;  %v8243_v31 = vpop.f32.mrf.mxu0 }
 0x16a   : > { %v2924_v18 = vcombine.low %v2916_v29, %v2923_v57  ;;  %v2940_v47 = vrot.slane %v2926_v12, %v7708_v16  ;;  %v2224_v59 = vcombine.high %v2220_v21, %v2220_v21  ;;  %v2494_v50 = vrot.slane %v2221_v56, %v7705_v23 }
 0x16b   : > { %v2498_v37 = vrot.slane %v2223_v53, %v7705_v23  ;;  %v2502_v8 = vrot.slane %v2206_v49, %v7705_v23  ;;  %v2506_v19 = vrot.slane %v2220_v21, %v7705_v23  ;;  %v2510_v62 = vrot.slane %v2222_v42, %v7705_v23  ;;  %v8256_v53 = vpop.f32.mrf.mxu1 }
 0x16c   : > { %v2941_v43 = vcombine.low %v2933_v2, %v2940_v47  ;;  %3068 = vst [vmem:[%s7967_s30 + $0x80] sm:$0xff] %v2924_v18  ;;  %v2684_v3 = vsel %vm2643_vm6, %v7810_v45, %v2486_v35  ;;  %v2514_v26 = vrot.slane %v2224_v59, %v7705_v23  ;;  %v2685_v0 = vsel %vm2643_vm6, %v7816_v17, %v2490_v54 }
 0x16d   : > { %v9100_v34 = vcombine.high %v7810_v45, %v7810_v45  ;;  %v9101_v44 = vcombine.high %v7816_v17, %v7816_v17  ;;  %v2688_v13 = vsel %vm2643_vm6, %v7813_v1, %v2502_v8  ;;  %v2689_v30 = vsel %vm2643_vm6, %v7826_v61, %v2506_v19 }
 0x16e   : > { %3069 = vst [vmem:[%s7967_s30 + $0x88] sm:$0xff] %v2941_v43  ;;  %v9102_v20 = vcombine.high %v7813_v1, %v7813_v1  ;;  %v2942_v45 = vcombine.low %v2684_v3, %v2685_v0  ;;  %v9103_v17 = vcombine.high %v7826_v61, %v7826_v61  ;;  %v2959_v12 = vcombine.low %v2688_v13, %v2689_v30 }
 0x16f   : > { %v2686_v32 = vsel %vm2643_vm6, %v9100_v34, %v2494_v50  ;;  %v2687_v52 = vsel %vm2643_vm6, %v9101_v44, %v2498_v37  ;;  %v1453_v2 = vadd.f32 %v8148_v4, %v8144_v55  ;;  %v6380_v1 = vadd.f32 %v8045_v27, %v8029_v38  ;;  %v8267_v27 = vpop.f32.mrf.mxu0 }
 0x170   : > { %v2690_v49 = vsel %vm2643_vm6, %v9102_v20, %v2510_v62  ;;  %v2691_v29 = vsel %vm2643_vm6, %v9103_v17, %v2514_v26  ;;  %v2943_v57 = vcombine.low %v2686_v32, %v2687_v52  ;;  %v2950_v21 = vrot.slane %v2942_v45, %v7708_v16 }
 0x171   : > { %v2960_v56 = vcombine.low %v2690_v49, %v2691_v29  ;;  %v6420_v42 = vadd.f32 %v8059_v58, %v8037_v22  ;;  %v2967_v18 = vrot.slane %v2959_v12, %v7708_v16  ;;  %v2225_v47 = vcombine.high %v1453_v2, %v1453_v2  ;;  %v8286_v34 = vpop.f32.mrf.mxu0 }
 0x172   : > { %v2957_v61 = vrot.slane %v2943_v57, %v7708_v16  ;;  %v2232_v35 = vrot.slane %v1453_v2, %v7693_v41  ;;  %v1391_v4 = vadd.f32 %v6380_v1, %v7689_v9  ;;  %v6439_v38 = vadd.f32 %v8090_v14, %v8073_v28  ;;  %v8276_v28 = vpop.f32.mrf.mxu1 }
 0x173   : > { %v2974_v55 = vrot.slane %v2960_v56, %v7708_v16  ;;  %v6479_v22 = vadd.f32 %v8105_v40, %v8083_v24  ;;  %v2239_v54 = vrot.slane %v2225_v47, %v7693_v41  ;;  %v8274_v19 = vadd.f32 %v8150_v33, %v8124_v6 }
 0x174   : > { %v2958_v58 = vcombine.low %v2950_v21, %v2957_v61  ;;  %v2240_v59 = vcombine.high %v2232_v35, %v2232_v35  ;;  %v2248_v50 = vrot.slane %v2232_v35, %v7693_v41  ;;  %v1456_v8 = vadd.f32 %v6420_v42, %v1391_v4  ;;  %v8295_v49 = vpop.f32.mrf.mxu1  ;;  %v8308_v42 = vpop.f32.mrf.mxu0 }
 0x175   : > { %v2975_v37 = vcombine.low %v2967_v18, %v2974_v55  ;;  %v3511_v43 = vadd.f32 %v6439_v38, %v7689_v9  ;;  %v2241_v24 = vcombine.high %v2239_v54, %v2239_v54  ;;  %v2255_v14 = vrot.slane %v2239_v54, %v7693_v41 }
 0x176   : > { %3070 = vst [vmem:[%s7967_s30 + $0xa0] sm:$0xff] %v2958_v58  ;;  %v2262_v40 = vrot.slane %v2240_v59, %v7693_v41  ;;  %v2270_v62 = vcombine.high %v2248_v50, %v2248_v50  ;;  %v2518_v3 = vrot.slane %v2248_v50, %v7705_v23  ;;  %v2274_v26 = vcombine.high %v1456_v8, %v1456_v8  ;;  %v8321_v54 = vpop.f32.mrf.mxu1 }
 0x177   : > { %3071 = vst [vmem:[%s7967_s30 + $0xa8] sm:$0xff] %v2975_v37  ;;  %v2281_v0 = vrot.slane %v1456_v8, %v7693_v41  ;;  %v8284_v9 = vadd.f32 %v6479_v22, %v3511_v43  ;;  %v2269_v6 = vrot.slane %v2241_v24, %v7693_v41  ;;  %v2271_v33 = vcombine.high %v2255_v14, %v2255_v14 }
 0x178   : > { %v2272_v32 = vcombine.high %v2262_v40, %v2262_v40  ;;  %v2522_v44 = vrot.slane %v2262_v40, %v7705_v23  ;;  %v2526_v52 = vrot.slane %v2270_v62, %v7705_v23  ;;  %v2534_v13 = vrot.slane %v2255_v14, %v7705_v23  ;;  %v8333_v40 = vpop.f32.mrf.mxu0 }
 0x179   : > { %v2692_v30 = vsel %vm2643_vm6, %v7830_v25, %v2518_v3  ;;  %v2288_v20 = vrot.slane %v2274_v26, %v7693_v41  ;;  %v2273_v45 = vcombine.high %v2269_v6, %v2269_v6  ;;  %v2538_v29 = vrot.slane %v2269_v6, %v7705_v23 }
 0x17a   : > { %v2530_v17 = vrot.slane %v2272_v32, %v7705_v23  ;;  %v2542_v57 = vrot.slane %v2271_v33, %v7705_v23  ;;  %v2693_v12 = vsel %vm2643_vm6, %v7845_v46, %v2522_v44  ;;  %v9104_v2 = vcombine.high %v7830_v25, %v7830_v25  ;;  %v8339_v44 = vpop.f32.mrf.mxu1 }
 0x17b   : > { %v2696_v56 = vsel %vm2643_vm6, %v7842_v60, %v2534_v13  ;;  %v2289_v1 = vcombine.high %v2281_v0, %v2281_v0  ;;  %v2546_v61 = vrot.slane %v2273_v45, %v7705_v23  ;;  %v9105_v18 = vcombine.high %v7845_v46, %v7845_v46 }
 0x17c   : > { %v2694_v21 = vsel %vm2643_vm6, %v9104_v2, %v2526_v52  ;;  %v2697_v35 = vsel %vm2643_vm6, %v7851_v36, %v2538_v29  ;;  %v9106_v25 = vcombine.high %v7842_v60, %v7842_v60  ;;  %v2976_v4 = vcombine.low %v2692_v30, %v2693_v12  ;;  %v8349_v12 = vpop.f32.mrf.mxu0 }
 0x17d   : > { %v2695_v47 = vsel %vm2643_vm6, %v9105_v18, %v2530_v17  ;;  %v2993_v22 = vcombine.low %v2696_v56, %v2697_v35  ;;  %v2290_v58 = vcombine.high %v2288_v20, %v2288_v20  ;;  %v9107_v59 = vcombine.high %v7851_v36, %v7851_v36  ;;  %v9111_v35 = vld [vmem:[#allocation6_spill] sm:$0xff] }
 0x17e   : > { %v2698_v55 = vsel %vm2643_vm6, %v9106_v25, %v2542_v57  ;;  %v2977_v38 = vcombine.low %v2694_v21, %v2695_v47  ;;  %v2297_v50 = vrot.slane %v2281_v0, %v7693_v41  ;;  %v2304_v37 = vrot.slane %v2288_v20, %v7693_v41  ;;  %v9108_v21 = vld [vmem:[#allocation7_spill] sm:$0xff] }
 0x17f   : > { %v2699_v46 = vsel %vm2643_vm6, %v9107_v59, %v2546_v61  ;;  %v2311_v8 = vrot.slane %v2289_v1, %v7693_v41  ;;  %v2984_v60 = vrot.slane %v2976_v4, %v7708_v16  ;;  %v3001_v14 = vrot.slane %v2993_v22, %v7708_v16 }
 0x180   : > { %v2991_v43 = vrot.slane %v2977_v38, %v7708_v16  ;;  %v2994_v24 = vcombine.low %v2698_v55, %v2699_v46  ;;  %v2318_v36 = vrot.slane %v2290_v58, %v7693_v41  ;;  %v2319_v62 = vcombine.high %v2297_v50, %v2297_v50  ;;  %v9112_v55 = vld [vmem:[#allocation8_spill] sm:$0xff]  ;;  %v8371_v58 = vpop.f32.mrf.mxu1 }
 0x181   : > { %v2320_v3 = vcombine.high %v2304_v37, %v2304_v37  ;;  %v2321_v26 = vcombine.high %v2311_v8, %v2311_v8  ;;  %v2550_v33 = vrot.slane %v2297_v50, %v7705_v23  ;;  %v2554_v32 = vrot.slane %v2311_v8, %v7705_v23 }
 0x182   : > { %v2992_v0 = vcombine.low %v2984_v60, %v2991_v43  ;;  %v3008_v6 = vrot.slane %v2994_v24, %v7708_v16  ;;  %v2322_v52 = vcombine.high %v2318_v36, %v2318_v36  ;;  %v2558_v13 = vrot.slane %v2319_v62, %v7705_v23  ;;  %v8389_v62 = vpop.f32.mrf.mxu0 }
 0x183   : > { %v2562_v30 = vrot.slane %v2321_v26, %v7705_v23  ;;  %v2566_v20 = vrot.slane %v2304_v37, %v7705_v23  ;;  %v2570_v17 = vrot.slane %v2318_v36, %v7705_v23  ;;  %v2574_v29 = vrot.slane %v2320_v3, %v7705_v23 }
 0x184   : > { %v3009_v45 = vcombine.low %v3001_v14, %v3008_v6  ;;  %3072 = vst [vmem:[%s7967_s30 + $0xc0] sm:$0xff] %v2992_v0  ;;  %v2700_v57 = vsel %vm2643_vm6, %v7859_v10, %v2550_v33  ;;  %v2578_v2 = vrot.slane %v2322_v52, %v7705_v23  ;;  %v2701_v56 = vsel %vm2643_vm6, %v9108_v21, %v2554_v32  ;;  %v8385_v14 = vld [vmem:[%s9064_s2] ss:$0 sm:$0xff]  ;;  %v8402_v52 = vpop.f32.mrf.mxu1 }
 0x185   : > { %v9109_v1 = vcombine.high %v7859_v10, %v7859_v10  ;;  %v9110_v18 = vcombine.high %v9108_v21, %v9108_v21  ;;  %v2704_v25 = vsel %vm2643_vm6, %v9111_v35, %v2566_v20  ;;  %v2705_v4 = vsel %vm2643_vm6, %v9112_v55, %v2570_v17 }
 0x186   : > { %3073 = vst [vmem:[%s7967_s30 + $0xc8] sm:$0xff] %v3009_v45  ;;  %v9113_v38 = vcombine.high %v9111_v35, %v9111_v35  ;;  %v3010_v10 = vcombine.low %v2700_v57, %v2701_v56  ;;  %v9114_v59 = vcombine.high %v9112_v55, %v9112_v55  ;;  %v3027_v37 = vcombine.low %v2704_v25, %v2705_v4 }
 0x187   : > { %v2702_v61 = vsel %vm2643_vm6, %v9109_v1, %v2558_v13  ;;  %v2703_v47 = vsel %vm2643_vm6, %v9110_v18, %v2562_v30  ;;  %v4136_v8 = vcombine.high %v8284_v9, %v8284_v9  ;;  %v4143_v24 = vrot.slane %v8284_v9, %v7693_v41  ;;  %v8425_v1 = vpop.f32.mrf.mxu1 }
 0x188   : > { %v2706_v22 = vsel %vm2643_vm6, %v9113_v38, %v2574_v29  ;;  %v2707_v46 = vsel %vm2643_vm6, %v9114_v59, %v2578_v2  ;;  %v3011_v50 = vcombine.low %v2702_v61, %v2703_v47  ;;  %v3018_v60 = vrot.slane %v3010_v10, %v7708_v16  ;;  %v8405_v29 = vpop.f32.mrf.mxu0 }
 0x189   : > { %v3028_v43 = vcombine.low %v2706_v22, %v2707_v46  ;;  %v3514_v36 = vadd.f32 %v8385_v14, %v8274_v19  ;;  %v3035_v26 = vrot.slane %v3027_v37, %v7708_v16  ;;  %v4150_v0 = vrot.slane %v4136_v8, %v7693_v41 }
 0x18a   : > { %v3025_v3 = vrot.slane %v3011_v50, %v7708_v16  ;;  %v6482_v9 = vadd.f32 %v8157_v48, %v8137_v15  ;;  %v4151_v33 = vcombine.high %v4143_v24, %v4143_v24  ;;  %v8398_v32 = vrot.slane %v4143_v24, %v7693_v41 }
 0x18b   : > { %v3042_v6 = vrot.slane %v3028_v43, %v7708_v16  ;;  %v6445_v19 = vadd.f32 %v8193_v51, %v8167_v7  ;;  %v4152_v30 = vcombine.high %v4150_v0, %v4150_v0  ;;  %v8409_v15 = vrot.slane %v4150_v0, %v7693_v41 }
 0x18c   : > { %v3026_v13 = vcombine.low %v3018_v60, %v3025_v3  ;;  %v3579_v20 = vadd.f32 %v6482_v9, %v3514_v36  ;;  %v8412_v48 = vrot.slane %v4151_v33, %v7693_v41  ;;  %v4181_v2 = vcombine.high %v8398_v32, %v8398_v32 }
 0x18d   : > { %v3043_v45 = vcombine.low %v3035_v26, %v3042_v6  ;;  %v3519_v17 = vadd.f32 %v8385_v14, %v6445_v19  ;;  %v8417_v51 = vrot.slane %v4152_v30, %v7693_v41  ;;  %v6485_v21 = vadd.f32 %v8205_v63, %v8180_v11 }
 0x18e   : > { %3074 = vst [vmem:[%s7967_s30 + $0xe0] sm:$0xff] %v3026_v13  ;;  %v4185_v57 = vcombine.high %v3579_v20, %v3579_v20  ;;  %v4192_v7 = vrot.slane %v3579_v20, %v7693_v41  ;;  %v6448_v56 = vadd.f32 %v8243_v31, %v8211_v39  ;;  %v6488_v35 = vadd.f32 %v8256_v53, %v8221_v5  ;;  %v6459_v39 = vpop.f32.mrf.mxu0 }
 0x18f   : > { %3075 = vst [vmem:[%s7967_s30 + $0xe8] sm:$0xff] %v3043_v45  ;;  %v3584_v25 = vadd.f32 %v6485_v21, %v3519_v17  ;;  %v6451_v11 = vadd.f32 %v8286_v34, %v8267_v27  ;;  %v6491_v63 = vadd.f32 %v8295_v49, %v8276_v28  ;;  %v4182_v31 = vcombine.high %v8409_v15, %v8409_v15  ;;  %v6499_v34 = vpop.f32.mrf.mxu1 }
 0x190   : > { %v4199_v61 = vrot.slane %v4185_v57, %v7693_v41  ;;  %v4200_v18 = vcombine.high %v4192_v7, %v4192_v7  ;;  %v8429_v47 = vrot.slane %v4192_v7, %v7693_v41  ;;  %v3522_v55 = vadd.f32 %v8385_v14, %v6448_v56  ;;  %v6517_v43 = vpop.f32.mrf.mxu0 }
 0x191   : > { %v4234_v5 = vcombine.high %v3584_v25, %v3584_v25  ;;  %v4241_v53 = vrot.slane %v3584_v25, %v7693_v41  ;;  %v3527_v27 = vadd.f32 %v8385_v14, %v6451_v11  ;;  %v4183_v28 = vcombine.high %v8412_v48, %v8412_v48  ;;  %v6557_v6 = vpop.f32.mrf.mxu1 }
 0x192   : > { %v4201_v4 = vcombine.high %v4199_v61, %v4199_v61  ;;  %v8441_v38 = vrot.slane %v4199_v61, %v7693_v41  ;;  %v8444_v22 = vrot.slane %v4200_v18, %v7693_v41  ;;  %v3587_v10 = vadd.f32 %v6488_v35, %v3522_v55  ;;  %v6518_v7 = vpop.f32.mrf.mxu0 }
 0x193   : > { %v4184_v49 = vcombine.high %v8417_v51, %v8417_v51  ;;  %v4230_v59 = vcombine.high %v8429_v47, %v8429_v47  ;;  %v6454_v46 = vadd.f32 %v8333_v40, %v8308_v42  ;;  %v4248_v37 = vrot.slane %v4234_v5, %v7693_v41 }
 0x194   : > { %v8457_v50 = vrot.slane %v4201_v4, %v7693_v41  ;;  %v4249_v8 = vcombine.high %v4241_v53, %v4241_v53  ;;  %v4283_v60 = vcombine.high %v3587_v10, %v3587_v10  ;;  %v4231_v24 = vcombine.high %v8441_v38, %v8441_v38 }
 0x195   : > { %v8463_v36 = vrot.slane %v4241_v53, %v7693_v41  ;;  %v4290_v3 = vrot.slane %v3587_v10, %v7693_v41  ;;  %v3592_v26 = vadd.f32 %v6491_v63, %v3527_v27  ;;  %v4250_v40 = vcombine.high %v4248_v37, %v4248_v37  ;;  %v6558_v63 = vpop.f32.mrf.mxu1 }
 0x196   : > { %v8469_v0 = vrot.slane %v4248_v37, %v7693_v41  ;;  %v8472_v9 = vrot.slane %v4249_v8, %v7693_v41  ;;  %v4297_v33 = vrot.slane %v4283_v60, %v7693_v41  ;;  %v3530_v57 = vadd.f32 %v8385_v14, %v6454_v46  ;;  %v6520_v60 = vpop.f32.mrf.mxu0 }
 0x197   : > { %v4298_v19 = vcombine.high %v4290_v3, %v4290_v3  ;;  %v8476_v13 = vrot.slane %v4290_v3, %v7693_v41  ;;  %v4332_v30 = vcombine.high %v3592_v26, %v3592_v26  ;;  %v8481_v45 = vrot.slane %v4250_v40, %v7693_v41 }
 0x198   : > { %v4339_v17 = vrot.slane %v3592_v26, %v7693_v41  ;;  %v4299_v61 = vcombine.high %v4297_v33, %v4297_v33  ;;  %v8490_v18 = vrot.slane %v4297_v33, %v7693_v41  ;;  %v6494_v10 = vadd.f32 %v8339_v44, %v8321_v54 }
 0x199   : > { %v8493_v35 = vrot.slane %v4298_v19, %v7693_v41  ;;  %v4346_v25 = vrot.slane %v4332_v30, %v7693_v41  ;;  %v6457_v40 = vadd.f32 %v8389_v62, %v8349_v12  ;;  %v6497_v54 = vadd.f32 %v8402_v52, %v8371_v58 }
 0x19a   : > { %v4347_v55 = vcombine.high %v4339_v17, %v4339_v17  ;;  %v8497_v11 = vrot.slane %v4339_v17, %v7693_v41  ;;  %v8508_v27 = vrot.slane %v4299_v61, %v7693_v41  ;;  %v3595_v26 = vadd.f32 %v6494_v10, %v3530_v57  ;;  %v6560_v17 = vpop.f32.mrf.mxu1  ;;  %v6521_v10 = vpop.f32.mrf.mxu0 }
 0x19b   : > { %v4348_v37 = vcombine.high %v4346_v25, %v4346_v25  ;;  %v8513_v8 = vrot.slane %v4346_v25, %v7693_v41  ;;  %v6460_v30 = vadd.f32 %v6459_v39, %v8405_v29  ;;  %v3535_v12 = vadd.f32 %v8385_v14, %v6457_v40 }
 0x19c   : > { %v8516_v3 = vrot.slane %v4347_v55, %v7693_v41  ;;  %v4381_v61 = vcombine.high %v3595_v26, %v3595_v26  ;;  %v4388_v57 = vrot.slane %v3595_v26, %v7693_v41  ;;  %v6500_v62 = vadd.f32 %v6499_v34, %v8425_v1  ;;  %v6561_v58 = vpop.f32.mrf.mxu1 }
 0x19d   : > { %v8525_v33 = vrot.slane %v4348_v37, %v7693_v41  ;;  %v3538_v25 = vadd.f32 %v8385_v14, %v6460_v30  ;;  %v6519_v55 = vadd.f32 %v6518_v7, %v6517_v43  ;;  %v3600_v26 = vadd.f32 %v6497_v54, %v3535_v12 }
 0x19e   : > { %v4395_v39 = vrot.slane %v4381_v61, %v7693_v41  ;;  %v4396_v37 = vcombine.high %v4388_v57, %v4388_v57  ;;  %v6559_v19 = vadd.f32 %v6558_v63, %v6557_v6  ;;  %v8545_v30 = vrot.slane %v4388_v57, %v7693_v41  ;;  %v6563_v1 = vpop.f32.mrf.mxu1 }
 0x19f   : > { %v3603_v34 = vadd.f32 %v6500_v62, %v3538_v25  ;;  %v4033_v40 = vadd.f32 %v8385_v14, %v6519_v55  ;;  %v6522_v7 = vadd.f32 %v6521_v10, %v6520_v60  ;;  %v4430_v29 = vcombine.high %v3600_v26, %v3600_v26  ;;  %v6523_v10 = vpop.f32.mrf.mxu0 }
 0x1a0   : > { %v4397_v52 = vcombine.high %v4395_v39, %v4395_v39  ;;  %v8548_v43 = vrot.slane %v4395_v39, %v7693_v41  ;;  %v4437_v61 = vrot.slane %v3600_v26, %v7693_v41  ;;  %v8553_v62 = vrot.slane %v4396_v37, %v7693_v41 }
 0x1a1   : > { %v4479_v54 = vcombine.high %v3603_v34, %v3603_v34  ;;  %v4486_v12 = vrot.slane %v3603_v34, %v7693_v41  ;;  %v4098_v63 = vadd.f32 %v6559_v19, %v4033_v40  ;;  %v6562_v25 = vadd.f32 %v6561_v58, %v6560_v17  ;;  %v6524_v40 = vpop.f32.mrf.mxu0 }
 0x1a2   : > { %v8556_v6 = vrot.slane %v4397_v52, %v7693_v41  ;;  %v4444_v57 = vrot.slane %v4430_v29, %v7693_v41  ;;  %v4445_v55 = vcombine.high %v4437_v61, %v4437_v61  ;;  %v8560_v39 = vrot.slane %v4437_v61, %v7693_v41 }
 0x1a3   : > { %v4493_v60 = vrot.slane %v4479_v54, %v7693_v41  ;;  %v4494_v34 = vcombine.high %v4486_v12, %v4486_v12  ;;  %v8566_v37 = vrot.slane %v4486_v12, %v7693_v41  ;;  %v4600_v52 = vcombine.high %v4098_v63, %v4098_v63 }
 0x1a4   : > { %v4446_v17 = vcombine.high %v4444_v57, %v4444_v57  ;;  %v8571_v58 = vrot.slane %v4444_v57, %v7693_v41  ;;  %v8574_v29 = vrot.slane %v4445_v55, %v7693_v41  ;;  %v4607_v55 = vrot.slane %v4098_v63, %v7693_v41 }
 0x1a5   : > { %v4495_v54 = vcombine.high %v4493_v60, %v4493_v60  ;;  %v8581_v12 = vrot.slane %v4493_v60, %v7693_v41  ;;  %v8586_v26 = vrot.slane %v4494_v34, %v7693_v41  ;;  %v4614_v19 = vrot.slane %v4600_v52, %v7693_v41 }
 0x1a6   : > { %v8592_v46 = vrot.slane %v4446_v17, %v7693_v41  ;;  %v4615_v44 = vcombine.high %v4607_v55, %v4607_v55  ;;  %v4623_v57 = vrot.slane %v4607_v55, %v7693_v41  ;;  %v4036_v63 = vadd.f32 %v8385_v14, %v6522_v7 }
 0x1a7   : > { %v8600_v34 = vrot.slane %v4495_v54, %v7693_v41  ;;  %v4616_v53 = vcombine.high %v4614_v19, %v4614_v19  ;;  %v4630_v5 = vrot.slane %v4614_v19, %v7693_v41  ;;  %v6525_v60 = vadd.f32 %v6524_v40, %v6523_v10  ;;  %v6564_v54 = vpop.f32.mrf.mxu1  ;;  %v6526_v10 = vpop.f32.mrf.mxu0 }
 0x1a8   : > { %v4637_v4 = vrot.slane %v4615_v44, %v7693_v41  ;;  %v4645_v61 = vcombine.high %v4623_v57, %v4623_v57  ;;  %v4995_v52 = vrot.slane %v4623_v57, %v7705_v23  ;;  %v4101_v56 = vadd.f32 %v6562_v25, %v4036_v63 }
 0x1a9   : > { %v4644_v21 = vrot.slane %v4616_v53, %v7693_v41  ;;  %v4646_v20 = vcombine.high %v4630_v5, %v4630_v5  ;;  %v5011_v55 = vrot.slane %v4630_v5, %v7705_v23  ;;  %v4041_v7 = vadd.f32 %v8385_v14, %v6525_v60  ;;  %v8627_v63 = vpop.f32.mrf.mxu1 }
 0x1aa   : > { %v4647_v42 = vcombine.high %v4637_v4, %v4637_v4  ;;  %v4999_v17 = vrot.slane %v4637_v4, %v7705_v23  ;;  %v5003_v19 = vrot.slane %v4645_v61, %v7705_v23  ;;  %v5312_v44 = vsel %vm2643_vm6, %v8398_v32, %v4995_v52 }
 0x1ab   : > { %v4648_v40 = vcombine.high %v4644_v21, %v4644_v21  ;;  %v5015_v25 = vrot.slane %v4644_v21, %v7705_v23  ;;  %v5019_v57 = vrot.slane %v4646_v20, %v7705_v23  ;;  %v5316_v53 = vsel %vm2643_vm6, %v8409_v15, %v5011_v55 }
 0x1ac   : > { %v5007_v5 = vrot.slane %v4647_v42, %v7705_v23  ;;  %v5313_v60 = vsel %vm2643_vm6, %v8412_v48, %v4999_v17  ;;  %v5314_v4 = vsel %vm2643_vm6, %v4181_v2, %v5003_v19  ;;  %v4649_v61 = vcombine.high %v4101_v56, %v4101_v56  ;;  %v6527_v19 = vpop.f32.mrf.mxu0 }
 0x1ad   : > { %v5023_v21 = vrot.slane %v4648_v40, %v7705_v23  ;;  %v5317_v20 = vsel %vm2643_vm6, %v8417_v51, %v5015_v25  ;;  %v5318_v42 = vsel %vm2643_vm6, %v4182_v31, %v5019_v57  ;;  %v5440_v52 = vcombine.low %v5312_v44, %v5313_v60 }
 0x1ae   : > { %v5315_v32 = vsel %vm2643_vm6, %v4183_v28, %v5007_v5  ;;  %v5457_v2 = vcombine.low %v5316_v53, %v5317_v20  ;;  %v4656_v17 = vrot.slane %v4101_v56, %v7693_v41  ;;  %v4663_v55 = vrot.slane %v4649_v61, %v7693_v41  ;;  %v6567_v53 = vpop.f32.mrf.mxu1  ;;  %v6529_v61 = vpop.f32.mrf.mxu0 }
 0x1af   : > { %v5319_v40 = vsel %vm2643_vm6, %v4184_v49, %v5023_v21  ;;  %v5441_v15 = vcombine.low %v5314_v4, %v5315_v32  ;;  %v5448_v31 = vrot.slane %v5440_v52, %v7708_v16  ;;  %v6565_v44 = vadd.f32 %v6564_v54, %v6563_v1 }
 0x1b0   : > { %v5458_v25 = vcombine.low %v5318_v42, %v5319_v40  ;;  %v5465_v48 = vrot.slane %v5457_v2, %v7708_v16  ;;  %v4664_v57 = vcombine.high %v4656_v17, %v4656_v17  ;;  %v4665_v28 = vcombine.high %v4663_v55, %v4663_v55 }
 0x1b1   : > { %v5455_v56 = vrot.slane %v5441_v15, %v7708_v16  ;;  %v4672_v5 = vrot.slane %v4656_v17, %v7693_v41  ;;  %v4679_v60 = vrot.slane %v4663_v55, %v7693_v41  ;;  %v4106_v51 = vadd.f32 %v6565_v44, %v4041_v7  ;;  %v8656_v7 = vpop.f32.mrf.mxu1 }
 0x1b2   : > { %v5472_v49 = vrot.slane %v5458_v25, %v7708_v16  ;;  %v4686_v4 = vrot.slane %v4664_v57, %v7693_v41  ;;  %v4693_v1 = vrot.slane %v4665_v28, %v7693_v41  ;;  %v6528_v54 = vadd.f32 %v6527_v19, %v6526_v10  ;;  %v6530_v57 = vpop.f32.mrf.mxu0 }
 0x1b3   : > { %v5456_v21 = vcombine.low %v5448_v31, %v5455_v56  ;;  %v4694_v20 = vcombine.high %v4672_v5, %v4672_v5  ;;  %v4695_v42 = vcombine.high %v4679_v60, %v4679_v60  ;;  %v5027_v52 = vrot.slane %v4672_v5, %v7705_v23 }
 0x1b4   : > { %v5473_v32 = vcombine.low %v5465_v48, %v5472_v49  ;;  %v4696_v2 = vcombine.high %v4686_v4, %v4686_v4  ;;  %v4697_v17 = vcombine.high %v4693_v1, %v4693_v1  ;;  %v5031_v55 = vrot.slane %v4686_v4, %v7705_v23 }
 0x1b5   : > { %6239 = vst [vmem:[%s7967_s30 + $0x10] sm:$0xff] %v5456_v21  ;;  %v5035_v40 = vrot.slane %v4694_v20, %v7705_v23  ;;  %v5043_v15 = vrot.slane %v4679_v60, %v7705_v23  ;;  %v5047_v10 = vrot.slane %v4693_v1, %v7705_v23  ;;  %v5051_v19 = vrot.slane %v4695_v42, %v7705_v23  ;;  %v8690_v20 = vpop.f32.mrf.mxu1 }
 0x1b6   : > { %6240 = vst [vmem:[%s7967_s30 + $0x18] sm:$0xff] %v5473_v32  ;;  %v5039_v31 = vrot.slane %v4696_v2, %v7705_v23  ;;  %v5055_v44 = vrot.slane %v4697_v17, %v7705_v23  ;;  %v5320_v25 = vsel %vm2643_vm6, %v8429_v47, %v5027_v52  ;;  %v5321_v48 = vsel %vm2643_vm6, %v8444_v22, %v5031_v55 }
 0x1b7   : > { %v5322_v28 = vsel %vm2643_vm6, %v4230_v59, %v5035_v40  ;;  %v5324_v56 = vsel %vm2643_vm6, %v8441_v38, %v5043_v15  ;;  %v5325_v5 = vsel %vm2643_vm6, %v8457_v50, %v5047_v10  ;;  %v5326_v60 = vsel %vm2643_vm6, %v4231_v24, %v5051_v19 }
 0x1b8   : > { %v9115_v49 = vcombine.high %v8444_v22, %v8444_v22  ;;  %v9116_v47 = vcombine.high %v8457_v50, %v8457_v50  ;;  %v5474_v1 = vcombine.low %v5320_v25, %v5321_v48  ;;  %v5491_v21 = vcombine.low %v5324_v56, %v5325_v5  ;;  %v8697_v50 = vpop.f32.mrf.mxu0 }
 0x1b9   : > { %v4698_v32 = vcombine.high %v4106_v51, %v4106_v51  ;;  %v4705_v38 = vrot.slane %v4106_v51, %v7693_v41  ;;  %v4044_v2 = vadd.f32 %v8385_v14, %v6528_v54  ;;  %v6568_v17 = vadd.f32 %v6567_v53, %v8627_v63  ;;  %v8707_v63 = vpop.f32.mrf.mxu1 }
 0x1ba   : > { %v5323_v4 = vsel %vm2643_vm6, %v9115_v49, %v5039_v31  ;;  %v5327_v59 = vsel %vm2643_vm6, %v9116_v47, %v5055_v44  ;;  %v5482_v24 = vrot.slane %v5474_v1, %v7708_v16  ;;  %v5499_v22 = vrot.slane %v5491_v21, %v7708_v16  ;;  %v8712_v49 = vpop.f32.mrf.mxu0 }
 0x1bb   : > { %v5475_v42 = vcombine.low %v5322_v28, %v5323_v4  ;;  %v5492_v52 = vcombine.low %v5326_v60, %v5327_v59  ;;  %v4712_v15 = vrot.slane %v4698_v32, %v7693_v41  ;;  %v4713_v10 = vcombine.high %v4705_v38, %v4705_v38 }
 0x1bc   : > { %v4526_v51 = vcombine.high %v8586_v26, %v8586_v26  ;;  %v4721_v19 = vrot.slane %v4705_v38, %v7693_v41  ;;  %v4109_v31 = vadd.f32 %v6568_v17, %v4044_v2  ;;  %v8705_v54 = vadd.f32 %v6530_v57, %v6529_v61 }
 0x1bd   : > { %v5489_v55 = vrot.slane %v5475_v42, %v7708_v16  ;;  %v5506_v40 = vrot.slane %v5492_v52, %v7708_v16  ;;  %v4714_v25 = vcombine.high %v4712_v15, %v4712_v15  ;;  %v4728_v48 = vrot.slane %v4712_v15, %v7693_v41  ;;  %v8723_v52 = vpop.f32.mrf.mxu1 }
 0x1be   : > { %v4735_v28 = vrot.slane %v4713_v10, %v7693_v41  ;;  %v4743_v56 = vcombine.high %v4721_v19, %v4721_v19  ;;  %v5059_v5 = vrot.slane %v4721_v19, %v7705_v23  ;;  %v4747_v60 = vcombine.high %v4109_v31, %v4109_v31  ;;  %v6535_v10 = vpop.f32.mrf.mxu0 }
 0x1bf   : > { %v5490_v53 = vcombine.low %v5482_v24, %v5489_v55  ;;  %v5507_v44 = vcombine.low %v5499_v22, %v5506_v40  ;;  %v4742_v61 = vrot.slane %v4714_v25, %v7693_v41  ;;  %v4744_v57 = vcombine.high %v4728_v48, %v4728_v48 }
 0x1c0   : > { %v5075_v4 = vrot.slane %v4728_v48, %v7705_v23  ;;  %v4754_v47 = vrot.slane %v4109_v31, %v7693_v41  ;;  %v4745_v59 = vcombine.high %v4735_v28, %v4735_v28  ;;  %v5063_v1 = vrot.slane %v4735_v28, %v7705_v23 }
 0x1c1   : > { %6241 = vst [vmem:[%s7967_s30 + $0x30] sm:$0xff] %v5490_v53  ;;  %6242 = vst [vmem:[%s7967_s30 + $0x38] sm:$0xff] %v5507_v44  ;;  %v5067_v21 = vrot.slane %v4743_v56, %v7705_v23  ;;  %v5328_v42 = vsel %vm2643_vm6, %v8463_v36, %v5059_v5  ;;  %v4746_v32 = vcombine.high %v4742_v61, %v4742_v61 }
 0x1c2   : > { %v5079_v38 = vrot.slane %v4742_v61, %v7705_v23  ;;  %v5083_v24 = vrot.slane %v4744_v57, %v7705_v23  ;;  %v5332_v22 = vsel %vm2643_vm6, %v8469_v0, %v5075_v4  ;;  %v5071_v2 = vrot.slane %v4745_v59, %v7705_v23 }
 0x1c3   : > { %v5329_v17 = vsel %vm2643_vm6, %v8472_v9, %v5063_v1  ;;  %v9117_v55 = vcombine.high %v8463_v36, %v8463_v36  ;;  %v4761_v15 = vrot.slane %v4747_v60, %v7693_v41  ;;  %v5087_v19 = vrot.slane %v4746_v32, %v7705_v23  ;;  %v6575_v60 = vpop.f32.mrf.mxu1  ;;  %v6536_v32 = vpop.f32.mrf.mxu0 }
 0x1c4   : > { %v5333_v31 = vsel %vm2643_vm6, %v8481_v45, %v5079_v38  ;;  %v9118_v53 = vcombine.high %v8469_v0, %v8469_v0  ;;  %v5508_v25 = vcombine.low %v5328_v42, %v5329_v17  ;;  %v9119_v48 = vcombine.high %v8472_v9, %v8472_v9 }
 0x1c5   : > { %v5330_v40 = vsel %vm2643_vm6, %v9117_v55, %v5067_v21  ;;  %v5525_v28 = vcombine.low %v5332_v22, %v5333_v31  ;;  %v4762_v56 = vcombine.high %v4754_v47, %v4754_v47  ;;  %v4763_v5 = vcombine.high %v4761_v15, %v4761_v15 }
 0x1c6   : > { %v5334_v44 = vsel %vm2643_vm6, %v9118_v53, %v5083_v24  ;;  %v5331_v36 = vsel %vm2643_vm6, %v9119_v48, %v5071_v2  ;;  %v9120_v61 = vcombine.high %v8481_v45, %v8481_v45  ;;  %v5516_v0 = vrot.slane %v5508_v25, %v7708_v16 }
 0x1c7   : > { %v5509_v4 = vcombine.low %v5330_v40, %v5331_v36  ;;  %v4770_v59 = vrot.slane %v4754_v47, %v7693_v41  ;;  %v5533_v21 = vrot.slane %v5525_v28, %v7708_v16  ;;  %v4777_v9 = vrot.slane %v4761_v15, %v7693_v41  ;;  %v6576_v40 = vpop.f32.mrf.mxu1  ;;  %v6538_v28 = vpop.f32.mrf.mxu0 }
 0x1c8   : > { %v5335_v57 = vsel %vm2643_vm6, %v9120_v61, %v5087_v19  ;;  %v4784_v42 = vrot.slane %v4762_v56, %v7693_v41  ;;  %v4791_v24 = vrot.slane %v4763_v5, %v7693_v41 }
 0x1c9   : > { %v5526_v1 = vcombine.low %v5334_v44, %v5335_v57  ;;  %v5523_v38 = vrot.slane %v5509_v4, %v7708_v16  ;;  %v4792_v45 = vcombine.high %v4770_v59, %v4770_v59  ;;  %v5091_v22 = vrot.slane %v4770_v59, %v7705_v23 }
 0x1ca   : > { %v4793_v17 = vcombine.high %v4777_v9, %v4777_v9  ;;  %v4794_v47 = vcombine.high %v4784_v42, %v4784_v42  ;;  %v5095_v55 = vrot.slane %v4784_v42, %v7705_v23  ;;  %v4795_v19 = vcombine.high %v4791_v24, %v4791_v24 }
 0x1cb   : > { %v5540_v2 = vrot.slane %v5526_v1, %v7708_v16  ;;  %v5524_v15 = vcombine.low %v5516_v0, %v5523_v38  ;;  %v5099_v31 = vrot.slane %v4792_v45, %v7705_v23  ;;  %v5107_v53 = vrot.slane %v4777_v9, %v7705_v23 }
 0x1cc   : > { %v5103_v25 = vrot.slane %v4794_v47, %v7705_v23  ;;  %v5111_v48 = vrot.slane %v4791_v24, %v7705_v23  ;;  %v5115_v36 = vrot.slane %v4793_v17, %v7705_v23  ;;  %v5119_v56 = vrot.slane %v4795_v19, %v7705_v23 }
 0x1cd   : > { %v5541_v44 = vcombine.low %v5533_v21, %v5540_v2  ;;  %6243 = vst [vmem:[%s7967_s30 + $0x50] sm:$0xff] %v5524_v15  ;;  %v5336_v5 = vsel %vm2643_vm6, %v8476_v13, %v5091_v22  ;;  %v5337_v61 = vsel %vm2643_vm6, %v8493_v35, %v5095_v55  ;;  %v9121_v57 = vcombine.high %v8476_v13, %v8476_v13  ;;  %v6578_v13 = vpop.f32.mrf.mxu1  ;;  %v6539_v55 = vpop.f32.mrf.mxu0 }
 0x1ce   : > { %v9122_v0 = vcombine.high %v8493_v35, %v8493_v35  ;;  %v5340_v1 = vsel %vm2643_vm6, %v8490_v18, %v5107_v53  ;;  %v5341_v21 = vsel %vm2643_vm6, %v8508_v27, %v5111_v48  ;;  %v9123_v9 = vcombine.high %v8490_v18, %v8490_v18 }
 0x1cf   : > { %v5338_v4 = vsel %vm2643_vm6, %v9121_v57, %v5099_v31  ;;  %6244 = vst [vmem:[%s7967_s30 + $0x58] sm:$0xff] %v5541_v44  ;;  %v9124_v38 = vcombine.high %v8508_v27, %v8508_v27  ;;  %v5542_v35 = vcombine.low %v5336_v5, %v5337_v61  ;;  %v5559_v22 = vcombine.low %v5340_v1, %v5341_v21 }
 0x1d0   : > { %v5339_v59 = vsel %vm2643_vm6, %v9122_v0, %v5103_v25  ;;  %v5342_v42 = vsel %vm2643_vm6, %v9123_v9, %v5115_v36  ;;  %v4049_v17 = vadd.f32 %v8385_v14, %v8705_v54  ;;  %v6571_v47 = vadd.f32 %v8690_v20, %v8656_v7  ;;  %v6579_v20 = vpop.f32.mrf.mxu1 }
 0x1d1   : > { %v5343_v24 = vsel %vm2643_vm6, %v9124_v38, %v5119_v56  ;;  %v5543_v45 = vcombine.low %v5338_v4, %v5339_v59  ;;  %v6534_v18 = vadd.f32 %v8712_v49, %v8697_v50  ;;  %v5550_v15 = vrot.slane %v5542_v35, %v7708_v16 }
 0x1d2   : > { %v5560_v2 = vcombine.low %v5342_v42, %v5343_v24  ;;  %v6574_v19 = vadd.f32 %v8723_v52, %v8707_v63  ;;  %v6537_v31 = vadd.f32 %v6536_v32, %v6535_v10  ;;  %v5567_v53 = vrot.slane %v5559_v22, %v7708_v16 }
 0x1d3   : > { %v5557_v27 = vrot.slane %v5543_v45, %v7708_v16  ;;  %v4114_v44 = vadd.f32 %v6571_v47, %v4049_v17  ;;  %v4052_v7 = vadd.f32 %v8385_v14, %v6534_v18  ;;  %v6577_v25 = vadd.f32 %v6576_v40, %v6575_v60 }
 0x1d4   : > { %v5574_v54 = vrot.slane %v5560_v2, %v7708_v16  ;;  %v4057_v49 = vadd.f32 %v8385_v14, %v6537_v31  ;;  %v6540_v48 = vadd.f32 %v6539_v55, %v6538_v28  ;;  %v4478_v10 = vcombine.high %v8592_v46, %v8592_v46 }
 0x1d5   : > { %v5558_v50 = vcombine.low %v5550_v15, %v5557_v27  ;;  %v4796_v56 = vcombine.high %v4114_v44, %v4114_v44  ;;  %v4803_v63 = vrot.slane %v4114_v44, %v7693_v41  ;;  %v4117_v52 = vadd.f32 %v6574_v19, %v4052_v7 }
 0x1d6   : > { %v5575_v36 = vcombine.low %v5567_v53, %v5574_v54  ;;  %v8812_v32 = vadd.f32 %v6577_v25, %v4057_v49  ;;  %v4060_v5 = vadd.f32 %v8385_v14, %v6540_v48  ;;  %v6580_v61 = vadd.f32 %v6579_v20, %v6578_v13 }
 0x1d7   : > { %6245 = vst [vmem:[%s7967_s30 + $0x70] sm:$0xff] %v5558_v50  ;;  %v4810_v57 = vrot.slane %v4796_v56, %v7693_v41  ;;  %v4811_v4 = vcombine.high %v4803_v63, %v4803_v63  ;;  %v4819_v60 = vrot.slane %v4803_v63, %v7693_v41  ;;  %v4845_v40 = vcombine.high %v4117_v52, %v4117_v52 }
 0x1d8   : > { %6246 = vst [vmem:[%s7967_s30 + $0x78] sm:$0xff] %v5575_v36  ;;  %v4852_v28 = vrot.slane %v4117_v52, %v7693_v41  ;;  %v4894_v0 = vcombine.high %v8812_v32, %v8812_v32  ;;  %v8823_v59 = vrot.slane %v8812_v32, %v7693_v41  ;;  %v8825_v1 = vadd.f32 %v6580_v61, %v4060_v5 }
 0x1d9   : > { %v4812_v14 = vcombine.high %v4810_v57, %v4810_v57  ;;  %v4826_v21 = vrot.slane %v4810_v57, %v7693_v41  ;;  %v4833_v9 = vrot.slane %v4811_v4, %v7693_v41  ;;  %v4841_v42 = vcombine.high %v4819_v60, %v4819_v60 }
 0x1da   : > { %v5123_v13 = vrot.slane %v4819_v60, %v7705_v23  ;;  %v4859_v38 = vrot.slane %v4845_v40, %v7693_v41  ;;  %v4860_v24 = vcombine.high %v4852_v28, %v4852_v28  ;;  %v4868_v35 = vrot.slane %v4852_v28, %v7693_v41 }
 0x1db   : > { %v4840_v45 = vrot.slane %v4812_v14, %v7693_v41  ;;  %v4842_v22 = vcombine.high %v4826_v21, %v4826_v21  ;;  %v4843_v2 = vcombine.high %v4833_v9, %v4833_v9  ;;  %v5127_v17 = vrot.slane %v4833_v9, %v7705_v23 }
 0x1dc   : > { %v5131_v47 = vrot.slane %v4841_v42, %v7705_v23  ;;  %v5139_v18 = vrot.slane %v4826_v21, %v7705_v23  ;;  %v5344_v55 = vsel %vm2643_vm6, %v8497_v11, %v5123_v13  ;;  %v4861_v15 = vcombine.high %v4859_v38, %v4859_v38 }
 0x1dd   : > { %v4844_v27 = vcombine.high %v4840_v45, %v4840_v45  ;;  %v5135_v19 = vrot.slane %v4843_v2, %v7705_v23  ;;  %v5143_v31 = vrot.slane %v4840_v45, %v7705_v23  ;;  %v5147_v53 = vrot.slane %v4842_v22, %v7705_v23 }
 0x1de   : > { %v5345_v54 = vsel %vm2643_vm6, %v8516_v3, %v5127_v17  ;;  %v9125_v44 = vcombine.high %v8497_v11, %v8497_v11  ;;  %v5348_v20 = vsel %vm2643_vm6, %v8513_v8, %v5139_v18  ;;  %v4875_v50 = vrot.slane %v4859_v38, %v7693_v41 }
 0x1df   : > { %v5151_v49 = vrot.slane %v4844_v27, %v7705_v23  ;;  %v9126_v25 = vcombine.high %v8516_v3, %v8516_v3  ;;  %v5349_v36 = vsel %vm2643_vm6, %v8525_v33, %v5143_v31  ;;  %v9127_v11 = vcombine.high %v8513_v8, %v8513_v8 }
 0x1e0   : > { %v5346_v7 = vsel %vm2643_vm6, %v9125_v44, %v5131_v47  ;;  %v5576_v63 = vcombine.low %v5344_v55, %v5345_v54  ;;  %v5593_v5 = vcombine.low %v5348_v20, %v5349_v36  ;;  %v4882_v61 = vrot.slane %v4860_v24, %v7693_v41 }
 0x1e1   : > { %v5347_v48 = vsel %vm2643_vm6, %v9126_v25, %v5135_v19  ;;  %v5350_v56 = vsel %vm2643_vm6, %v9127_v11, %v5147_v53  ;;  %v9128_v57 = vcombine.high %v8525_v33, %v8525_v33  ;;  %v4889_v4 = vrot.slane %v4861_v15, %v7693_v41 }
 0x1e2   : > { %v5577_v52 = vcombine.low %v5346_v7, %v5347_v48  ;;  %v4890_v60 = vcombine.high %v4868_v35, %v4868_v35  ;;  %v4891_v40 = vcombine.high %v4875_v50, %v4875_v50  ;;  %v5584_v28 = vrot.slane %v5576_v63, %v7708_v16 }
 0x1e3   : > { %v5351_v3 = vsel %vm2643_vm6, %v9128_v57, %v5151_v49  ;;  %v5601_v21 = vrot.slane %v5593_v5, %v7708_v16  ;;  %v4892_v9 = vcombine.high %v4882_v61, %v4882_v61  ;;  %v4893_v42 = vcombine.high %v4889_v4, %v4889_v4 }
 0x1e4   : > { %v5591_v8 = vrot.slane %v5577_v52, %v7708_v16  ;;  %v5594_v14 = vcombine.low %v5350_v56, %v5351_v3  ;;  %v5155_v13 = vrot.slane %v4868_v35, %v7705_v23  ;;  %v5159_v33 = vrot.slane %v4882_v61, %v7705_v23 }
 0x1e5   : > { %v5163_v45 = vrot.slane %v4890_v60, %v7705_v23  ;;  %v5171_v22 = vrot.slane %v4875_v50, %v7705_v23  ;;  %v5167_v2 = vrot.slane %v4892_v9, %v7705_v23  ;;  %v5175_v17 = vrot.slane %v4889_v4, %v7705_v23 }
 0x1e6   : > { %v5592_v38 = vcombine.low %v5584_v28, %v5591_v8  ;;  %v5608_v24 = vrot.slane %v5594_v14, %v7708_v16  ;;  %v5179_v47 = vrot.slane %v4891_v40, %v7705_v23  ;;  %v5183_v18 = vrot.slane %v4893_v42, %v7705_v23 }
 0x1e7   : > { %v5352_v35 = vsel %vm2643_vm6, %v8545_v30, %v5155_v13  ;;  %v5353_v15 = vsel %vm2643_vm6, %v8553_v62, %v5159_v33  ;;  %v9129_v27 = vcombine.high %v8545_v30, %v8545_v30  ;;  %v9130_v31 = vcombine.high %v8553_v62, %v8553_v62 }
 0x1e8   : > { %v5609_v55 = vcombine.low %v5601_v21, %v5608_v24  ;;  %6247 = vst [vmem:[%s7967_s30 + $0x90] sm:$0xff] %v5592_v38  ;;  %v5356_v54 = vsel %vm2643_vm6, %v8548_v43, %v5171_v22  ;;  %v5357_v44 = vsel %vm2643_vm6, %v8556_v6, %v5175_v17  ;;  %v9131_v7 = vcombine.high %v8548_v43, %v8548_v43 }
 0x1e9   : > { %v5354_v19 = vsel %vm2643_vm6, %v9129_v27, %v5163_v45  ;;  %v5355_v53 = vsel %vm2643_vm6, %v9130_v31, %v5167_v2  ;;  %v9132_v30 = vcombine.high %v8556_v6, %v8556_v6  ;;  %v5610_v62 = vcombine.low %v5352_v35, %v5353_v15 }
 0x1ea   : > { %v5358_v20 = vsel %vm2643_vm6, %v9131_v7, %v5179_v47  ;;  %6248 = vst [vmem:[%s7967_s30 + $0x98] sm:$0xff] %v5609_v55  ;;  %v5611_v49 = vcombine.low %v5354_v19, %v5355_v53  ;;  %v5627_v25 = vcombine.low %v5356_v54, %v5357_v44  ;;  %v4908_v36 = vrot.slane %v4894_v0, %v7693_v41 }
 0x1eb   : > { %v5359_v50 = vsel %vm2643_vm6, %v9132_v30, %v5183_v18  ;;  %v4909_v43 = vcombine.high %v8823_v59, %v8823_v59  ;;  %v4917_v11 = vrot.slane %v8823_v59, %v7693_v41  ;;  %v5618_v56 = vrot.slane %v5610_v62, %v7708_v16 }
 0x1ec   : > { %v5628_v48 = vcombine.low %v5358_v20, %v5359_v50  ;;  %v5625_v6 = vrot.slane %v5611_v49, %v7708_v16  ;;  %v5635_v63 = vrot.slane %v5627_v25, %v7708_v16  ;;  %v4943_v52 = vcombine.high %v8825_v1, %v8825_v1 }
 0x1ed   : > { %v4910_v32 = vcombine.high %v4908_v36, %v4908_v36  ;;  %v4924_v0 = vrot.slane %v4908_v36, %v7693_v41  ;;  %v4931_v61 = vrot.slane %v4909_v43, %v7693_v41  ;;  %v4939_v59 = vcombine.high %v4917_v11, %v4917_v11 }
 0x1ee   : > { %v5642_v5 = vrot.slane %v5628_v48, %v7708_v16  ;;  %v5626_v57 = vcombine.low %v5618_v56, %v5625_v6  ;;  %v5187_v3 = vrot.slane %v4917_v11, %v7705_v23  ;;  %v4950_v4 = vrot.slane %v8825_v1, %v7693_v41 }
 0x1ef   : > { %v4938_v40 = vrot.slane %v4910_v32, %v7693_v41  ;;  %v4940_v28 = vcombine.high %v4924_v0, %v4924_v0  ;;  %v4941_v8 = vcombine.high %v4931_v61, %v4931_v61  ;;  %v5191_v14 = vrot.slane %v4931_v61, %v7705_v23 }
 0x1f0   : > { %v5643_v60 = vcombine.low %v5635_v63, %v5642_v5  ;;  %6249 = vst [vmem:[%s7967_s30 + $0xb0] sm:$0xff] %v5626_v57  ;;  %v5195_v21 = vrot.slane %v4939_v59, %v7705_v23  ;;  %v5203_v9 = vrot.slane %v4924_v0, %v7705_v23  ;;  %v5360_v42 = vsel %vm2643_vm6, %v8560_v39, %v5187_v3 }
 0x1f1   : > { %v4942_v13 = vcombine.high %v4938_v40, %v4938_v40  ;;  %v5199_v33 = vrot.slane %v4941_v8, %v7705_v23  ;;  %v5207_v1 = vrot.slane %v4938_v40, %v7705_v23  ;;  %v5211_v38 = vrot.slane %v4940_v28, %v7705_v23 }
 0x1f2   : > { %6250 = vst [vmem:[%s7967_s30 + $0xb8] sm:$0xff] %v5643_v60  ;;  %v5361_v24 = vsel %vm2643_vm6, %v8574_v29, %v5191_v14  ;;  %v9133_v45 = vcombine.high %v8560_v39, %v8560_v39  ;;  %v5364_v2 = vsel %vm2643_vm6, %v8571_v58, %v5203_v9  ;;  %v4957_v17 = vrot.slane %v4943_v52, %v7693_v41 }
 0x1f3   : > { %v5215_v47 = vrot.slane %v4942_v13, %v7705_v23  ;;  %v9134_v18 = vcombine.high %v8574_v29, %v8574_v29  ;;  %v5365_v35 = vsel %vm2643_vm6, %v8592_v46, %v5207_v1  ;;  %v9135_v39 = vcombine.high %v8571_v58, %v8571_v58 }
 0x1f4   : > { %v5362_v22 = vsel %vm2643_vm6, %v9133_v45, %v5195_v21  ;;  %v5644_v27 = vcombine.low %v5360_v42, %v5361_v24  ;;  %v5661_v31 = vcombine.low %v5364_v2, %v5365_v35  ;;  %v4958_v53 = vcombine.high %v4950_v4, %v4950_v4 }
 0x1f5   : > { %v5363_v55 = vsel %vm2643_vm6, %v9134_v18, %v5199_v33  ;;  %v5366_v15 = vsel %vm2643_vm6, %v9135_v39, %v5211_v38  ;;  %v5367_v54 = vsel %vm2643_vm6, %v4478_v10, %v5215_v47  ;;  %v4959_v29 = vcombine.high %v4957_v17, %v4957_v17 }
 0x1f6   : > { %v5645_v19 = vcombine.low %v5362_v22, %v5363_v55  ;;  %v4966_v44 = vrot.slane %v4950_v4, %v7693_v41  ;;  %v4973_v7 = vrot.slane %v4957_v17, %v7693_v41  ;;  %v5652_v20 = vrot.slane %v5644_v27, %v7708_v16 }
 0x1f7   : > { %v5662_v30 = vcombine.low %v5366_v15, %v5367_v54  ;;  %v5669_v50 = vrot.slane %v5661_v31, %v7708_v16  ;;  %v4980_v62 = vrot.slane %v4958_v53, %v7693_v41  ;;  %v4987_v49 = vrot.slane %v4959_v29, %v7693_v41 }
 0x1f8   : > { %v5659_v58 = vrot.slane %v5645_v19, %v7708_v16  ;;  %v4988_v46 = vcombine.high %v4966_v44, %v4966_v44  ;;  %v4989_v25 = vcombine.high %v4973_v7, %v4973_v7  ;;  %v5219_v36 = vrot.slane %v4966_v44, %v7705_v23 }
 0x1f9   : > { %v5676_v48 = vrot.slane %v5662_v30, %v7708_v16  ;;  %v5235_v43 = vrot.slane %v4973_v7, %v7705_v23  ;;  %v4990_v11 = vcombine.high %v4980_v62, %v4980_v62  ;;  %v4991_v56 = vcombine.high %v4987_v49, %v4987_v49 }
 0x1fa   : > { %v5660_v10 = vcombine.low %v5652_v20, %v5659_v58  ;;  %v5223_v6 = vrot.slane %v4980_v62, %v7705_v23  ;;  %v5227_v63 = vrot.slane %v4988_v46, %v7705_v23  ;;  %v4527_v52 = vcombine.high %v8600_v34, %v8600_v34 }
 0x1fb   : > { %v5677_v41 = vcombine.low %v5669_v50, %v5676_v48  ;;  %v5239_v5 = vrot.slane %v4987_v49, %v7705_v23  ;;  %v5243_v32 = vrot.slane %v4989_v25, %v7705_v23  ;;  %v5231_v0 = vrot.slane %v4990_v11, %v7705_v23 }
 0x1fc   : > { %6251 = vst [vmem:[%s7967_s30 + $0xd0] sm:$0xff] %v5660_v10  ;;  %v5247_v61 = vrot.slane %v4991_v56, %v7705_v23  ;;  %v5368_v57 = vsel %vm2643_vm6, %v8566_v37, %v5219_v36  ;;  %v5369_v59 = vsel %vm2643_vm6, %v8586_v26, %v5223_v6  ;;  %v9136_v3 = vcombine.high %v8566_v37, %v8566_v37 }
 0x1fd   : > { %6252 = vst [vmem:[%s7967_s30 + $0xd8] sm:$0xff] %v5677_v41  ;;  %v5372_v60 = vsel %vm2643_vm6, %v8581_v12, %v5235_v43  ;;  %v5373_v40 = vsel %vm2643_vm6, %v8600_v34, %v5239_v5  ;;  %v5678_v28 = vcombine.low %v5368_v57, %v5369_v59  ;;  %v5371_v23 = vsel %vm2643_vm6, %v4526_v51, %v5231_v0 }
 0x1fe   : > { %v5370_v4 = vsel %vm2643_vm6, %v9136_v3, %v5227_v63  ;;  %v9137_v8 = vcombine.high %v8581_v12, %v8581_v12  ;;  %v5375_v14 = vsel %vm2643_vm6, %v4527_v52, %v5247_v61  ;;  %v5695_v21 = vcombine.low %v5372_v60, %v5373_v40 }
 0x1ff   : > { %v5679_v9 = vcombine.low %v5370_v4, %v5371_v23  ;;  %v5686_v26 = vrot.slane %v5678_v28, %v7708_v16 }
 0x200   : > { %v5374_v37 = vsel %vm2643_vm6, %v9137_v8, %v5243_v32  ;;  %v5703_v51 = vrot.slane %v5695_v21, %v7708_v16 }
 0x201   : > { %v5696_v42 = vcombine.low %v5374_v37, %v5375_v14  ;;  %v5693_v34 = vrot.slane %v5679_v9, %v7708_v16 }
 0x203   : > { %v5710_v12 = vrot.slane %v5696_v42, %v7708_v16  ;;  %v5694_v13 = vcombine.low %v5686_v26, %v5693_v34 }
 0x205   : > { %v5711_v33 = vcombine.low %v5703_v51, %v5710_v12  ;;  %6253 = vst [vmem:[%s7967_s30 + $0xf0] sm:$0xff] %v5694_v13 }
 0x207   : > { %6254 = vst [vmem:[%s7967_s30 + $0xf8] sm:$0xff] %v5711_v33 }
 0x208   : > { %6855 = shalt.err (!%p6852_p5)
}
 0x209   : > { %s6856_s23 = scalar_lea.hbm %s9009_s9, 4096  ;;  %s6860_s28 = scalar_lea.hbm %s9065_s3, 8192 }
 0x20a   : > { %p6857_p6 = scmp.ne.s32.totalorder %s9009_s9, %s6856_s23  ;;  %p6861_p10 = scmp.lt.s32.totalorder %s9009_s9, %s9065_s3 }
 0x20b   : > { %p6862_p11 = scmp.lt.s32.totalorder %s6860_s28, %s6856_s23 }
 0x20c   : > { %p6858_p7 = pnand %p6857_p6, %p6985_p4 }
 0x20d   : > { %p6863_p12 = por %p6862_p11, %p6861_p10 }
 0x20e   : > { %p6859_p9 = pneg %p6858_p7 }
 0x210   : > { %p6864_p13 = pnand %p6863_p12, %p6859_p9 }
 0x212   : > { %6867 = shalt.err (!%p6864_p13)
}
 0x213   : > { %s6923_s4 = smov 128   ;;  %s6924_s5 = smov 8  }
 0x214   : > { %6582 = dma.vmem_to_hbm [thread:$0]  (%p6985_p4), %s9011_s7, 4096, %s9009_s9, %s9017_s15, %s6923_s4, %s6923_s4, %s6924_s5  }
 0x215 PF: > { %p6588_p0 = scmp.ge.s32.totalorder %s6918_s17, 2  ;;  %s5777_s6 = sand.u32 1, %s6898_s12  }
 0x216   : > { %s5778_s8 = scalar_lea.sflag [#allocation4], %s5777_s6 }
 0x217   : > { %p6585_p1 = pnand %p6588_p0, %p6992_p8 }
 0x219   : > { %p6586_p2 = pneg %p6585_p1 }
 0x21b   : > { %6893 = dma.done.wait (%p6586_p2), %s5778_s8, 4096  }
 0x21c   : > { %6895 = vsyncadd (%p6586_p2), %s5778_s8, 4294963200  ;;  %s16_s17 = sadd.s32 1, %s6918_s17   ;;  %s9138_s12 = smov %s6902_s13 }
 0x21d   : > { %p13_p3 = scmp.ge.s32.totalorder %s16_s17, 4   ;;  %s9139_s13 = smov %s6906_s14 }
 0x21e   : > { %s9140_s14 = smov %s6998_s25  ;;  %s9141_s15 = smov %s6914_s16 }
 0x21f   : > { %s9142_s16 = smov %s9144_s20  ;;  %15 = sbr.rel (!%p13_p3) target bundleno = 4 (0x4), region = 72 }
 0x224   :  { %5783 = vsyncpa [#allocation4], 1 }
 0x225   :  { %5785 = vsyncpa [#allocation4 + $0x1], 1 }

</bundles_post_ra>
